<compile_context>
chip_gen: v6e
topology: v6e:2x2x1
jax: 0.10.0
libtpu: 0.0.40
codegen_flags: <defaults>
</compile_context>

<pallas_src>
import math

import jax
import jax.numpy as jnp
from jax.experimental import pallas as pl
from jax.experimental.pallas import tpu as pltpu

NUM_HEADS = 8
N_LAYERS = 3
CONV_K = 7
D_FF = 2048
LN_EPS = 1e-6
ATT_MASK_FILL = -1e9       # MultiHeadedAttention.masked_fill value
SOFTMAX_MASK = -1e30       # util.masked_softmax additive mask value


def _layer_norm(x, g, b):
    """Reference LayerNorm: a*(x-mean)/(std+eps)+b with unbiased std, eps=1e-6."""
    h = x.shape[-1]
    mu = jnp.mean(x, axis=-1, keepdims=True)
    xc = x - mu
    var = jnp.sum(xc * xc, axis=-1, keepdims=True) * (1.0 / (h - 1))
    inv = pl.reciprocal(jnp.sqrt(var) + LN_EPS, approx=True)   # EUP slot
    return xc * inv * g + b


def transformer_output_kernel(
        att_ref, mod_ref, mask_row_ref, mask_col_ref,   # per-batch activations
        watt_ref, wmod_ref, bias_ref,                   # the two logit heads
        conv_w_ref, conv_b_ref,                         # (NL, K, H, H), (NL, 1, H)
        ln_g_ref, ln_b_ref,                             # (NL, 6, 1, H) sublayer norms
        wqkv_ref, bqkv_ref, wo_ref, bo_ref,             # attention
        w1_ref, b1_ref, w2_ref, b2_ref,                 # feed-forward
        lnf_g_ref, lnf_b_ref,                           # final encoder norm
        logp1_ref, logp2_ref,                           # outputs (1, L, 1)
        x_ref, xpad_ref):                               # VMEM scratch
    f32, bf16 = jnp.float32, jnp.bfloat16

    _, L, H = mod_ref.shape
    NL, K = conv_w_ref.shape[0], conv_w_ref.shape[1]
    PAD = K // 2
    NH = NUM_HEADS
    DH = H // NH
    q_scale = 1.0 / math.sqrt(DH)

    # ---- per-grid-step init of persistent VMEM scratch -----------------------
    x_ref[...] = mod_ref[0]                              # (L, H) f32
    xpad_ref[0:PAD, :] = jnp.zeros((PAD, H), f32)        # zero conv halos once
    xpad_ref[PAD + L:PAD + L + PAD, :] = jnp.zeros((PAD, H), f32)

    # ---- 3-layer TransformerEncoder over this batch row -----------------------
    @pl.loop(0, NL)
    def _encoder_layer(layer):
        conv_w = conv_w_ref[layer]      # (K, H, H) bf16
        conv_b = conv_b_ref[layer]      # (1, H)    f32
        ln_g = ln_g_ref[layer]          # (6, 1, H)
        ln_b = ln_b_ref[layer]

        # 4 x [Conv1d(k=7, pad=3) + ReLU, then x = x + LN_s(x)]
        conv_bias = jnp.broadcast_to(conv_b, (L, H))     # hoisted out of s-loop
        for s in range(4):
            xpad_ref[PAD:PAD + L, :] = x_ref[...]        # halos stay zero
            acc = conv_bias
            for k in range(K):   # K shifted (L,H)@(H,H) matmuls -> no im2col buffer
                acc = acc + jnp.dot(xpad_ref[k:k + L, :].astype(bf16), conv_w[k],
                                    preferred_element_type=f32)
            y = jnp.maximum(acc, 0.0)                    # ReLU
            x_ref[...] = y + _layer_norm(y, ln_g[s], ln_b[s])

        # pre-norm multi-head self-attention (batched over all heads)
        x = x_ref[...]
        xn = _layer_norm(x, ln_g[4], ln_b[4])
        qkv = jnp.dot(xn.astype(bf16), wqkv_ref[layer],
                      preferred_element_type=f32) + bqkv_ref[layer]    # (L, 3H)
        q = (qkv[:, 0:H] * q_scale).reshape(L, NH, DH)   # fold 1/sqrt(d_k) into q
        kk = qkv[:, H:2 * H].reshape(L, NH, DH)
        v = qkv[:, 2 * H:3 * H].reshape(L, NH, DH)
        # tiny DH=4 contractions kept in f32 (no bf16 cast traffic; v5e-friendly)
        scores = jnp.einsum('lhd,mhd->hlm', q, kk,
                            preferred_element_type=f32)                # (NH, L, L)
        scores = jnp.where(mask_row_ref[...] > 0.0, scores, ATT_MASK_FILL)
        scores = scores - jnp.max(scores, axis=-1, keepdims=True)
        p_att = jnp.exp(scores)
        p_att = p_att * pl.reciprocal(jnp.sum(p_att, axis=-1, keepdims=True),
                                      approx=True)                     # EUP slot
        ctx = jnp.einsum('hlm,mhd->lhd', p_att, v,
                         preferred_element_type=f32).reshape(L, H)
        x = x + jnp.dot(ctx.astype(bf16), wo_ref[layer],
                        preferred_element_type=f32) + bo_ref[layer]

        # pre-norm position-wise feed-forward (ReLU)
        xn = _layer_norm(x, ln_g[5], ln_b[5])
        h1 = jnp.dot(xn.astype(bf16), w1_ref[layer],
                     preferred_element_type=f32) + b1_ref[layer]       # (L, DFF)
        h1 = jnp.maximum(h1, 0.0)
        x_ref[...] = x + jnp.dot(h1.astype(bf16), w2_ref[layer],
                                 preferred_element_type=f32) + b2_ref[layer]

    # ---- final LN, the two logit heads, both masked log-softmaxes -------------
    att = att_ref[0]                    # (L, 4H)
    mod0 = mod_ref[0]                   # (L, H)
    mod2 = _layer_norm(x_ref[...], lnf_g_ref[...], lnf_b_ref[...])     # (L, H)

    logits1 = (jnp.sum(att * watt_ref[0], axis=-1, keepdims=True)
               + jnp.sum(mod0 * wmod_ref[0], axis=-1, keepdims=True)
               + bias_ref[0])           # (L, 1)
    logits2 = (jnp.sum(att * watt_ref[1], axis=-1, keepdims=True)
               + jnp.sum(mod2 * wmod_ref[1], axis=-1, keepdims=True)
               + bias_ref[1])           # (L, 1)

    mask_col = mask_col_ref[0]          # (L, 1), 1 = keep

    def masked_log_softmax(lg):
        masked = mask_col * lg + (1.0 - mask_col) * SOFTMAX_MASK
        z = masked - jnp.max(masked, axis=0, keepdims=True)
        lse = jnp.log(jnp.sum(jnp.exp(z), axis=0, keepdims=True))
        return z - lse

    logp1_ref[...] = masked_log_softmax(logits1).reshape(1, L, 1)
    logp2_ref[...] = masked_log_softmax(logits2).reshape(1, L, 1)


# ---------------------------------------------------------------------------
# Parameters (stacked over the 3 encoder layers) + forward wrapper
# ---------------------------------------------------------------------------
def init_params(key, hidden_size, *, n_layers=N_LAYERS, d_ff=D_FF, conv_k=CONV_K):
    H = hidden_size
    ks = jax.random.split(key, 16)

    def unif(k, shape, fan_in):
        bound = 1.0 / math.sqrt(fan_in)
        return jax.random.uniform(k, shape, jnp.float32, -bound, bound)

    return {
        # the two (att, mod) -> 1 logit heads; row i belongs to logits_{i+1}
        "w_att": unif(ks[0], (2, 1, 4 * H), 4 * H),
        "b_att": unif(ks[1], (2,), 4 * H),
        "w_mod": unif(ks[2], (2, 1, H), H),
        "b_mod": unif(ks[3], (2,), H),
        # conv_w[l, k, i, o] == torch Conv1d weight[o, i, k]
        "conv_w": unif(ks[4], (n_layers, conv_k, H, H), conv_k * H),
        "conv_b": unif(ks[5], (n_layers, 1, H), conv_k * H),
        "ln_g": jnp.ones((n_layers, 6, 1, H), jnp.float32),
        "ln_b": jnp.zeros((n_layers, 6, 1, H), jnp.float32),
        # fused QKV weight: columns [0:H]=Q, [H:2H]=K, [2H:3H]=V
        "w_qkv": unif(ks[6], (n_layers, H, 3 * H), H),
        "b_qkv": unif(ks[7], (n_layers, 1, 3 * H), H),
        "w_o": unif(ks[8], (n_layers, H, H), H),
        "b_o": unif(ks[9], (n_layers, 1, H), H),
        "w_ff1": unif(ks[10], (n_layers, H, d_ff), H),
        "b_ff1": unif(ks[11], (n_layers, 1, d_ff), H),
        "w_ff2": unif(ks[12], (n_layers, d_ff, H), d_ff),
        "b_ff2": unif(ks[13], (n_layers, 1, H), d_ff),
        "lnf_g": jnp.ones((1, H), jnp.float32),
        "lnf_b": jnp.zeros((1, H), jnp.float32),
    }


@jax.jit
def transformer_output_forward(att, mod, mask, p):
    B, L, H = mod.shape
    conv_k = p["conv_w"].shape[1]
    pad = conv_k // 2
    bf16 = jnp.bfloat16
    maskf = mask.astype(jnp.float32)

    weight_args = (
        p["w_att"], p["w_mod"], (p["b_att"] + p["b_mod"]).reshape(2, 1, 1),
        p["conv_w"].astype(bf16), p["conv_b"],
        p["ln_g"], p["ln_b"],
        p["w_qkv"].astype(bf16), p["b_qkv"],
        p["w_o"].astype(bf16), p["b_o"],
        p["w_ff1"].astype(bf16), p["b_ff1"],
        p["w_ff2"].astype(bf16), p["b_ff2"],
        p["lnf_g"], p["lnf_b"],
    )

    def resident(w):            # whole weight resident in VMEM across the grid
        nd = w.ndim
        return pl.BlockSpec(w.shape, lambda b: (0,) * nd)

    in_specs = (
        [pl.BlockSpec((1, L, 4 * H), lambda b: (b, 0, 0)),   # att  (per batch row)
         pl.BlockSpec((1, L, H), lambda b: (b, 0, 0)),       # mod
         pl.BlockSpec((1, 1, L), lambda b: (b, 0, 0)),       # mask, key layout
         pl.BlockSpec((1, L, 1), lambda b: (b, 0, 0))]       # mask, column layout
        + [resident(w) for w in weight_args])

    out_spec = pl.BlockSpec((1, L, 1), lambda b: (b, 0, 0))

    logp1, logp2 = pl.pallas_call(
        transformer_output_kernel,
        out_shape=(jax.ShapeDtypeStruct((B, L, 1), jnp.float32),
                   jax.ShapeDtypeStruct((B, L, 1), jnp.float32)),
        grid=(B,),
        in_specs=in_specs,
        out_specs=(out_spec, out_spec),
        scratch_shapes=[pltpu.VMEM((L, H), jnp.float32),            # x carry
                        pltpu.VMEM((L + 2 * pad, H), jnp.float32)], # padded conv buf
        compiler_params=pltpu.CompilerParams(
            dimension_semantics=("parallel",),     # v7x: shard batch over both TCs
            vmem_limit_bytes=32 * 1024 * 1024),    # raise on v5e/v6e for big tiles
    )(att, mod, maskf.reshape(B, 1, L), maskf.reshape(B, L, 1), *weight_args)

    return logp1.reshape(B, L), logp2.reshape(B, L)


if __name__ == "__main__":
    B, L, H = 2, 8, 32
    key = jax.random.PRNGKey(0)
    k_att, k_mod, k_par = jax.random.split(key, 3)

    att = jax.random.normal(k_att, (B, L, 4 * H), jnp.float32)
    mod = jax.random.normal(k_mod, (B, L, H), jnp.float32)
    lengths = jnp.array([L, L - 2])
    mask = (jnp.arange(L)[None, :] < lengths[:, None]).astype(jnp.float32)

    params = init_params(k_par, H)

    log_p1, log_p2 = transformer_output_forward(att, mod, mask, params)
    jax.block_until_ready((log_p1, log_p2))

    assert log_p1.shape == (B, L) and log_p2.shape == (B, L)
    assert bool(jnp.all(jnp.isfinite(log_p1))) and bool(jnp.all(jnp.isfinite(log_p2)))
    # masked log-softmax must normalize over the valid positions
    assert bool(jnp.all(jnp.abs(jnp.sum(jnp.exp(log_p1) * mask, axis=-1) - 1.0) < 1e-3))
    assert bool(jnp.all(jnp.abs(jnp.sum(jnp.exp(log_p2) * mask, axis=-1) - 1.0) < 1e-3))
    print("KERNEL_OK")
</pallas_src>

<mosaic_0001>
module attributes {stable_mosaic.version = 11 : i64} {
  func.func @transformer_output_kernel(%arg0: i32, %arg1: memref<1x8x128xf32, #tpu.memory_space<vmem>>, %arg2: memref<1x8x32xf32, #tpu.memory_space<vmem>>, %arg3: memref<1x1x8xf32, #tpu.memory_space<vmem>>, %arg4: memref<1x8x1xf32, #tpu.memory_space<vmem>>, %arg5: memref<2x1x128xf32, #tpu.memory_space<vmem>>, %arg6: memref<2x1x32xf32, #tpu.memory_space<vmem>>, %arg7: memref<2x1x1xf32, #tpu.memory_space<vmem>>, %arg8: memref<3x7x32x32xbf16, #tpu.memory_space<vmem>>, %arg9: memref<3x1x32xf32, #tpu.memory_space<vmem>>, %arg10: memref<3x6x1x32xf32, #tpu.memory_space<vmem>>, %arg11: memref<3x6x1x32xf32, #tpu.memory_space<vmem>>, %arg12: memref<3x32x96xbf16, #tpu.memory_space<vmem>>, %arg13: memref<3x1x96xf32, #tpu.memory_space<vmem>>, %arg14: memref<3x32x32xbf16, #tpu.memory_space<vmem>>, %arg15: memref<3x1x32xf32, #tpu.memory_space<vmem>>, %arg16: memref<3x32x2048xbf16, #tpu.memory_space<vmem>>, %arg17: memref<3x1x2048xf32, #tpu.memory_space<vmem>>, %arg18: memref<3x2048x32xbf16, #tpu.memory_space<vmem>>, %arg19: memref<3x1x32xf32, #tpu.memory_space<vmem>>, %arg20: memref<1x32xf32, #tpu.memory_space<vmem>>, %arg21: memref<1x32xf32, #tpu.memory_space<vmem>>, %arg22: memref<1x8x1xf32, #tpu.memory_space<vmem>>, %arg23: memref<1x8x1xf32, #tpu.memory_space<vmem>>, %arg24: memref<8x32xf32, #tpu.memory_space<vmem>>, %arg25: memref<14x32xf32, #tpu.memory_space<vmem>>) attributes {dimension_semantics = [#tpu.dimension_semantics<parallel>], iteration_bounds = array<i64: 2>, scalar_prefetch = 0 : i64, scratch_operands = 2 : i64, tpu.core_type = #tpu.core_type<tc>, window_params = [{transform_indices = @transform_0, window_bounds = array<i64: 1, 8, 128>}, {transform_indices = @transform_1, window_bounds = array<i64: 1, 8, 32>}, {transform_indices = @transform_2, window_bounds = array<i64: 1, 1, 8>}, {transform_indices = @transform_3, window_bounds = array<i64: 1, 8, 1>}, {pipeline_mode = #tpu.pipeline_mode<synchronous>, transform_indices = @transform_4, window_bounds = array<i64: 2, 1, 128>}, {pipeline_mode = #tpu.pipeline_mode<synchronous>, transform_indices = @transform_5, window_bounds = array<i64: 2, 1, 32>}, {pipeline_mode = #tpu.pipeline_mode<synchronous>, transform_indices = @transform_6, window_bounds = array<i64: 2, 1, 1>}, {pipeline_mode = #tpu.pipeline_mode<synchronous>, transform_indices = @transform_7, window_bounds = array<i64: 3, 7, 32, 32>}, {pipeline_mode = #tpu.pipeline_mode<synchronous>, transform_indices = @transform_8, window_bounds = array<i64: 3, 1, 32>}, {pipeline_mode = #tpu.pipeline_mode<synchronous>, transform_indices = @transform_9, window_bounds = array<i64: 3, 6, 1, 32>}, {pipeline_mode = #tpu.pipeline_mode<synchronous>, transform_indices = @transform_10, window_bounds = array<i64: 3, 6, 1, 32>}, {pipeline_mode = #tpu.pipeline_mode<synchronous>, transform_indices = @transform_11, window_bounds = array<i64: 3, 32, 96>}, {pipeline_mode = #tpu.pipeline_mode<synchronous>, transform_indices = @transform_12, window_bounds = array<i64: 3, 1, 96>}, {pipeline_mode = #tpu.pipeline_mode<synchronous>, transform_indices = @transform_13, window_bounds = array<i64: 3, 32, 32>}, {pipeline_mode = #tpu.pipeline_mode<synchronous>, transform_indices = @transform_14, window_bounds = array<i64: 3, 1, 32>}, {pipeline_mode = #tpu.pipeline_mode<synchronous>, transform_indices = @transform_15, window_bounds = array<i64: 3, 32, 2048>}, {pipeline_mode = #tpu.pipeline_mode<synchronous>, transform_indices = @transform_16, window_bounds = array<i64: 3, 1, 2048>}, {pipeline_mode = #tpu.pipeline_mode<synchronous>, transform_indices = @transform_17, window_bounds = array<i64: 3, 2048, 32>}, {pipeline_mode = #tpu.pipeline_mode<synchronous>, transform_indices = @transform_18, window_bounds = array<i64: 3, 1, 32>}, {pipeline_mode = #tpu.pipeline_mode<synchronous>, transform_indices = @transform_19, window_bounds = array<i64: 1, 32>}, {pipeline_mode = #tpu.pipeline_mode<synchronous>, transform_indices = @transform_20, window_bounds = array<i64: 1, 32>}, {transform_indices = @transform_21, window_bounds = array<i64: 1, 8, 1>}, {transform_indices = @transform_22, window_bounds = array<i64: 1, 8, 1>}]} {
    %c0 = arith.constant 0 : index
    %c0_0 = arith.constant 0 : index
    %c0_1 = arith.constant 0 : index
    %0 = vector.load %arg2[%c0, %c0_0, %c0_1] : memref<1x8x32xf32, #tpu.memory_space<vmem>>, vector<1x8x32xf32>
    %1 = vector.shape_cast %0 : vector<1x8x32xf32> to vector<8x32xf32>
    %c0_2 = arith.constant 0 : index
    %c0_3 = arith.constant 0 : index
    %2 = vector.load %arg24[%c0_2, %c0_3] : memref<8x32xf32, #tpu.memory_space<vmem>>, vector<8x32xf32>
    tpu.vector_store %arg24[%c0_2, %c0_3], %1 {strides = array<i32>} : memref<8x32xf32, #tpu.memory_space<vmem>>, vector<8x32xf32>,
    %cst = arith.constant 0.000000e+00 : f32
    %3 = vector.broadcast %cst : f32 to vector<3x32xf32>
    %c0_4 = arith.constant 0 : index
    %c0_5 = arith.constant 0 : index
    %4 = vector.load %arg25[%c0_4, %c0_5] : memref<14x32xf32, #tpu.memory_space<vmem>>, vector<3x32xf32>
    tpu.vector_store %arg25[%c0_4, %c0_5], %3 {strides = array<i32>} : memref<14x32xf32, #tpu.memory_space<vmem>>, vector<3x32xf32>,
    %cst_6 = arith.constant 0.000000e+00 : f32
    %5 = vector.broadcast %cst_6 : f32 to vector<3x32xf32>
    %c11 = arith.constant 11 : index
    %c0_7 = arith.constant 0 : index
    %6 = vector.load %arg25[%c11, %c0_7] : memref<14x32xf32, #tpu.memory_space<vmem>>, vector<3x32xf32>
    tpu.vector_store %arg25[%c11, %c0_7], %5 {strides = array<i32>} : memref<14x32xf32, #tpu.memory_space<vmem>>, vector<3x32xf32>,
    %c0_i32 = arith.constant 0 : i32
    %c3_i32 = arith.constant 3 : i32
    %7 = arith.addi %c0_i32, %c3_i32 : i32
    %c1_i32 = arith.constant 1 : i32
    scf.for %arg26 = %c0_i32 to %7 step %c1_i32  : i32 {
      %c1_i32_64 = arith.constant 1 : i32
      %108 = arith.muli %arg26, %c1_i32_64 : i32
      %c0_i32_65 = arith.constant 0 : i32
      %109 = arith.addi %c0_i32_65, %108 : i32
      %110 = arith.index_cast %109 : i32 to index
      %c0_66 = arith.constant 0 : index
      %c0_67 = arith.constant 0 : index
      %c0_68 = arith.constant 0 : index
      %111 = vector.load %arg8[%110, %c0_66, %c0_67, %c0_68] : memref<3x7x32x32xbf16, #tpu.memory_space<vmem>>, vector<1x7x32x32xbf16>
      %112 = vector.shape_cast %111 : vector<1x7x32x32xbf16> to vector<7x32x32xbf16>
      %113 = arith.index_cast %109 : i32 to index
      %c0_69 = arith.constant 0 : index
      %c0_70 = arith.constant 0 : index
      %114 = vector.load %arg9[%113, %c0_69, %c0_70] : memref<3x1x32xf32, #tpu.memory_space<vmem>>, vector<1x1x32xf32>
      %115 = vector.shape_cast %114 : vector<1x1x32xf32> to vector<1x32xf32>
      %116 = arith.index_cast %109 : i32 to index
      %c0_71 = arith.constant 0 : index
      %c0_72 = arith.constant 0 : index
      %c0_73 = arith.constant 0 : index
      %117 = vector.load %arg10[%116, %c0_71, %c0_72, %c0_73] : memref<3x6x1x32xf32, #tpu.memory_space<vmem>>, vector<1x6x1x32xf32>
      %118 = vector.shape_cast %117 : vector<1x6x1x32xf32> to vector<6x1x32xf32>
      %119 = arith.index_cast %109 : i32 to index
      %c0_74 = arith.constant 0 : index
      %c0_75 = arith.constant 0 : index
      %c0_76 = arith.constant 0 : index
      %120 = vector.load %arg11[%119, %c0_74, %c0_75, %c0_76] : memref<3x6x1x32xf32, #tpu.memory_space<vmem>>, vector<1x6x1x32xf32>
      %121 = vector.shape_cast %120 : vector<1x6x1x32xf32> to vector<6x1x32xf32>
      %122 = vector.shape_cast %115 : vector<1x32xf32> to vector<1x32xf32>
      %123 = vector.broadcast %122 : vector<1x32xf32> to vector<8x32xf32>
      %c0_77 = arith.constant 0 : index
      %c0_78 = arith.constant 0 : index
      %124 = vector.load %arg24[%c0_77, %c0_78] : memref<8x32xf32, #tpu.memory_space<vmem>>, vector<8x32xf32>
      %c3 = arith.constant 3 : index
      %c0_79 = arith.constant 0 : index
      %125 = vector.load %arg25[%c3, %c0_79] : memref<14x32xf32, #tpu.memory_space<vmem>>, vector<8x32xf32>
      tpu.vector_store %arg25[%c3, %c0_79], %124 {strides = array<i32>} : memref<14x32xf32, #tpu.memory_space<vmem>>, vector<8x32xf32>,
      %c0_80 = arith.constant 0 : index
      %c0_81 = arith.constant 0 : index
      %126 = vector.load %arg25[%c0_80, %c0_81] : memref<14x32xf32, #tpu.memory_space<vmem>>, vector<8x32xf32>
      %127 = arith.truncf %126 : vector<8x32xf32> to vector<8x32xbf16>
      %128 = vector.extract_strided_slice %112 {offsets = [0, 0, 0], sizes = [1, 32, 32], strides = [1, 1, 1]} : vector<7x32x32xbf16> to vector<1x32x32xbf16>
      %129 = vector.shape_cast %128 : vector<1x32x32xbf16> to vector<32x32xbf16>
      %cst_82 = arith.constant dense<0.000000e+00> : vector<8x32xf32>
      %130 = tpu.matmul %127, %129, %cst_82 {dimension_numbers = #tpu.dot_dimension_numbers<[1], [0], [0], [1], [0, 0, 1, 1], [], []>} : vector<8x32xbf16>, vector<32x32xbf16>, vector<8x32xf32> -> vector<8x32xf32>
      %131 = arith.addf %123, %130 : vector<8x32xf32>
      %c1_83 = arith.constant 1 : index
      %c0_84 = arith.constant 0 : index
      %132 = vector.load %arg25[%c1_83, %c0_84] : memref<14x32xf32, #tpu.memory_space<vmem>>, vector<8x32xf32>
      %133 = arith.truncf %132 : vector<8x32xf32> to vector<8x32xbf16>
      %134 = vector.extract_strided_slice %112 {offsets = [1, 0, 0], sizes = [1, 32, 32], strides = [1, 1, 1]} : vector<7x32x32xbf16> to vector<1x32x32xbf16>
      %135 = vector.shape_cast %134 : vector<1x32x32xbf16> to vector<32x32xbf16>
      %cst_85 = arith.constant dense<0.000000e+00> : vector<8x32xf32>
      %136 = tpu.matmul %133, %135, %cst_85 {dimension_numbers = #tpu.dot_dimension_numbers<[1], [0], [0], [1], [0, 0, 1, 1], [], []>} : vector<8x32xbf16>, vector<32x32xbf16>, vector<8x32xf32> -> vector<8x32xf32>
      %137 = arith.addf %131, %136 : vector<8x32xf32>
      %c2 = arith.constant 2 : index
      %c0_86 = arith.constant 0 : index
      %138 = vector.load %arg25[%c2, %c0_86] : memref<14x32xf32, #tpu.memory_space<vmem>>, vector<8x32xf32>
      %139 = arith.truncf %138 : vector<8x32xf32> to vector<8x32xbf16>
      %140 = vector.extract_strided_slice %112 {offsets = [2, 0, 0], sizes = [1, 32, 32], strides = [1, 1, 1]} : vector<7x32x32xbf16> to vector<1x32x32xbf16>
      %141 = vector.shape_cast %140 : vector<1x32x32xbf16> to vector<32x32xbf16>
      %cst_87 = arith.constant dense<0.000000e+00> : vector<8x32xf32>
      %142 = tpu.matmul %139, %141, %cst_87 {dimension_numbers = #tpu.dot_dimension_numbers<[1], [0], [0], [1], [0, 0, 1, 1], [], []>} : vector<8x32xbf16>, vector<32x32xbf16>, vector<8x32xf32> -> vector<8x32xf32>
      %143 = arith.addf %137, %142 : vector<8x32xf32>
      %c3_88 = arith.constant 3 : index
      %c0_89 = arith.constant 0 : index
      %144 = vector.load %arg25[%c3_88, %c0_89] : memref<14x32xf32, #tpu.memory_space<vmem>>, vector<8x32xf32>
      %145 = arith.truncf %144 : vector<8x32xf32> to vector<8x32xbf16>
      %146 = vector.extract_strided_slice %112 {offsets = [3, 0, 0], sizes = [1, 32, 32], strides = [1, 1, 1]} : vector<7x32x32xbf16> to vector<1x32x32xbf16>
      %147 = vector.shape_cast %146 : vector<1x32x32xbf16> to vector<32x32xbf16>
      %cst_90 = arith.constant dense<0.000000e+00> : vector<8x32xf32>
      %148 = tpu.matmul %145, %147, %cst_90 {dimension_numbers = #tpu.dot_dimension_numbers<[1], [0], [0], [1], [0, 0, 1, 1], [], []>} : vector<8x32xbf16>, vector<32x32xbf16>, vector<8x32xf32> -> vector<8x32xf32>
      %149 = arith.addf %143, %148 : vector<8x32xf32>
      %c4 = arith.constant 4 : index
      %c0_91 = arith.constant 0 : index
      %150 = vector.load %arg25[%c4, %c0_91] : memref<14x32xf32, #tpu.memory_space<vmem>>, vector<8x32xf32>
      %151 = arith.truncf %150 : vector<8x32xf32> to vector<8x32xbf16>
      %152 = vector.extract_strided_slice %112 {offsets = [4, 0, 0], sizes = [1, 32, 32], strides = [1, 1, 1]} : vector<7x32x32xbf16> to vector<1x32x32xbf16>
      %153 = vector.shape_cast %152 : vector<1x32x32xbf16> to vector<32x32xbf16>
      %cst_92 = arith.constant dense<0.000000e+00> : vector<8x32xf32>
      %154 = tpu.matmul %151, %153, %cst_92 {dimension_numbers = #tpu.dot_dimension_numbers<[1], [0], [0], [1], [0, 0, 1, 1], [], []>} : vector<8x32xbf16>, vector<32x32xbf16>, vector<8x32xf32> -> vector<8x32xf32>
      %155 = arith.addf %149, %154 : vector<8x32xf32>
      %c5 = arith.constant 5 : index
      %c0_93 = arith.constant 0 : index
      %156 = vector.load %arg25[%c5, %c0_93] : memref<14x32xf32, #tpu.memory_space<vmem>>, vector<8x32xf32>
      %157 = arith.truncf %156 : vector<8x32xf32> to vector<8x32xbf16>
      %158 = vector.extract_strided_slice %112 {offsets = [5, 0, 0], sizes = [1, 32, 32], strides = [1, 1, 1]} : vector<7x32x32xbf16> to vector<1x32x32xbf16>
      %159 = vector.shape_cast %158 : vector<1x32x32xbf16> to vector<32x32xbf16>
      %cst_94 = arith.constant dense<0.000000e+00> : vector<8x32xf32>
      %160 = tpu.matmul %157, %159, %cst_94 {dimension_numbers = #tpu.dot_dimension_numbers<[1], [0], [0], [1], [0, 0, 1, 1], [], []>} : vector<8x32xbf16>, vector<32x32xbf16>, vector<8x32xf32> -> vector<8x32xf32>
      %161 = arith.addf %155, %160 : vector<8x32xf32>
      %c6 = arith.constant 6 : index
      %c0_95 = arith.constant 0 : index
      %162 = vector.load %arg25[%c6, %c0_95] : memref<14x32xf32, #tpu.memory_space<vmem>>, vector<8x32xf32>
      %163 = arith.truncf %162 : vector<8x32xf32> to vector<8x32xbf16>
      %164 = vector.extract_strided_slice %112 {offsets = [6, 0, 0], sizes = [1, 32, 32], strides = [1, 1, 1]} : vector<7x32x32xbf16> to vector<1x32x32xbf16>
      %165 = vector.shape_cast %164 : vector<1x32x32xbf16> to vector<32x32xbf16>
      %cst_96 = arith.constant dense<0.000000e+00> : vector<8x32xf32>
      %166 = tpu.matmul %163, %165, %cst_96 {dimension_numbers = #tpu.dot_dimension_numbers<[1], [0], [0], [1], [0, 0, 1, 1], [], []>} : vector<8x32xbf16>, vector<32x32xbf16>, vector<8x32xf32> -> vector<8x32xf32>
      %167 = arith.addf %161, %166 : vector<8x32xf32>
      %cst_97 = arith.constant 0.000000e+00 : f32
      %168 = vector.broadcast %cst_97 : f32 to vector<8x32xf32>
      %169 = arith.maximumf %167, %168 : vector<8x32xf32>
      %170 = vector.extract_strided_slice %118 {offsets = [0, 0, 0], sizes = [1, 1, 32], strides = [1, 1, 1]} : vector<6x1x32xf32> to vector<1x1x32xf32>
      %171 = vector.shape_cast %170 : vector<1x1x32xf32> to vector<1x32xf32>
      %172 = vector.extract_strided_slice %121 {offsets = [0, 0, 0], sizes = [1, 1, 32], strides = [1, 1, 1]} : vector<6x1x32xf32> to vector<1x1x32xf32>
      %173 = vector.shape_cast %172 : vector<1x1x32xf32> to vector<1x32xf32>
      %cst_98 = arith.constant dense<0.000000e+00> : vector<8xf32>
      %174 = vector.multi_reduction <add>, %169, %cst_98 [1] : vector<8x32xf32> to vector<8xf32>
      %175 = vector.shape_cast %174 : vector<8xf32> to vector<8x1xf32>
      %cst_99 = arith.constant 3.200000e+01 : f32
      %176 = vector.broadcast %cst_99 : f32 to vector<8x1xf32>
      %177 = arith.divf %175, %176 : vector<8x1xf32>
      %178 = vector.broadcast %177 : vector<8x1xf32> to vector<8x32xf32>
      %179 = arith.subf %169, %178 : vector<8x32xf32>
      %180 = arith.mulf %179, %179 : vector<8x32xf32>
      %cst_100 = arith.constant dense<0.000000e+00> : vector<8xf32>
      %181 = vector.multi_reduction <add>, %180, %cst_100 [1] : vector<8x32xf32> to vector<8xf32>
      %182 = vector.shape_cast %181 : vector<8xf32> to vector<8x1xf32>
      %cst_101 = arith.constant 0.0322580636 : f32
      %183 = vector.broadcast %cst_101 : f32 to vector<8x1xf32>
      %184 = arith.mulf %182, %183 : vector<8x1xf32>
      %185 = math.sqrt %184 : vector<8x1xf32>
      %cst_102 = arith.constant 9.99999997E-7 : f32
      %186 = vector.broadcast %cst_102 : f32 to vector<8x1xf32>
      %187 = arith.addf %185, %186 : vector<8x1xf32>
      %188 = tpu.reciprocal %187 {approx = true} : vector<8x1xf32> -> vector<8x1xf32>
      %189 = vector.broadcast %188 : vector<8x1xf32> to vector<8x32xf32>
      %190 = arith.mulf %179, %189 : vector<8x32xf32>
      %191 = vector.broadcast %171 : vector<1x32xf32> to vector<8x32xf32>
      %192 = arith.mulf %190, %191 : vector<8x32xf32>
      %193 = vector.broadcast %173 : vector<1x32xf32> to vector<8x32xf32>
      %194 = arith.addf %192, %193 : vector<8x32xf32>
      %195 = arith.addf %169, %194 : vector<8x32xf32>
      %c0_103 = arith.constant 0 : index
      %c0_104 = arith.constant 0 : index
      %196 = vector.load %arg24[%c0_103, %c0_104] : memref<8x32xf32, #tpu.memory_space<vmem>>, vector<8x32xf32>
      tpu.vector_store %arg24[%c0_103, %c0_104], %195 {strides = array<i32>} : memref<8x32xf32, #tpu.memory_space<vmem>>, vector<8x32xf32>,
      %c0_105 = arith.constant 0 : index
      %c0_106 = arith.constant 0 : index
      %197 = vector.load %arg24[%c0_105, %c0_106] : memref<8x32xf32, #tpu.memory_space<vmem>>, vector<8x32xf32>
      %c3_107 = arith.constant 3 : index
      %c0_108 = arith.constant 0 : index
      %198 = vector.load %arg25[%c3_107, %c0_108] : memref<14x32xf32, #tpu.memory_space<vmem>>, vector<8x32xf32>
      tpu.vector_store %arg25[%c3_107, %c0_108], %197 {strides = array<i32>} : memref<14x32xf32, #tpu.memory_space<vmem>>, vector<8x32xf32>,
      %c0_109 = arith.constant 0 : index
      %c0_110 = arith.constant 0 : index
      %199 = vector.load %arg25[%c0_109, %c0_110] : memref<14x32xf32, #tpu.memory_space<vmem>>, vector<8x32xf32>
      %200 = arith.truncf %199 : vector<8x32xf32> to vector<8x32xbf16>
      %201 = vector.extract_strided_slice %112 {offsets = [0, 0, 0], sizes = [1, 32, 32], strides = [1, 1, 1]} : vector<7x32x32xbf16> to vector<1x32x32xbf16>
      %202 = vector.shape_cast %201 : vector<1x32x32xbf16> to vector<32x32xbf16>
      %cst_111 = arith.constant dense<0.000000e+00> : vector<8x32xf32>
      %203 = tpu.matmul %200, %202, %cst_111 {dimension_numbers = #tpu.dot_dimension_numbers<[1], [0], [0], [1], [0, 0, 1, 1], [], []>} : vector<8x32xbf16>, vector<32x32xbf16>, vector<8x32xf32> -> vector<8x32xf32>
      %204 = arith.addf %123, %203 : vector<8x32xf32>
      %c1_112 = arith.constant 1 : index
      %c0_113 = arith.constant 0 : index
      %205 = vector.load %arg25[%c1_112, %c0_113] : memref<14x32xf32, #tpu.memory_space<vmem>>, vector<8x32xf32>
      %206 = arith.truncf %205 : vector<8x32xf32> to vector<8x32xbf16>
      %207 = vector.extract_strided_slice %112 {offsets = [1, 0, 0], sizes = [1, 32, 32], strides = [1, 1, 1]} : vector<7x32x32xbf16> to vector<1x32x32xbf16>
      %208 = vector.shape_cast %207 : vector<1x32x32xbf16> to vector<32x32xbf16>
      %cst_114 = arith.constant dense<0.000000e+00> : vector<8x32xf32>
      %209 = tpu.matmul %206, %208, %cst_114 {dimension_numbers = #tpu.dot_dimension_numbers<[1], [0], [0], [1], [0, 0, 1, 1], [], []>} : vector<8x32xbf16>, vector<32x32xbf16>, vector<8x32xf32> -> vector<8x32xf32>
      %210 = arith.addf %204, %209 : vector<8x32xf32>
      %c2_115 = arith.constant 2 : index
      %c0_116 = arith.constant 0 : index
      %211 = vector.load %arg25[%c2_115, %c0_116] : memref<14x32xf32, #tpu.memory_space<vmem>>, vector<8x32xf32>
      %212 = arith.truncf %211 : vector<8x32xf32> to vector<8x32xbf16>
      %213 = vector.extract_strided_slice %112 {offsets = [2, 0, 0], sizes = [1, 32, 32], strides = [1, 1, 1]} : vector<7x32x32xbf16> to vector<1x32x32xbf16>
      %214 = vector.shape_cast %213 : vector<1x32x32xbf16> to vector<32x32xbf16>
      %cst_117 = arith.constant dense<0.000000e+00> : vector<8x32xf32>
      %215 = tpu.matmul %212, %214, %cst_117 {dimension_numbers = #tpu.dot_dimension_numbers<[1], [0], [0], [1], [0, 0, 1, 1], [], []>} : vector<8x32xbf16>, vector<32x32xbf16>, vector<8x32xf32> -> vector<8x32xf32>
      %216 = arith.addf %210, %215 : vector<8x32xf32>
      %c3_118 = arith.constant 3 : index
      %c0_119 = arith.constant 0 : index
      %217 = vector.load %arg25[%c3_118, %c0_119] : memref<14x32xf32, #tpu.memory_space<vmem>>, vector<8x32xf32>
      %218 = arith.truncf %217 : vector<8x32xf32> to vector<8x32xbf16>
      %219 = vector.extract_strided_slice %112 {offsets = [3, 0, 0], sizes = [1, 32, 32], strides = [1, 1, 1]} : vector<7x32x32xbf16> to vector<1x32x32xbf16>
      %220 = vector.shape_cast %219 : vector<1x32x32xbf16> to vector<32x32xbf16>
      %cst_120 = arith.constant dense<0.000000e+00> : vector<8x32xf32>
      %221 = tpu.matmul %218, %220, %cst_120 {dimension_numbers = #tpu.dot_dimension_numbers<[1], [0], [0], [1], [0, 0, 1, 1], [], []>} : vector<8x32xbf16>, vector<32x32xbf16>, vector<8x32xf32> -> vector<8x32xf32>
      %222 = arith.addf %216, %221 : vector<8x32xf32>
      %c4_121 = arith.constant 4 : index
      %c0_122 = arith.constant 0 : index
      %223 = vector.load %arg25[%c4_121, %c0_122] : memref<14x32xf32, #tpu.memory_space<vmem>>, vector<8x32xf32>
      %224 = arith.truncf %223 : vector<8x32xf32> to vector<8x32xbf16>
      %225 = vector.extract_strided_slice %112 {offsets = [4, 0, 0], sizes = [1, 32, 32], strides = [1, 1, 1]} : vector<7x32x32xbf16> to vector<1x32x32xbf16>
      %226 = vector.shape_cast %225 : vector<1x32x32xbf16> to vector<32x32xbf16>
      %cst_123 = arith.constant dense<0.000000e+00> : vector<8x32xf32>
      %227 = tpu.matmul %224, %226, %cst_123 {dimension_numbers = #tpu.dot_dimension_numbers<[1], [0], [0], [1], [0, 0, 1, 1], [], []>} : vector<8x32xbf16>, vector<32x32xbf16>, vector<8x32xf32> -> vector<8x32xf32>
      %228 = arith.addf %222, %227 : vector<8x32xf32>
      %c5_124 = arith.constant 5 : index
      %c0_125 = arith.constant 0 : index
      %229 = vector.load %arg25[%c5_124, %c0_125] : memref<14x32xf32, #tpu.memory_space<vmem>>, vector<8x32xf32>
      %230 = arith.truncf %229 : vector<8x32xf32> to vector<8x32xbf16>
      %231 = vector.extract_strided_slice %112 {offsets = [5, 0, 0], sizes = [1, 32, 32], strides = [1, 1, 1]} : vector<7x32x32xbf16> to vector<1x32x32xbf16>
      %232 = vector.shape_cast %231 : vector<1x32x32xbf16> to vector<32x32xbf16>
      %cst_126 = arith.constant dense<0.000000e+00> : vector<8x32xf32>
      %233 = tpu.matmul %230, %232, %cst_126 {dimension_numbers = #tpu.dot_dimension_numbers<[1], [0], [0], [1], [0, 0, 1, 1], [], []>} : vector<8x32xbf16>, vector<32x32xbf16>, vector<8x32xf32> -> vector<8x32xf32>
      %234 = arith.addf %228, %233 : vector<8x32xf32>
      %c6_127 = arith.constant 6 : index
      %c0_128 = arith.constant 0 : index
      %235 = vector.load %arg25[%c6_127, %c0_128] : memref<14x32xf32, #tpu.memory_space<vmem>>, vector<8x32xf32>
      %236 = arith.truncf %235 : vector<8x32xf32> to vector<8x32xbf16>
      %237 = vector.extract_strided_slice %112 {offsets = [6, 0, 0], sizes = [1, 32, 32], strides = [1, 1, 1]} : vector<7x32x32xbf16> to vector<1x32x32xbf16>
      %238 = vector.shape_cast %237 : vector<1x32x32xbf16> to vector<32x32xbf16>
      %cst_129 = arith.constant dense<0.000000e+00> : vector<8x32xf32>
      %239 = tpu.matmul %236, %238, %cst_129 {dimension_numbers = #tpu.dot_dimension_numbers<[1], [0], [0], [1], [0, 0, 1, 1], [], []>} : vector<8x32xbf16>, vector<32x32xbf16>, vector<8x32xf32> -> vector<8x32xf32>
      %240 = arith.addf %234, %239 : vector<8x32xf32>
      %cst_130 = arith.constant 0.000000e+00 : f32
      %241 = vector.broadcast %cst_130 : f32 to vector<8x32xf32>
      %242 = arith.maximumf %240, %241 : vector<8x32xf32>
      %243 = vector.extract_strided_slice %118 {offsets = [1, 0, 0], sizes = [1, 1, 32], strides = [1, 1, 1]} : vector<6x1x32xf32> to vector<1x1x32xf32>
      %244 = vector.shape_cast %243 : vector<1x1x32xf32> to vector<1x32xf32>
      %245 = vector.extract_strided_slice %121 {offsets = [1, 0, 0], sizes = [1, 1, 32], strides = [1, 1, 1]} : vector<6x1x32xf32> to vector<1x1x32xf32>
      %246 = vector.shape_cast %245 : vector<1x1x32xf32> to vector<1x32xf32>
      %cst_131 = arith.constant dense<0.000000e+00> : vector<8xf32>
      %247 = vector.multi_reduction <add>, %242, %cst_131 [1] : vector<8x32xf32> to vector<8xf32>
      %248 = vector.shape_cast %247 : vector<8xf32> to vector<8x1xf32>
      %cst_132 = arith.constant 3.200000e+01 : f32
      %249 = vector.broadcast %cst_132 : f32 to vector<8x1xf32>
      %250 = arith.divf %248, %249 : vector<8x1xf32>
      %251 = vector.broadcast %250 : vector<8x1xf32> to vector<8x32xf32>
      %252 = arith.subf %242, %251 : vector<8x32xf32>
      %253 = arith.mulf %252, %252 : vector<8x32xf32>
      %cst_133 = arith.constant dense<0.000000e+00> : vector<8xf32>
      %254 = vector.multi_reduction <add>, %253, %cst_133 [1] : vector<8x32xf32> to vector<8xf32>
      %255 = vector.shape_cast %254 : vector<8xf32> to vector<8x1xf32>
      %cst_134 = arith.constant 0.0322580636 : f32
      %256 = vector.broadcast %cst_134 : f32 to vector<8x1xf32>
      %257 = arith.mulf %255, %256 : vector<8x1xf32>
      %258 = math.sqrt %257 : vector<8x1xf32>
      %cst_135 = arith.constant 9.99999997E-7 : f32
      %259 = vector.broadcast %cst_135 : f32 to vector<8x1xf32>
      %260 = arith.addf %258, %259 : vector<8x1xf32>
      %261 = tpu.reciprocal %260 {approx = true} : vector<8x1xf32> -> vector<8x1xf32>
      %262 = vector.broadcast %261 : vector<8x1xf32> to vector<8x32xf32>
      %263 = arith.mulf %252, %262 : vector<8x32xf32>
      %264 = vector.broadcast %244 : vector<1x32xf32> to vector<8x32xf32>
      %265 = arith.mulf %263, %264 : vector<8x32xf32>
      %266 = vector.broadcast %246 : vector<1x32xf32> to vector<8x32xf32>
      %267 = arith.addf %265, %266 : vector<8x32xf32>
      %268 = arith.addf %242, %267 : vector<8x32xf32>
      %c0_136 = arith.constant 0 : index
      %c0_137 = arith.constant 0 : index
      %269 = vector.load %arg24[%c0_136, %c0_137] : memref<8x32xf32, #tpu.memory_space<vmem>>, vector<8x32xf32>
      tpu.vector_store %arg24[%c0_136, %c0_137], %268 {strides = array<i32>} : memref<8x32xf32, #tpu.memory_space<vmem>>, vector<8x32xf32>,
      %c0_138 = arith.constant 0 : index
      %c0_139 = arith.constant 0 : index
      %270 = vector.load %arg24[%c0_138, %c0_139] : memref<8x32xf32, #tpu.memory_space<vmem>>, vector<8x32xf32>
      %c3_140 = arith.constant 3 : index
      %c0_141 = arith.constant 0 : index
      %271 = vector.load %arg25[%c3_140, %c0_141] : memref<14x32xf32, #tpu.memory_space<vmem>>, vector<8x32xf32>
      tpu.vector_store %arg25[%c3_140, %c0_141], %270 {strides = array<i32>} : memref<14x32xf32, #tpu.memory_space<vmem>>, vector<8x32xf32>,
      %c0_142 = arith.constant 0 : index
      %c0_143 = arith.constant 0 : index
      %272 = vector.load %arg25[%c0_142, %c0_143] : memref<14x32xf32, #tpu.memory_space<vmem>>, vector<8x32xf32>
      %273 = arith.truncf %272 : vector<8x32xf32> to vector<8x32xbf16>
      %274 = vector.extract_strided_slice %112 {offsets = [0, 0, 0], sizes = [1, 32, 32], strides = [1, 1, 1]} : vector<7x32x32xbf16> to vector<1x32x32xbf16>
      %275 = vector.shape_cast %274 : vector<1x32x32xbf16> to vector<32x32xbf16>
      %cst_144 = arith.constant dense<0.000000e+00> : vector<8x32xf32>
      %276 = tpu.matmul %273, %275, %cst_144 {dimension_numbers = #tpu.dot_dimension_numbers<[1], [0], [0], [1], [0, 0, 1, 1], [], []>} : vector<8x32xbf16>, vector<32x32xbf16>, vector<8x32xf32> -> vector<8x32xf32>
      %277 = arith.addf %123, %276 : vector<8x32xf32>
      %c1_145 = arith.constant 1 : index
      %c0_146 = arith.constant 0 : index
      %278 = vector.load %arg25[%c1_145, %c0_146] : memref<14x32xf32, #tpu.memory_space<vmem>>, vector<8x32xf32>
      %279 = arith.truncf %278 : vector<8x32xf32> to vector<8x32xbf16>
      %280 = vector.extract_strided_slice %112 {offsets = [1, 0, 0], sizes = [1, 32, 32], strides = [1, 1, 1]} : vector<7x32x32xbf16> to vector<1x32x32xbf16>
      %281 = vector.shape_cast %280 : vector<1x32x32xbf16> to vector<32x32xbf16>
      %cst_147 = arith.constant dense<0.000000e+00> : vector<8x32xf32>
      %282 = tpu.matmul %279, %281, %cst_147 {dimension_numbers = #tpu.dot_dimension_numbers<[1], [0], [0], [1], [0, 0, 1, 1], [], []>} : vector<8x32xbf16>, vector<32x32xbf16>, vector<8x32xf32> -> vector<8x32xf32>
      %283 = arith.addf %277, %282 : vector<8x32xf32>
      %c2_148 = arith.constant 2 : index
      %c0_149 = arith.constant 0 : index
      %284 = vector.load %arg25[%c2_148, %c0_149] : memref<14x32xf32, #tpu.memory_space<vmem>>, vector<8x32xf32>
      %285 = arith.truncf %284 : vector<8x32xf32> to vector<8x32xbf16>
      %286 = vector.extract_strided_slice %112 {offsets = [2, 0, 0], sizes = [1, 32, 32], strides = [1, 1, 1]} : vector<7x32x32xbf16> to vector<1x32x32xbf16>
      %287 = vector.shape_cast %286 : vector<1x32x32xbf16> to vector<32x32xbf16>
      %cst_150 = arith.constant dense<0.000000e+00> : vector<8x32xf32>
      %288 = tpu.matmul %285, %287, %cst_150 {dimension_numbers = #tpu.dot_dimension_numbers<[1], [0], [0], [1], [0, 0, 1, 1], [], []>} : vector<8x32xbf16>, vector<32x32xbf16>, vector<8x32xf32> -> vector<8x32xf32>
      %289 = arith.addf %283, %288 : vector<8x32xf32>
      %c3_151 = arith.constant 3 : index
      %c0_152 = arith.constant 0 : index
      %290 = vector.load %arg25[%c3_151, %c0_152] : memref<14x32xf32, #tpu.memory_space<vmem>>, vector<8x32xf32>
      %291 = arith.truncf %290 : vector<8x32xf32> to vector<8x32xbf16>
      %292 = vector.extract_strided_slice %112 {offsets = [3, 0, 0], sizes = [1, 32, 32], strides = [1, 1, 1]} : vector<7x32x32xbf16> to vector<1x32x32xbf16>
      %293 = vector.shape_cast %292 : vector<1x32x32xbf16> to vector<32x32xbf16>
      %cst_153 = arith.constant dense<0.000000e+00> : vector<8x32xf32>
      %294 = tpu.matmul %291, %293, %cst_153 {dimension_numbers = #tpu.dot_dimension_numbers<[1], [0], [0], [1], [0, 0, 1, 1], [], []>} : vector<8x32xbf16>, vector<32x32xbf16>, vector<8x32xf32> -> vector<8x32xf32>
      %295 = arith.addf %289, %294 : vector<8x32xf32>
      %c4_154 = arith.constant 4 : index
      %c0_155 = arith.constant 0 : index
      %296 = vector.load %arg25[%c4_154, %c0_155] : memref<14x32xf32, #tpu.memory_space<vmem>>, vector<8x32xf32>
      %297 = arith.truncf %296 : vector<8x32xf32> to vector<8x32xbf16>
      %298 = vector.extract_strided_slice %112 {offsets = [4, 0, 0], sizes = [1, 32, 32], strides = [1, 1, 1]} : vector<7x32x32xbf16> to vector<1x32x32xbf16>
      %299 = vector.shape_cast %298 : vector<1x32x32xbf16> to vector<32x32xbf16>
      %cst_156 = arith.constant dense<0.000000e+00> : vector<8x32xf32>
      %300 = tpu.matmul %297, %299, %cst_156 {dimension_numbers = #tpu.dot_dimension_numbers<[1], [0], [0], [1], [0, 0, 1, 1], [], []>} : vector<8x32xbf16>, vector<32x32xbf16>, vector<8x32xf32> -> vector<8x32xf32>
      %301 = arith.addf %295, %300 : vector<8x32xf32>
      %c5_157 = arith.constant 5 : index
      %c0_158 = arith.constant 0 : index
      %302 = vector.load %arg25[%c5_157, %c0_158] : memref<14x32xf32, #tpu.memory_space<vmem>>, vector<8x32xf32>
      %303 = arith.truncf %302 : vector<8x32xf32> to vector<8x32xbf16>
      %304 = vector.extract_strided_slice %112 {offsets = [5, 0, 0], sizes = [1, 32, 32], strides = [1, 1, 1]} : vector<7x32x32xbf16> to vector<1x32x32xbf16>
      %305 = vector.shape_cast %304 : vector<1x32x32xbf16> to vector<32x32xbf16>
      %cst_159 = arith.constant dense<0.000000e+00> : vector<8x32xf32>
      %306 = tpu.matmul %303, %305, %cst_159 {dimension_numbers = #tpu.dot_dimension_numbers<[1], [0], [0], [1], [0, 0, 1, 1], [], []>} : vector<8x32xbf16>, vector<32x32xbf16>, vector<8x32xf32> -> vector<8x32xf32>
      %307 = arith.addf %301, %306 : vector<8x32xf32>
      %c6_160 = arith.constant 6 : index
      %c0_161 = arith.constant 0 : index
      %308 = vector.load %arg25[%c6_160, %c0_161] : memref<14x32xf32, #tpu.memory_space<vmem>>, vector<8x32xf32>
      %309 = arith.truncf %308 : vector<8x32xf32> to vector<8x32xbf16>
      %310 = vector.extract_strided_slice %112 {offsets = [6, 0, 0], sizes = [1, 32, 32], strides = [1, 1, 1]} : vector<7x32x32xbf16> to vector<1x32x32xbf16>
      %311 = vector.shape_cast %310 : vector<1x32x32xbf16> to vector<32x32xbf16>
      %cst_162 = arith.constant dense<0.000000e+00> : vector<8x32xf32>
      %312 = tpu.matmul %309, %311, %cst_162 {dimension_numbers = #tpu.dot_dimension_numbers<[1], [0], [0], [1], [0, 0, 1, 1], [], []>} : vector<8x32xbf16>, vector<32x32xbf16>, vector<8x32xf32> -> vector<8x32xf32>
      %313 = arith.addf %307, %312 : vector<8x32xf32>
      %cst_163 = arith.constant 0.000000e+00 : f32
      %314 = vector.broadcast %cst_163 : f32 to vector<8x32xf32>
      %315 = arith.maximumf %313, %314 : vector<8x32xf32>
      %316 = vector.extract_strided_slice %118 {offsets = [2, 0, 0], sizes = [1, 1, 32], strides = [1, 1, 1]} : vector<6x1x32xf32> to vector<1x1x32xf32>
      %317 = vector.shape_cast %316 : vector<1x1x32xf32> to vector<1x32xf32>
      %318 = vector.extract_strided_slice %121 {offsets = [2, 0, 0], sizes = [1, 1, 32], strides = [1, 1, 1]} : vector<6x1x32xf32> to vector<1x1x32xf32>
      %319 = vector.shape_cast %318 : vector<1x1x32xf32> to vector<1x32xf32>
      %cst_164 = arith.constant dense<0.000000e+00> : vector<8xf32>
      %320 = vector.multi_reduction <add>, %315, %cst_164 [1] : vector<8x32xf32> to vector<8xf32>
      %321 = vector.shape_cast %320 : vector<8xf32> to vector<8x1xf32>
      %cst_165 = arith.constant 3.200000e+01 : f32
      %322 = vector.broadcast %cst_165 : f32 to vector<8x1xf32>
      %323 = arith.divf %321, %322 : vector<8x1xf32>
      %324 = vector.broadcast %323 : vector<8x1xf32> to vector<8x32xf32>
      %325 = arith.subf %315, %324 : vector<8x32xf32>
      %326 = arith.mulf %325, %325 : vector<8x32xf32>
      %cst_166 = arith.constant dense<0.000000e+00> : vector<8xf32>
      %327 = vector.multi_reduction <add>, %326, %cst_166 [1] : vector<8x32xf32> to vector<8xf32>
      %328 = vector.shape_cast %327 : vector<8xf32> to vector<8x1xf32>
      %cst_167 = arith.constant 0.0322580636 : f32
      %329 = vector.broadcast %cst_167 : f32 to vector<8x1xf32>
      %330 = arith.mulf %328, %329 : vector<8x1xf32>
      %331 = math.sqrt %330 : vector<8x1xf32>
      %cst_168 = arith.constant 9.99999997E-7 : f32
      %332 = vector.broadcast %cst_168 : f32 to vector<8x1xf32>
      %333 = arith.addf %331, %332 : vector<8x1xf32>
      %334 = tpu.reciprocal %333 {approx = true} : vector<8x1xf32> -> vector<8x1xf32>
      %335 = vector.broadcast %334 : vector<8x1xf32> to vector<8x32xf32>
      %336 = arith.mulf %325, %335 : vector<8x32xf32>
      %337 = vector.broadcast %317 : vector<1x32xf32> to vector<8x32xf32>
      %338 = arith.mulf %336, %337 : vector<8x32xf32>
      %339 = vector.broadcast %319 : vector<1x32xf32> to vector<8x32xf32>
      %340 = arith.addf %338, %339 : vector<8x32xf32>
      %341 = arith.addf %315, %340 : vector<8x32xf32>
      %c0_169 = arith.constant 0 : index
      %c0_170 = arith.constant 0 : index
      %342 = vector.load %arg24[%c0_169, %c0_170] : memref<8x32xf32, #tpu.memory_space<vmem>>, vector<8x32xf32>
      tpu.vector_store %arg24[%c0_169, %c0_170], %341 {strides = array<i32>} : memref<8x32xf32, #tpu.memory_space<vmem>>, vector<8x32xf32>,
      %c0_171 = arith.constant 0 : index
      %c0_172 = arith.constant 0 : index
      %343 = vector.load %arg24[%c0_171, %c0_172] : memref<8x32xf32, #tpu.memory_space<vmem>>, vector<8x32xf32>
      %c3_173 = arith.constant 3 : index
      %c0_174 = arith.constant 0 : index
      %344 = vector.load %arg25[%c3_173, %c0_174] : memref<14x32xf32, #tpu.memory_space<vmem>>, vector<8x32xf32>
      tpu.vector_store %arg25[%c3_173, %c0_174], %343 {strides = array<i32>} : memref<14x32xf32, #tpu.memory_space<vmem>>, vector<8x32xf32>,
      %c0_175 = arith.constant 0 : index
      %c0_176 = arith.constant 0 : index
      %345 = vector.load %arg25[%c0_175, %c0_176] : memref<14x32xf32, #tpu.memory_space<vmem>>, vector<8x32xf32>
      %346 = arith.truncf %345 : vector<8x32xf32> to vector<8x32xbf16>
      %347 = vector.extract_strided_slice %112 {offsets = [0, 0, 0], sizes = [1, 32, 32], strides = [1, 1, 1]} : vector<7x32x32xbf16> to vector<1x32x32xbf16>
      %348 = vector.shape_cast %347 : vector<1x32x32xbf16> to vector<32x32xbf16>
      %cst_177 = arith.constant dense<0.000000e+00> : vector<8x32xf32>
      %349 = tpu.matmul %346, %348, %cst_177 {dimension_numbers = #tpu.dot_dimension_numbers<[1], [0], [0], [1], [0, 0, 1, 1], [], []>} : vector<8x32xbf16>, vector<32x32xbf16>, vector<8x32xf32> -> vector<8x32xf32>
      %350 = arith.addf %123, %349 : vector<8x32xf32>
      %c1_178 = arith.constant 1 : index
      %c0_179 = arith.constant 0 : index
      %351 = vector.load %arg25[%c1_178, %c0_179] : memref<14x32xf32, #tpu.memory_space<vmem>>, vector<8x32xf32>
      %352 = arith.truncf %351 : vector<8x32xf32> to vector<8x32xbf16>
      %353 = vector.extract_strided_slice %112 {offsets = [1, 0, 0], sizes = [1, 32, 32], strides = [1, 1, 1]} : vector<7x32x32xbf16> to vector<1x32x32xbf16>
      %354 = vector.shape_cast %353 : vector<1x32x32xbf16> to vector<32x32xbf16>
      %cst_180 = arith.constant dense<0.000000e+00> : vector<8x32xf32>
      %355 = tpu.matmul %352, %354, %cst_180 {dimension_numbers = #tpu.dot_dimension_numbers<[1], [0], [0], [1], [0, 0, 1, 1], [], []>} : vector<8x32xbf16>, vector<32x32xbf16>, vector<8x32xf32> -> vector<8x32xf32>
      %356 = arith.addf %350, %355 : vector<8x32xf32>
      %c2_181 = arith.constant 2 : index
      %c0_182 = arith.constant 0 : index
      %357 = vector.load %arg25[%c2_181, %c0_182] : memref<14x32xf32, #tpu.memory_space<vmem>>, vector<8x32xf32>
      %358 = arith.truncf %357 : vector<8x32xf32> to vector<8x32xbf16>
      %359 = vector.extract_strided_slice %112 {offsets = [2, 0, 0], sizes = [1, 32, 32], strides = [1, 1, 1]} : vector<7x32x32xbf16> to vector<1x32x32xbf16>
      %360 = vector.shape_cast %359 : vector<1x32x32xbf16> to vector<32x32xbf16>
      %cst_183 = arith.constant dense<0.000000e+00> : vector<8x32xf32>
      %361 = tpu.matmul %358, %360, %cst_183 {dimension_numbers = #tpu.dot_dimension_numbers<[1], [0], [0], [1], [0, 0, 1, 1], [], []>} : vector<8x32xbf16>, vector<32x32xbf16>, vector<8x32xf32> -> vector<8x32xf32>
      %362 = arith.addf %356, %361 : vector<8x32xf32>
      %c3_184 = arith.constant 3 : index
      %c0_185 = arith.constant 0 : index
      %363 = vector.load %arg25[%c3_184, %c0_185] : memref<14x32xf32, #tpu.memory_space<vmem>>, vector<8x32xf32>
      %364 = arith.truncf %363 : vector<8x32xf32> to vector<8x32xbf16>
      %365 = vector.extract_strided_slice %112 {offsets = [3, 0, 0], sizes = [1, 32, 32], strides = [1, 1, 1]} : vector<7x32x32xbf16> to vector<1x32x32xbf16>
      %366 = vector.shape_cast %365 : vector<1x32x32xbf16> to vector<32x32xbf16>
      %cst_186 = arith.constant dense<0.000000e+00> : vector<8x32xf32>
      %367 = tpu.matmul %364, %366, %cst_186 {dimension_numbers = #tpu.dot_dimension_numbers<[1], [0], [0], [1], [0, 0, 1, 1], [], []>} : vector<8x32xbf16>, vector<32x32xbf16>, vector<8x32xf32> -> vector<8x32xf32>
      %368 = arith.addf %362, %367 : vector<8x32xf32>
      %c4_187 = arith.constant 4 : index
      %c0_188 = arith.constant 0 : index
      %369 = vector.load %arg25[%c4_187, %c0_188] : memref<14x32xf32, #tpu.memory_space<vmem>>, vector<8x32xf32>
      %370 = arith.truncf %369 : vector<8x32xf32> to vector<8x32xbf16>
      %371 = vector.extract_strided_slice %112 {offsets = [4, 0, 0], sizes = [1, 32, 32], strides = [1, 1, 1]} : vector<7x32x32xbf16> to vector<1x32x32xbf16>
      %372 = vector.shape_cast %371 : vector<1x32x32xbf16> to vector<32x32xbf16>
      %cst_189 = arith.constant dense<0.000000e+00> : vector<8x32xf32>
      %373 = tpu.matmul %370, %372, %cst_189 {dimension_numbers = #tpu.dot_dimension_numbers<[1], [0], [0], [1], [0, 0, 1, 1], [], []>} : vector<8x32xbf16>, vector<32x32xbf16>, vector<8x32xf32> -> vector<8x32xf32>
      %374 = arith.addf %368, %373 : vector<8x32xf32>
      %c5_190 = arith.constant 5 : index
      %c0_191 = arith.constant 0 : index
      %375 = vector.load %arg25[%c5_190, %c0_191] : memref<14x32xf32, #tpu.memory_space<vmem>>, vector<8x32xf32>
      %376 = arith.truncf %375 : vector<8x32xf32> to vector<8x32xbf16>
      %377 = vector.extract_strided_slice %112 {offsets = [5, 0, 0], sizes = [1, 32, 32], strides = [1, 1, 1]} : vector<7x32x32xbf16> to vector<1x32x32xbf16>
      %378 = vector.shape_cast %377 : vector<1x32x32xbf16> to vector<32x32xbf16>
      %cst_192 = arith.constant dense<0.000000e+00> : vector<8x32xf32>
      %379 = tpu.matmul %376, %378, %cst_192 {dimension_numbers = #tpu.dot_dimension_numbers<[1], [0], [0], [1], [0, 0, 1, 1], [], []>} : vector<8x32xbf16>, vector<32x32xbf16>, vector<8x32xf32> -> vector<8x32xf32>
      %380 = arith.addf %374, %379 : vector<8x32xf32>
      %c6_193 = arith.constant 6 : index
      %c0_194 = arith.constant 0 : index
      %381 = vector.load %arg25[%c6_193, %c0_194] : memref<14x32xf32, #tpu.memory_space<vmem>>, vector<8x32xf32>
      %382 = arith.truncf %381 : vector<8x32xf32> to vector<8x32xbf16>
      %383 = vector.extract_strided_slice %112 {offsets = [6, 0, 0], sizes = [1, 32, 32], strides = [1, 1, 1]} : vector<7x32x32xbf16> to vector<1x32x32xbf16>
      %384 = vector.shape_cast %383 : vector<1x32x32xbf16> to vector<32x32xbf16>
      %cst_195 = arith.constant dense<0.000000e+00> : vector<8x32xf32>
      %385 = tpu.matmul %382, %384, %cst_195 {dimension_numbers = #tpu.dot_dimension_numbers<[1], [0], [0], [1], [0, 0, 1, 1], [], []>} : vector<8x32xbf16>, vector<32x32xbf16>, vector<8x32xf32> -> vector<8x32xf32>
      %386 = arith.addf %380, %385 : vector<8x32xf32>
      %cst_196 = arith.constant 0.000000e+00 : f32
      %387 = vector.broadcast %cst_196 : f32 to vector<8x32xf32>
      %388 = arith.maximumf %386, %387 : vector<8x32xf32>
      %389 = vector.extract_strided_slice %118 {offsets = [3, 0, 0], sizes = [1, 1, 32], strides = [1, 1, 1]} : vector<6x1x32xf32> to vector<1x1x32xf32>
      %390 = vector.shape_cast %389 : vector<1x1x32xf32> to vector<1x32xf32>
      %391 = vector.extract_strided_slice %121 {offsets = [3, 0, 0], sizes = [1, 1, 32], strides = [1, 1, 1]} : vector<6x1x32xf32> to vector<1x1x32xf32>
      %392 = vector.shape_cast %391 : vector<1x1x32xf32> to vector<1x32xf32>
      %cst_197 = arith.constant dense<0.000000e+00> : vector<8xf32>
      %393 = vector.multi_reduction <add>, %388, %cst_197 [1] : vector<8x32xf32> to vector<8xf32>
      %394 = vector.shape_cast %393 : vector<8xf32> to vector<8x1xf32>
      %cst_198 = arith.constant 3.200000e+01 : f32
      %395 = vector.broadcast %cst_198 : f32 to vector<8x1xf32>
      %396 = arith.divf %394, %395 : vector<8x1xf32>
      %397 = vector.broadcast %396 : vector<8x1xf32> to vector<8x32xf32>
      %398 = arith.subf %388, %397 : vector<8x32xf32>
      %399 = arith.mulf %398, %398 : vector<8x32xf32>
      %cst_199 = arith.constant dense<0.000000e+00> : vector<8xf32>
      %400 = vector.multi_reduction <add>, %399, %cst_199 [1] : vector<8x32xf32> to vector<8xf32>
      %401 = vector.shape_cast %400 : vector<8xf32> to vector<8x1xf32>
      %cst_200 = arith.constant 0.0322580636 : f32
      %402 = vector.broadcast %cst_200 : f32 to vector<8x1xf32>
      %403 = arith.mulf %401, %402 : vector<8x1xf32>
      %404 = math.sqrt %403 : vector<8x1xf32>
      %cst_201 = arith.constant 9.99999997E-7 : f32
      %405 = vector.broadcast %cst_201 : f32 to vector<8x1xf32>
      %406 = arith.addf %404, %405 : vector<8x1xf32>
      %407 = tpu.reciprocal %406 {approx = true} : vector<8x1xf32> -> vector<8x1xf32>
      %408 = vector.broadcast %407 : vector<8x1xf32> to vector<8x32xf32>
      %409 = arith.mulf %398, %408 : vector<8x32xf32>
      %410 = vector.broadcast %390 : vector<1x32xf32> to vector<8x32xf32>
      %411 = arith.mulf %409, %410 : vector<8x32xf32>
      %412 = vector.broadcast %392 : vector<1x32xf32> to vector<8x32xf32>
      %413 = arith.addf %411, %412 : vector<8x32xf32>
      %414 = arith.addf %388, %413 : vector<8x32xf32>
      %c0_202 = arith.constant 0 : index
      %c0_203 = arith.constant 0 : index
      %415 = vector.load %arg24[%c0_202, %c0_203] : memref<8x32xf32, #tpu.memory_space<vmem>>, vector<8x32xf32>
      tpu.vector_store %arg24[%c0_202, %c0_203], %414 {strides = array<i32>} : memref<8x32xf32, #tpu.memory_space<vmem>>, vector<8x32xf32>,
      %c0_204 = arith.constant 0 : index
      %c0_205 = arith.constant 0 : index
      %416 = vector.load %arg24[%c0_204, %c0_205] : memref<8x32xf32, #tpu.memory_space<vmem>>, vector<8x32xf32>
      %417 = vector.extract_strided_slice %118 {offsets = [4, 0, 0], sizes = [1, 1, 32], strides = [1, 1, 1]} : vector<6x1x32xf32> to vector<1x1x32xf32>
      %418 = vector.shape_cast %417 : vector<1x1x32xf32> to vector<1x32xf32>
      %419 = vector.extract_strided_slice %121 {offsets = [4, 0, 0], sizes = [1, 1, 32], strides = [1, 1, 1]} : vector<6x1x32xf32> to vector<1x1x32xf32>
      %420 = vector.shape_cast %419 : vector<1x1x32xf32> to vector<1x32xf32>
      %cst_206 = arith.constant dense<0.000000e+00> : vector<8xf32>
      %421 = vector.multi_reduction <add>, %416, %cst_206 [1] : vector<8x32xf32> to vector<8xf32>
      %422 = vector.shape_cast %421 : vector<8xf32> to vector<8x1xf32>
      %cst_207 = arith.constant 3.200000e+01 : f32
      %423 = vector.broadcast %cst_207 : f32 to vector<8x1xf32>
      %424 = arith.divf %422, %423 : vector<8x1xf32>
      %425 = vector.broadcast %424 : vector<8x1xf32> to vector<8x32xf32>
      %426 = arith.subf %416, %425 : vector<8x32xf32>
      %427 = arith.mulf %426, %426 : vector<8x32xf32>
      %cst_208 = arith.constant dense<0.000000e+00> : vector<8xf32>
      %428 = vector.multi_reduction <add>, %427, %cst_208 [1] : vector<8x32xf32> to vector<8xf32>
      %429 = vector.shape_cast %428 : vector<8xf32> to vector<8x1xf32>
      %cst_209 = arith.constant 0.0322580636 : f32
      %430 = vector.broadcast %cst_209 : f32 to vector<8x1xf32>
      %431 = arith.mulf %429, %430 : vector<8x1xf32>
      %432 = math.sqrt %431 : vector<8x1xf32>
      %cst_210 = arith.constant 9.99999997E-7 : f32
      %433 = vector.broadcast %cst_210 : f32 to vector<8x1xf32>
      %434 = arith.addf %432, %433 : vector<8x1xf32>
      %435 = tpu.reciprocal %434 {approx = true} : vector<8x1xf32> -> vector<8x1xf32>
      %436 = vector.broadcast %435 : vector<8x1xf32> to vector<8x32xf32>
      %437 = arith.mulf %426, %436 : vector<8x32xf32>
      %438 = vector.broadcast %418 : vector<1x32xf32> to vector<8x32xf32>
      %439 = arith.mulf %437, %438 : vector<8x32xf32>
      %440 = vector.broadcast %420 : vector<1x32xf32> to vector<8x32xf32>
      %441 = arith.addf %439, %440 : vector<8x32xf32>
      %442 = arith.truncf %441 : vector<8x32xf32> to vector<8x32xbf16>
      %443 = arith.index_cast %109 : i32 to index
      %c0_211 = arith.constant 0 : index
      %c0_212 = arith.constant 0 : index
      %444 = vector.load %arg12[%443, %c0_211, %c0_212] : memref<3x32x96xbf16, #tpu.memory_space<vmem>>, vector<1x32x96xbf16>
      %445 = vector.shape_cast %444 : vector<1x32x96xbf16> to vector<32x96xbf16>
      %cst_213 = arith.constant dense<0.000000e+00> : vector<8x96xf32>
      %446 = tpu.matmul %442, %445, %cst_213 {dimension_numbers = #tpu.dot_dimension_numbers<[1], [0], [0], [1], [0, 0, 1, 1], [], []>} : vector<8x32xbf16>, vector<32x96xbf16>, vector<8x96xf32> -> vector<8x96xf32>
      %447 = arith.index_cast %109 : i32 to index
      %c0_214 = arith.constant 0 : index
      %c0_215 = arith.constant 0 : index
      %448 = vector.load %arg13[%447, %c0_214, %c0_215] : memref<3x1x96xf32, #tpu.memory_space<vmem>>, vector<1x1x96xf32>
      %449 = vector.shape_cast %448 : vector<1x1x96xf32> to vector<1x96xf32>
      %450 = vector.broadcast %449 : vector<1x96xf32> to vector<8x96xf32>
      %451 = arith.addf %446, %450 : vector<8x96xf32>
      %452 = vector.extract_strided_slice %451 {offsets = [0, 0], sizes = [8, 32], strides = [1, 1]} : vector<8x96xf32> to vector<8x32xf32>
      %cst_216 = arith.constant 5.000000e-01 : f32
      %453 = vector.broadcast %cst_216 : f32 to vector<8x32xf32>
      %454 = arith.mulf %452, %453 : vector<8x32xf32>
      %455 = vector.shape_cast %454 : vector<8x32xf32> to vector<8x8x4xf32>
      %456 = vector.extract_strided_slice %451 {offsets = [0, 32], sizes = [8, 32], strides = [1, 1]} : vector<8x96xf32> to vector<8x32xf32>
      %457 = vector.shape_cast %456 : vector<8x32xf32> to vector<8x8x4xf32>
      %458 = vector.extract_strided_slice %451 {offsets = [0, 64], sizes = [8, 32], strides = [1, 1]} : vector<8x96xf32> to vector<8x32xf32>
      %459 = vector.shape_cast %458 : vector<8x32xf32> to vector<8x8x4xf32>
      "tpu.trace_start"() <{level = 10 : i32, message = "lhd,mhd->hlm"}> : () -> ()
      %cst_217 = arith.constant dense<0.000000e+00> : vector<8x8x8xf32>
      %460 = tpu.matmul %455, %457, %cst_217 {dimension_numbers = #tpu.dot_dimension_numbers<[2], [2], [0], [0], [0, 1, 0, 0, 1, 0], [1], [1]>} : vector<8x8x4xf32>, vector<8x8x4xf32>, vector<8x8x8xf32> -> vector<8x8x8xf32>
      "tpu.trace_stop"() : () -> ()
      %c0_218 = arith.constant 0 : index
      %c0_219 = arith.constant 0 : index
      %c0_220 = arith.constant 0 : index
      %461 = vector.load %arg3[%c0_218, %c0_219, %c0_220] : memref<1x1x8xf32, #tpu.memory_space<vmem>>, vector<1x1x8xf32>
      %cst_221 = arith.constant 0.000000e+00 : f32
      %462 = vector.broadcast %cst_221 : f32 to vector<1x1x8xf32>
      %463 = arith.cmpf ogt, %461, %462 : vector<1x1x8xf32>
      %cst_222 = arith.constant -1.000000e+09 : f32
      %464 = vector.shape_cast %463 : vector<1x1x8xi1> to vector<1x1x8xi1>
      %465 = vector.broadcast %464 : vector<1x1x8xi1> to vector<8x8x8xi1>
      %466 = vector.broadcast %cst_222 : f32 to vector<8x8x8xf32>
      %467 = arith.select %465, %460, %466 : vector<8x8x8xi1>, vector<8x8x8xf32>
      %cst_223 = arith.constant dense<0xFF800000> : vector<8x8xf32>
      %468 = vector.multi_reduction <maximumf>, %467, %cst_223 [2] : vector<8x8x8xf32> to vector<8x8xf32>
      %469 = vector.shape_cast %468 : vector<8x8xf32> to vector<8x8x1xf32>
      %470 = vector.broadcast %469 : vector<8x8x1xf32> to vector<8x8x8xf32>
      %471 = arith.subf %467, %470 : vector<8x8x8xf32>
      %472 = math.exp %471 : vector<8x8x8xf32>
      %cst_224 = arith.constant dense<0.000000e+00> : vector<8x8xf32>
      %473 = vector.multi_reduction <add>, %472, %cst_224 [2] : vector<8x8x8xf32> to vector<8x8xf32>
      %474 = vector.shape_cast %473 : vector<8x8xf32> to vector<8x8x1xf32>
      %475 = tpu.reciprocal %474 {approx = true} : vector<8x8x1xf32> -> vector<8x8x1xf32>
      %476 = vector.broadcast %475 : vector<8x8x1xf32> to vector<8x8x8xf32>
      %477 = arith.mulf %472, %476 : vector<8x8x8xf32>
      "tpu.trace_start"() <{level = 10 : i32, message = "hlm,mhd->lhd"}> : () -> ()
      %cst_225 = arith.constant dense<0.000000e+00> : vector<8x4x8xf32>
      %478 = tpu.matmul %459, %477, %cst_225 {dimension_numbers = #tpu.dot_dimension_numbers<[0], [2], [2], [1], [0, 1, 0, 2, 1, 1], [1], [0]>} : vector<8x8x4xf32>, vector<8x8x8xf32>, vector<8x4x8xf32> -> vector<8x4x8xf32>
      %479 = tpu.transpose %478, [2, 0, 1] : vector<8x4x8xf32> -> vector<8x8x4xf32>
      "tpu.trace_stop"() : () -> ()
      %480 = vector.shape_cast %479 : vector<8x8x4xf32> to vector<8x32xf32>
      %481 = arith.truncf %480 : vector<8x32xf32> to vector<8x32xbf16>
      %482 = arith.index_cast %109 : i32 to index
      %c0_226 = arith.constant 0 : index
      %c0_227 = arith.constant 0 : index
      %483 = vector.load %arg14[%482, %c0_226, %c0_227] : memref<3x32x32xbf16, #tpu.memory_space<vmem>>, vector<1x32x32xbf16>
      %484 = vector.shape_cast %483 : vector<1x32x32xbf16> to vector<32x32xbf16>
      %cst_228 = arith.constant dense<0.000000e+00> : vector<8x32xf32>
      %485 = tpu.matmul %481, %484, %cst_228 {dimension_numbers = #tpu.dot_dimension_numbers<[1], [0], [0], [1], [0, 0, 1, 1], [], []>} : vector<8x32xbf16>, vector<32x32xbf16>, vector<8x32xf32> -> vector<8x32xf32>
      %486 = arith.addf %416, %485 : vector<8x32xf32>
      %487 = arith.index_cast %109 : i32 to index
      %c0_229 = arith.constant 0 : index
      %c0_230 = arith.constant 0 : index
      %488 = vector.load %arg15[%487, %c0_229, %c0_230] : memref<3x1x32xf32, #tpu.memory_space<vmem>>, vector<1x1x32xf32>
      %489 = vector.shape_cast %488 : vector<1x1x32xf32> to vector<1x32xf32>
      %490 = vector.broadcast %489 : vector<1x32xf32> to vector<8x32xf32>
      %491 = arith.addf %486, %490 : vector<8x32xf32>
      %492 = vector.extract_strided_slice %118 {offsets = [5, 0, 0], sizes = [1, 1, 32], strides = [1, 1, 1]} : vector<6x1x32xf32> to vector<1x1x32xf32>
      %493 = vector.shape_cast %492 : vector<1x1x32xf32> to vector<1x32xf32>
      %494 = vector.extract_strided_slice %121 {offsets = [5, 0, 0], sizes = [1, 1, 32], strides = [1, 1, 1]} : vector<6x1x32xf32> to vector<1x1x32xf32>
      %495 = vector.shape_cast %494 : vector<1x1x32xf32> to vector<1x32xf32>
      %cst_231 = arith.constant dense<0.000000e+00> : vector<8xf32>
      %496 = vector.multi_reduction <add>, %491, %cst_231 [1] : vector<8x32xf32> to vector<8xf32>
      %497 = vector.shape_cast %496 : vector<8xf32> to vector<8x1xf32>
      %cst_232 = arith.constant 3.200000e+01 : f32
      %498 = vector.broadcast %cst_232 : f32 to vector<8x1xf32>
      %499 = arith.divf %497, %498 : vector<8x1xf32>
      %500 = vector.broadcast %499 : vector<8x1xf32> to vector<8x32xf32>
      %501 = arith.subf %491, %500 : vector<8x32xf32>
      %502 = arith.mulf %501, %501 : vector<8x32xf32>
      %cst_233 = arith.constant dense<0.000000e+00> : vector<8xf32>
      %503 = vector.multi_reduction <add>, %502, %cst_233 [1] : vector<8x32xf32> to vector<8xf32>
      %504 = vector.shape_cast %503 : vector<8xf32> to vector<8x1xf32>
      %cst_234 = arith.constant 0.0322580636 : f32
      %505 = vector.broadcast %cst_234 : f32 to vector<8x1xf32>
      %506 = arith.mulf %504, %505 : vector<8x1xf32>
      %507 = math.sqrt %506 : vector<8x1xf32>
      %cst_235 = arith.constant 9.99999997E-7 : f32
      %508 = vector.broadcast %cst_235 : f32 to vector<8x1xf32>
      %509 = arith.addf %507, %508 : vector<8x1xf32>
      %510 = tpu.reciprocal %509 {approx = true} : vector<8x1xf32> -> vector<8x1xf32>
      %511 = vector.broadcast %510 : vector<8x1xf32> to vector<8x32xf32>
      %512 = arith.mulf %501, %511 : vector<8x32xf32>
      %513 = vector.broadcast %493 : vector<1x32xf32> to vector<8x32xf32>
      %514 = arith.mulf %512, %513 : vector<8x32xf32>
      %515 = vector.broadcast %495 : vector<1x32xf32> to vector<8x32xf32>
      %516 = arith.addf %514, %515 : vector<8x32xf32>
      %517 = arith.truncf %516 : vector<8x32xf32> to vector<8x32xbf16>
      %518 = arith.index_cast %109 : i32 to index
      %c0_236 = arith.constant 0 : index
      %c0_237 = arith.constant 0 : index
      %519 = vector.load %arg16[%518, %c0_236, %c0_237] : memref<3x32x2048xbf16, #tpu.memory_space<vmem>>, vector<1x32x2048xbf16>
      %520 = vector.shape_cast %519 : vector<1x32x2048xbf16> to vector<32x2048xbf16>
      %cst_238 = arith.constant dense<0.000000e+00> : vector<8x2048xf32>
      %521 = tpu.matmul %517, %520, %cst_238 {dimension_numbers = #tpu.dot_dimension_numbers<[1], [0], [0], [1], [0, 0, 1, 1], [], []>} : vector<8x32xbf16>, vector<32x2048xbf16>, vector<8x2048xf32> -> vector<8x2048xf32>
      %522 = arith.index_cast %109 : i32 to index
      %c0_239 = arith.constant 0 : index
      %c0_240 = arith.constant 0 : index
      %523 = vector.load %arg17[%522, %c0_239, %c0_240] : memref<3x1x2048xf32, #tpu.memory_space<vmem>>, vector<1x1x2048xf32>
      %524 = vector.shape_cast %523 : vector<1x1x2048xf32> to vector<1x2048xf32>
      %525 = vector.broadcast %524 : vector<1x2048xf32> to vector<8x2048xf32>
      %526 = arith.addf %521, %525 : vector<8x2048xf32>
      %cst_241 = arith.constant 0.000000e+00 : f32
      %527 = vector.broadcast %cst_241 : f32 to vector<8x2048xf32>
      %528 = arith.maximumf %526, %527 : vector<8x2048xf32>
      %529 = arith.truncf %528 : vector<8x2048xf32> to vector<8x2048xbf16>
      %530 = arith.index_cast %109 : i32 to index
      %c0_242 = arith.constant 0 : index
      %c0_243 = arith.constant 0 : index
      %531 = vector.load %arg18[%530, %c0_242, %c0_243] : memref<3x2048x32xbf16, #tpu.memory_space<vmem>>, vector<1x2048x32xbf16>
      %532 = vector.shape_cast %531 : vector<1x2048x32xbf16> to vector<2048x32xbf16>
      %cst_244 = arith.constant dense<0.000000e+00> : vector<8x32xf32>
      %533 = tpu.matmul %529, %532, %cst_244 {dimension_numbers = #tpu.dot_dimension_numbers<[1], [0], [0], [1], [0, 0, 1, 1], [], []>} : vector<8x2048xbf16>, vector<2048x32xbf16>, vector<8x32xf32> -> vector<8x32xf32>
      %534 = arith.addf %491, %533 : vector<8x32xf32>
      %535 = arith.index_cast %109 : i32 to index
      %c0_245 = arith.constant 0 : index
      %c0_246 = arith.constant 0 : index
      %536 = vector.load %arg19[%535, %c0_245, %c0_246] : memref<3x1x32xf32, #tpu.memory_space<vmem>>, vector<1x1x32xf32>
      %537 = vector.shape_cast %536 : vector<1x1x32xf32> to vector<1x32xf32>
      %538 = vector.broadcast %537 : vector<1x32xf32> to vector<8x32xf32>
      %539 = arith.addf %534, %538 : vector<8x32xf32>
      %c0_247 = arith.constant 0 : index
      %c0_248 = arith.constant 0 : index
      %540 = vector.load %arg24[%c0_247, %c0_248] : memref<8x32xf32, #tpu.memory_space<vmem>>, vector<8x32xf32>
      tpu.vector_store %arg24[%c0_247, %c0_248], %539 {strides = array<i32>} : memref<8x32xf32, #tpu.memory_space<vmem>>, vector<8x32xf32>,
    }
    %c3_i32_8 = arith.constant 3 : i32
    %c0_9 = arith.constant 0 : index
    %c0_10 = arith.constant 0 : index
    %c0_11 = arith.constant 0 : index
    %8 = vector.load %arg1[%c0_9, %c0_10, %c0_11] : memref<1x8x128xf32, #tpu.memory_space<vmem>>, vector<1x8x128xf32>
    %9 = vector.shape_cast %8 : vector<1x8x128xf32> to vector<8x128xf32>
    %c0_12 = arith.constant 0 : index
    %c0_13 = arith.constant 0 : index
    %c0_14 = arith.constant 0 : index
    %10 = vector.load %arg2[%c0_12, %c0_13, %c0_14] : memref<1x8x32xf32, #tpu.memory_space<vmem>>, vector<1x8x32xf32>
    %11 = vector.shape_cast %10 : vector<1x8x32xf32> to vector<8x32xf32>
    %c0_15 = arith.constant 0 : index
    %c0_16 = arith.constant 0 : index
    %12 = vector.load %arg24[%c0_15, %c0_16] : memref<8x32xf32, #tpu.memory_space<vmem>>, vector<8x32xf32>
    %c0_17 = arith.constant 0 : index
    %c0_18 = arith.constant 0 : index
    %13 = vector.load %arg20[%c0_17, %c0_18] : memref<1x32xf32, #tpu.memory_space<vmem>>, vector<1x32xf32>
    %c0_19 = arith.constant 0 : index
    %c0_20 = arith.constant 0 : index
    %14 = vector.load %arg21[%c0_19, %c0_20] : memref<1x32xf32, #tpu.memory_space<vmem>>, vector<1x32xf32>
    %cst_21 = arith.constant dense<0.000000e+00> : vector<8xf32>
    %15 = vector.multi_reduction <add>, %12, %cst_21 [1] : vector<8x32xf32> to vector<8xf32>
    %16 = vector.shape_cast %15 : vector<8xf32> to vector<8x1xf32>
    %cst_22 = arith.constant 3.200000e+01 : f32
    %17 = vector.broadcast %cst_22 : f32 to vector<8x1xf32>
    %18 = arith.divf %16, %17 : vector<8x1xf32>
    %19 = vector.broadcast %18 : vector<8x1xf32> to vector<8x32xf32>
    %20 = arith.subf %12, %19 : vector<8x32xf32>
    %21 = arith.mulf %20, %20 : vector<8x32xf32>
    %cst_23 = arith.constant dense<0.000000e+00> : vector<8xf32>
    %22 = vector.multi_reduction <add>, %21, %cst_23 [1] : vector<8x32xf32> to vector<8xf32>
    %23 = vector.shape_cast %22 : vector<8xf32> to vector<8x1xf32>
    %cst_24 = arith.constant 0.0322580636 : f32
    %24 = vector.broadcast %cst_24 : f32 to vector<8x1xf32>
    %25 = arith.mulf %23, %24 : vector<8x1xf32>
    %26 = math.sqrt %25 : vector<8x1xf32>
    %cst_25 = arith.constant 9.99999997E-7 : f32
    %27 = vector.broadcast %cst_25 : f32 to vector<8x1xf32>
    %28 = arith.addf %26, %27 : vector<8x1xf32>
    %29 = tpu.reciprocal %28 {approx = true} : vector<8x1xf32> -> vector<8x1xf32>
    %30 = vector.broadcast %29 : vector<8x1xf32> to vector<8x32xf32>
    %31 = arith.mulf %20, %30 : vector<8x32xf32>
    %32 = vector.broadcast %13 : vector<1x32xf32> to vector<8x32xf32>
    %33 = arith.mulf %31, %32 : vector<8x32xf32>
    %34 = vector.broadcast %14 : vector<1x32xf32> to vector<8x32xf32>
    %35 = arith.addf %33, %34 : vector<8x32xf32>
    %c0_26 = arith.constant 0 : index
    %c0_27 = arith.constant 0 : index
    %c0_28 = arith.constant 0 : index
    %36 = vector.load %arg5[%c0_26, %c0_27, %c0_28] : memref<2x1x128xf32, #tpu.memory_space<vmem>>, vector<1x1x128xf32>
    %37 = vector.shape_cast %36 : vector<1x1x128xf32> to vector<1x128xf32>
    %38 = vector.broadcast %37 : vector<1x128xf32> to vector<8x128xf32>
    %39 = arith.mulf %9, %38 : vector<8x128xf32>
    %cst_29 = arith.constant dense<0.000000e+00> : vector<8xf32>
    %40 = vector.multi_reduction <add>, %39, %cst_29 [1] : vector<8x128xf32> to vector<8xf32>
    %41 = vector.shape_cast %40 : vector<8xf32> to vector<8x1xf32>
    %c0_30 = arith.constant 0 : index
    %c0_31 = arith.constant 0 : index
    %c0_32 = arith.constant 0 : index
    %42 = vector.load %arg6[%c0_30, %c0_31, %c0_32] : memref<2x1x32xf32, #tpu.memory_space<vmem>>, vector<1x1x32xf32>
    %43 = vector.shape_cast %42 : vector<1x1x32xf32> to vector<1x32xf32>
    %44 = vector.broadcast %43 : vector<1x32xf32> to vector<8x32xf32>
    %45 = arith.mulf %11, %44 : vector<8x32xf32>
    %cst_33 = arith.constant dense<0.000000e+00> : vector<8xf32>
    %46 = vector.multi_reduction <add>, %45, %cst_33 [1] : vector<8x32xf32> to vector<8xf32>
    %47 = vector.shape_cast %46 : vector<8xf32> to vector<8x1xf32>
    %48 = arith.addf %41, %47 : vector<8x1xf32>
    %c0_34 = arith.constant 0 : index
    %c0_35 = arith.constant 0 : index
    %c0_36 = arith.constant 0 : index
    %49 = vector.load %arg7[%c0_34, %c0_35, %c0_36] : memref<2x1x1xf32, #tpu.memory_space<vmem>>, vector<1x1x1xf32>
    %50 = vector.shape_cast %49 : vector<1x1x1xf32> to vector<1x1xf32>
    %51 = vector.broadcast %50 : vector<1x1xf32> to vector<8x1xf32>
    %52 = arith.addf %48, %51 : vector<8x1xf32>
    %c1 = arith.constant 1 : index
    %c0_37 = arith.constant 0 : index
    %c0_38 = arith.constant 0 : index
    %53 = vector.load %arg5[%c1, %c0_37, %c0_38] : memref<2x1x128xf32, #tpu.memory_space<vmem>>, vector<1x1x128xf32>
    %54 = vector.shape_cast %53 : vector<1x1x128xf32> to vector<1x128xf32>
    %55 = vector.broadcast %54 : vector<1x128xf32> to vector<8x128xf32>
    %56 = arith.mulf %9, %55 : vector<8x128xf32>
    %cst_39 = arith.constant dense<0.000000e+00> : vector<8xf32>
    %57 = vector.multi_reduction <add>, %56, %cst_39 [1] : vector<8x128xf32> to vector<8xf32>
    %58 = vector.shape_cast %57 : vector<8xf32> to vector<8x1xf32>
    %c1_40 = arith.constant 1 : index
    %c0_41 = arith.constant 0 : index
    %c0_42 = arith.constant 0 : index
    %59 = vector.load %arg6[%c1_40, %c0_41, %c0_42] : memref<2x1x32xf32, #tpu.memory_space<vmem>>, vector<1x1x32xf32>
    %60 = vector.shape_cast %59 : vector<1x1x32xf32> to vector<1x32xf32>
    %61 = vector.broadcast %60 : vector<1x32xf32> to vector<8x32xf32>
    %62 = arith.mulf %35, %61 : vector<8x32xf32>
    %cst_43 = arith.constant dense<0.000000e+00> : vector<8xf32>
    %63 = vector.multi_reduction <add>, %62, %cst_43 [1] : vector<8x32xf32> to vector<8xf32>
    %64 = vector.shape_cast %63 : vector<8xf32> to vector<8x1xf32>
    %65 = arith.addf %58, %64 : vector<8x1xf32>
    %c1_44 = arith.constant 1 : index
    %c0_45 = arith.constant 0 : index
    %c0_46 = arith.constant 0 : index
    %66 = vector.load %arg7[%c1_44, %c0_45, %c0_46] : memref<2x1x1xf32, #tpu.memory_space<vmem>>, vector<1x1x1xf32>
    %67 = vector.shape_cast %66 : vector<1x1x1xf32> to vector<1x1xf32>
    %68 = vector.broadcast %67 : vector<1x1xf32> to vector<8x1xf32>
    %69 = arith.addf %65, %68 : vector<8x1xf32>
    %c0_47 = arith.constant 0 : index
    %c0_48 = arith.constant 0 : index
    %c0_49 = arith.constant 0 : index
    %70 = vector.load %arg4[%c0_47, %c0_48, %c0_49] : memref<1x8x1xf32, #tpu.memory_space<vmem>>, vector<1x8x1xf32>
    %71 = vector.shape_cast %70 : vector<1x8x1xf32> to vector<8x1xf32>
    %72 = arith.mulf %71, %52 : vector<8x1xf32>
    %cst_50 = arith.constant 1.000000e+00 : f32
    %73 = vector.broadcast %cst_50 : f32 to vector<8x1xf32>
    %74 = arith.subf %73, %71 : vector<8x1xf32>
    %cst_51 = arith.constant -1.000000e+30 : f32
    %75 = vector.broadcast %cst_51 : f32 to vector<8x1xf32>
    %76 = arith.mulf %74, %75 : vector<8x1xf32>
    %77 = arith.addf %72, %76 : vector<8x1xf32>
    %cst_52 = arith.constant dense<0xFF800000> : vector<1xf32>
    %78 = vector.multi_reduction <maximumf>, %77, %cst_52 [0] : vector<8x1xf32> to vector<1xf32>
    %79 = vector.shape_cast %78 : vector<1xf32> to vector<1x1xf32>
    %80 = vector.broadcast %79 : vector<1x1xf32> to vector<8x1xf32>
    %81 = arith.subf %77, %80 : vector<8x1xf32>
    %82 = math.exp %81 : vector<8x1xf32>
    %cst_53 = arith.constant dense<0.000000e+00> : vector<1xf32>
    %83 = vector.multi_reduction <add>, %82, %cst_53 [0] : vector<8x1xf32> to vector<1xf32>
    %84 = vector.shape_cast %83 : vector<1xf32> to vector<1x1xf32>
    %85 = math.log %84 : vector<1x1xf32>
    %86 = vector.broadcast %85 : vector<1x1xf32> to vector<8x1xf32>
    %87 = arith.subf %81, %86 : vector<8x1xf32>
    %88 = vector.shape_cast %87 : vector<8x1xf32> to vector<1x8x1xf32>
    %c0_54 = arith.constant 0 : index
    %c0_55 = arith.constant 0 : index
    %c0_56 = arith.constant 0 : index
    %89 = vector.load %arg22[%c0_54, %c0_55, %c0_56] : memref<1x8x1xf32, #tpu.memory_space<vmem>>, vector<1x8x1xf32>
    tpu.vector_store %arg22[%c0_54, %c0_55, %c0_56], %88 {strides = array<i32>} : memref<1x8x1xf32, #tpu.memory_space<vmem>>, vector<1x8x1xf32>,
    %90 = arith.mulf %71, %69 : vector<8x1xf32>
    %cst_57 = arith.constant 1.000000e+00 : f32
    %91 = vector.broadcast %cst_57 : f32 to vector<8x1xf32>
    %92 = arith.subf %91, %71 : vector<8x1xf32>
    %cst_58 = arith.constant -1.000000e+30 : f32
    %93 = vector.broadcast %cst_58 : f32 to vector<8x1xf32>
    %94 = arith.mulf %92, %93 : vector<8x1xf32>
    %95 = arith.addf %90, %94 : vector<8x1xf32>
    %cst_59 = arith.constant dense<0xFF800000> : vector<1xf32>
    %96 = vector.multi_reduction <maximumf>, %95, %cst_59 [0] : vector<8x1xf32> to vector<1xf32>
    %97 = vector.shape_cast %96 : vector<1xf32> to vector<1x1xf32>
    %98 = vector.broadcast %97 : vector<1x1xf32> to vector<8x1xf32>
    %99 = arith.subf %95, %98 : vector<8x1xf32>
    %100 = math.exp %99 : vector<8x1xf32>
    %cst_60 = arith.constant dense<0.000000e+00> : vector<1xf32>
    %101 = vector.multi_reduction <add>, %100, %cst_60 [0] : vector<8x1xf32> to vector<1xf32>
    %102 = vector.shape_cast %101 : vector<1xf32> to vector<1x1xf32>
    %103 = math.log %102 : vector<1x1xf32>
    %104 = vector.broadcast %103 : vector<1x1xf32> to vector<8x1xf32>
    %105 = arith.subf %99, %104 : vector<8x1xf32>
    %106 = vector.shape_cast %105 : vector<8x1xf32> to vector<1x8x1xf32>
    %c0_61 = arith.constant 0 : index
    %c0_62 = arith.constant 0 : index
    %c0_63 = arith.constant 0 : index
    %107 = vector.load %arg23[%c0_61, %c0_62, %c0_63] : memref<1x8x1xf32, #tpu.memory_space<vmem>>, vector<1x8x1xf32>
    tpu.vector_store %arg23[%c0_61, %c0_62, %c0_63], %106 {strides = array<i32>} : memref<1x8x1xf32, #tpu.memory_space<vmem>>, vector<1x8x1xf32>,
    return
  }
  func.func @transform_0(%arg0: i32) -> (i32, i32, i32) {
    %c0_i32 = arith.constant 0 : i32
    %c0_i32_0 = arith.constant 0 : i32
    %c0_i32_1 = arith.constant 0 : i32
    return %arg0, %c0_i32, %c0_i32_0 : i32, i32, i32
  }
  func.func @transform_1(%arg0: i32) -> (i32, i32, i32) {
    %c0_i32 = arith.constant 0 : i32
    %c0_i32_0 = arith.constant 0 : i32
    %c0_i32_1 = arith.constant 0 : i32
    return %arg0, %c0_i32, %c0_i32_0 : i32, i32, i32
  }
  func.func @transform_2(%arg0: i32) -> (i32, i32, i32) {
    %c0_i32 = arith.constant 0 : i32
    %c0_i32_0 = arith.constant 0 : i32
    %c0_i32_1 = arith.constant 0 : i32
    return %arg0, %c0_i32, %c0_i32_0 : i32, i32, i32
  }
  func.func @transform_3(%arg0: i32) -> (i32, i32, i32) {
    %c0_i32 = arith.constant 0 : i32
    %c0_i32_0 = arith.constant 0 : i32
    %c0_i32_1 = arith.constant 0 : i32
    return %arg0, %c0_i32, %c0_i32_0 : i32, i32, i32
  }
  func.func @transform_4(%arg0: i32) -> (i32, i32, i32) {
    %c0_i32 = arith.constant 0 : i32
    %c0_i32_0 = arith.constant 0 : i32
    %c0_i32_1 = arith.constant 0 : i32
    %c0_i32_2 = arith.constant 0 : i32
    return %c0_i32, %c0_i32_0, %c0_i32_1 : i32, i32, i32
  }
  func.func @transform_5(%arg0: i32) -> (i32, i32, i32) {
    %c0_i32 = arith.constant 0 : i32
    %c0_i32_0 = arith.constant 0 : i32
    %c0_i32_1 = arith.constant 0 : i32
    %c0_i32_2 = arith.constant 0 : i32
    return %c0_i32, %c0_i32_0, %c0_i32_1 : i32, i32, i32
  }
  func.func @transform_6(%arg0: i32) -> (i32, i32, i32) {
    %c0_i32 = arith.constant 0 : i32
    %c0_i32_0 = arith.constant 0 : i32
    %c0_i32_1 = arith.constant 0 : i32
    %c0_i32_2 = arith.constant 0 : i32
    return %c0_i32, %c0_i32_0, %c0_i32_1 : i32, i32, i32
  }
  func.func @transform_7(%arg0: i32) -> (i32, i32, i32, i32) {
    %c0_i32 = arith.constant 0 : i32
    %c0_i32_0 = arith.constant 0 : i32
    %c0_i32_1 = arith.constant 0 : i32
    %c0_i32_2 = arith.constant 0 : i32
    %c0_i32_3 = arith.constant 0 : i32
    return %c0_i32, %c0_i32_0, %c0_i32_1, %c0_i32_2 : i32, i32, i32, i32
  }
  func.func @transform_8(%arg0: i32) -> (i32, i32, i32) {
    %c0_i32 = arith.constant 0 : i32
    %c0_i32_0 = arith.constant 0 : i32
    %c0_i32_1 = arith.constant 0 : i32
    %c0_i32_2 = arith.constant 0 : i32
    return %c0_i32, %c0_i32_0, %c0_i32_1 : i32, i32, i32
  }
  func.func @transform_9(%arg0: i32) -> (i32, i32, i32, i32) {
    %c0_i32 = arith.constant 0 : i32
    %c0_i32_0 = arith.constant 0 : i32
    %c0_i32_1 = arith.constant 0 : i32
    %c0_i32_2 = arith.constant 0 : i32
    %c0_i32_3 = arith.constant 0 : i32
    return %c0_i32, %c0_i32_0, %c0_i32_1, %c0_i32_2 : i32, i32, i32, i32
  }
  func.func @transform_10(%arg0: i32) -> (i32, i32, i32, i32) {
    %c0_i32 = arith.constant 0 : i32
    %c0_i32_0 = arith.constant 0 : i32
    %c0_i32_1 = arith.constant 0 : i32
    %c0_i32_2 = arith.constant 0 : i32
    %c0_i32_3 = arith.constant 0 : i32
    return %c0_i32, %c0_i32_0, %c0_i32_1, %c0_i32_2 : i32, i32, i32, i32
  }
  func.func @transform_11(%arg0: i32) -> (i32, i32, i32) {
    %c0_i32 = arith.constant 0 : i32
    %c0_i32_0 = arith.constant 0 : i32
    %c0_i32_1 = arith.constant 0 : i32
    %c0_i32_2 = arith.constant 0 : i32
    return %c0_i32, %c0_i32_0, %c0_i32_1 : i32, i32, i32
  }
  func.func @transform_12(%arg0: i32) -> (i32, i32, i32) {
    %c0_i32 = arith.constant 0 : i32
    %c0_i32_0 = arith.constant 0 : i32
    %c0_i32_1 = arith.constant 0 : i32
    %c0_i32_2 = arith.constant 0 : i32
    return %c0_i32, %c0_i32_0, %c0_i32_1 : i32, i32, i32
  }
  func.func @transform_13(%arg0: i32) -> (i32, i32, i32) {
    %c0_i32 = arith.constant 0 : i32
    %c0_i32_0 = arith.constant 0 : i32
    %c0_i32_1 = arith.constant 0 : i32
    %c0_i32_2 = arith.constant 0 : i32
    return %c0_i32, %c0_i32_0, %c0_i32_1 : i32, i32, i32
  }
  func.func @transform_14(%arg0: i32) -> (i32, i32, i32) {
    %c0_i32 = arith.constant 0 : i32
    %c0_i32_0 = arith.constant 0 : i32
    %c0_i32_1 = arith.constant 0 : i32
    %c0_i32_2 = arith.constant 0 : i32
    return %c0_i32, %c0_i32_0, %c0_i32_1 : i32, i32, i32
  }
  func.func @transform_15(%arg0: i32) -> (i32, i32, i32) {
    %c0_i32 = arith.constant 0 : i32
    %c0_i32_0 = arith.constant 0 : i32
    %c0_i32_1 = arith.constant 0 : i32
    %c0_i32_2 = arith.constant 0 : i32
    return %c0_i32, %c0_i32_0, %c0_i32_1 : i32, i32, i32
  }
  func.func @transform_16(%arg0: i32) -> (i32, i32, i32) {
    %c0_i32 = arith.constant 0 : i32
    %c0_i32_0 = arith.constant 0 : i32
    %c0_i32_1 = arith.constant 0 : i32
    %c0_i32_2 = arith.constant 0 : i32
    return %c0_i32, %c0_i32_0, %c0_i32_1 : i32, i32, i32
  }
  func.func @transform_17(%arg0: i32) -> (i32, i32, i32) {
    %c0_i32 = arith.constant 0 : i32
    %c0_i32_0 = arith.constant 0 : i32
    %c0_i32_1 = arith.constant 0 : i32
    %c0_i32_2 = arith.constant 0 : i32
    return %c0_i32, %c0_i32_0, %c0_i32_1 : i32, i32, i32
  }
  func.func @transform_18(%arg0: i32) -> (i32, i32, i32) {
    %c0_i32 = arith.constant 0 : i32
    %c0_i32_0 = arith.constant 0 : i32
    %c0_i32_1 = arith.constant 0 : i32
    %c0_i32_2 = arith.constant 0 : i32
    return %c0_i32, %c0_i32_0, %c0_i32_1 : i32, i32, i32
  }
  func.func @transform_19(%arg0: i32) -> (i32, i32) {
    %c0_i32 = arith.constant 0 : i32
    %c0_i32_0 = arith.constant 0 : i32
    %c0_i32_1 = arith.constant 0 : i32
    return %c0_i32, %c0_i32_0 : i32, i32
  }
  func.func @transform_20(%arg0: i32) -> (i32, i32) {
    %c0_i32 = arith.constant 0 : i32
    %c0_i32_0 = arith.constant 0 : i32
    %c0_i32_1 = arith.constant 0 : i32
    return %c0_i32, %c0_i32_0 : i32, i32
  }
  func.func @transform_21(%arg0: i32) -> (i32, i32, i32) {
    %c0_i32 = arith.constant 0 : i32
    %c0_i32_0 = arith.constant 0 : i32
    %c0_i32_1 = arith.constant 0 : i32
    return %arg0, %c0_i32, %c0_i32_0 : i32, i32, i32
  }
  func.func @transform_22(%arg0: i32) -> (i32, i32, i32) {
    %c0_i32 = arith.constant 0 : i32
    %c0_i32_0 = arith.constant 0 : i32
    %c0_i32_1 = arith.constant 0 : i32
    return %arg0, %c0_i32, %c0_i32_0 : i32, i32, i32
  }
}

</mosaic_0001>

<bundles_post_ra>
// kernel: transformer_output_forward.1
= control target key start
LH: loop header
LB: loop body
LE: loop exit
PB: predicated region body
PF: predicated region fallthrough
CT: control target
= control target key end

     0   :  { %s9666_s0 = inlined_call_operand.vmem [shape: f32[2,8,128], index: 0, kind: input, shape index: {}]   ;;  %s9667_s1 = inlined_call_operand.vmem [shape: f32[2,8,32], index: 1, kind: input, shape index: {}]   ;;  %s9668_s2 = inlined_call_operand.vmem [shape: f32[2,1,8], index: 2, kind: input, shape index: {}]   ;;  %s9669_s3 = inlined_call_operand.vmem [shape: f32[2,8,1], index: 3, kind: input, shape index: {}]   ;;  %s9670_s4 = inlined_call_operand.vmem [shape: f32[2,1,128], index: 4, kind: input, shape index: {}]   ;;  %s9671_s5 = inlined_call_operand.vmem [shape: f32[2,1,32], index: 5, kind: input, shape index: {}]   ;;  %s9672_s6 = inlined_call_operand.vmem [shape: f32[2,1,1], index: 6, kind: input, shape index: {}]   ;;  %s9673_s7 = inlined_call_operand.vmem [shape: bf16[3,7,32,32], index: 7, kind: input, shape index: {}]   ;;  %s9674_s8 = inlined_call_operand.vmem [shape: f32[3,1,32], index: 8, kind: input, shape index: {}]   ;;  %s9675_s9 = inlined_call_operand.vmem [shape: f32[3,6,1,32], index: 9, kind: input, shape index: {}]   ;;  %s9676_s10 = inlined_call_operand.vmem [shape: f32[3,6,1,32], index: 10, kind: input, shape index: {}]   ;;  %s9677_s11 = inlined_call_operand.vmem [shape: bf16[3,32,96], index: 11, kind: input, shape index: {}]   ;;  %s9678_s12 = inlined_call_operand.vmem [shape: f32[3,1,96], index: 12, kind: input, shape index: {}]   ;;  %s9679_s13 = inlined_call_operand.vmem [shape: bf16[3,32,32], index: 13, kind: input, shape index: {}]   ;;  %s9680_s14 = inlined_call_operand.vmem [shape: f32[3,1,32], index: 14, kind: input, shape index: {}]   ;;  %s9681_s15 = inlined_call_operand.vmem [shape: bf16[3,32,2048], index: 15, kind: input, shape index: {}]   ;;  %s9682_s16 = inlined_call_operand.vmem [shape: f32[3,1,2048], index: 16, kind: input, shape index: {}]   ;;  %s9683_s17 = inlined_call_operand.vmem [shape: bf16[3,2048,32], index: 17, kind: input, shape index: {}]   ;;  %s9684_s18 = inlined_call_operand.vmem [shape: f32[3,1,32], index: 18, kind: input, shape index: {}]   ;;  %s9685_s19 = inlined_call_operand.vmem [shape: f32[1,32], index: 19, kind: input, shape index: {}]   ;;  %s9686_s20 = inlined_call_operand.vmem [shape: f32[1,32], index: 20, kind: input, shape index: {}]   ;;  %s9687_s21 = inlined_call_operand.vmem [shape: f32[2,8,1], index: 21, kind: output, shape index: {0}]   ;;  %s9688_s22 = inlined_call_operand.vmem [shape: f32[2,8,1], index: 22, kind: output, shape index: {1}]  }
   0x1   :  { %9693 = sst [smem:[#allocation5_spill]] %s9666_s0 }
   0x2   :  { %9694 = sst [smem:[#allocation6_spill]] %s9667_s1 }
   0x3   :  { %9695 = sst [smem:[#allocation7_spill]] %s9668_s2 }
   0x4   :  { %9696 = sst [smem:[#allocation8_spill]] %s9669_s3  ;;  %s8665_s3 = smov 0  }
   0x5   :  { %9697 = sst [smem:[#allocation9_spill]] %s9670_s4 }
   0x6   :  { %9698 = sst [smem:[#allocation10_spill]] %s9671_s5 }
   0x7   :  { %9699 = sst [smem:[#allocation11_spill]] %s9672_s6 }
   0x8   :  { %9700 = sst [smem:[#allocation12_spill]] %s9682_s16 }
   0x9   :  { %9701 = sst [smem:[#allocation13_spill]] %s9684_s18 }
   0xa   :  { %9702 = sst [smem:[#allocation14_spill]] %s9685_s19 }
   0xb   :  { %9703 = sst [smem:[#allocation15_spill]] %s9686_s20 }
   0xc LB: > { %9704 = sst [smem:[#allocation4_spill]] %s8522_s3  ;;  %s7318_s28 = sadd.s32 4294967295, %s8522_s3   ;;  %s8522_s3 = sphi %s8665_s3, %s33_s3  }
   0xd   : > { %p7322_p0 = scmp.ge.s32.totalorder %s8522_s3, 1  ;;  %p640_p1 = scmp.lt.s32.totalorder %s8522_s3, 3 }
   0xf   : > { %p641_p2 = pnand %p7322_p0, %p640_p1 }
  0x10   : > { %p715_p3 = scmp.lt.s32.totalorder (!%p641_p2), %s7318_s28, 1  ;;  %s9706_s24 = sld [smem:[#allocation5_spill]] (!%p641_p2) }
  0x11   : > { %644 = sbr.rel (%p641_p2) target bundleno = 5865 (0x16e9), region = 104  ;;  %s9707_s2 = sld [smem:[#allocation6_spill]] (!%p641_p2) }
  0x12   : > { %s9708_s19 = sld [smem:[#allocation8_spill]] (!%p641_p2)  ;;  %s8706_s5 = smov (!%p641_p2), 0  }
  0x16   : > { %vm742_vm0 = vcmask 256000   ;;  %v8528_v0 = vmov 0.0   ;;  %s9725_s28 = smov (!%p715_p3, %s7318_s28), 1  ;;  %vm740_vm1 = vcmask 261120  }
  0x17   : > { %743 = vst.msk [vmem:[#allocation3] sm:$0x7] %vm742_vm0, %v8528_v0  ;;  %744 = vst.msk [vmem:[#allocation3 + $0xb] sm:$0x7] %vm742_vm0, %v8528_v0  ;;  %s8676_s29 = sshll.u32 %s9725_s28, 3 }
  0x18   : > { %s718_s6 = scalar_lea.vmem %s9706_s24, %s8676_s29  ;;  %s8690_s27 = scalar_lea.vmem %s9707_s2, %s8676_s29 }
  0x19   : > { %s729_s30 = scalar_lea.vmem %s9708_s19, %s8676_s29  ;;  %s733_s16 = scalar_lea.vmem %s9687_s21, %s8676_s29  ;;  %v739_v1 = vld [vmem:[%s8690_s27] sm:$0xff] }
  0x1a   : > { %741 = vst.msk [vmem:[#allocation2] sm:$0xff] %vm740_vm1, %v739_v1 }
  0x1b LB: >> { %v8529_v3 = vmov 0.0   ;;  %s7622_s18 = smul.u32 112, %s8526_s5  ;;  %vm8530_vm2 = vmmov 0   ;;  %s7626_s23 = sshll.u32 %s8526_s5, 10  ;;  %vm2754_vm13 = vcmask 1043456   ;;  %vm2751_vm14 = vcmask 31744   ;;  %s8526_s5 = sphi %s8706_s5, %s750_s5  }
  0x1c   : >> { %7925 = vmatprep.subr.bf16.mxu0 %v8529_v3  ;;  %7933 = vmatprep.subr.bf16.mxu1 %v8529_v3  ;;  %s8774_s26 = scalar_lea.vmem %s9683_s17, %s7626_s23  ;;  %s782_s0 = scalar_lea.vmem %s9674_s8, %s8526_s5 }
  0x1d   : >> { %7929 = vmatprep.mubr.msk.bf16.mxu0 %vm8530_vm2, %v8529_v3  ;;  %7937 = vmatprep.mubr.msk.bf16.mxu1 %vm8530_vm2, %v8529_v3  ;;  %s8722_s3 = scalar_lea.vmem %s9673_s7, %s7622_s18  ;;  %v8833_v36 = vld [vmem:[%s782_s0] ss:$0 sm:$0xff]  ;;  %s784_s18 = smul.u32 6, %s8526_s5 }
  0x1e   : >> { %v8725_v4 = vld [vmem:[%s8722_s3 + $0x8] sm:$0xff]   ;;  %v8728_v5 = vld [vmem:[%s8722_s3 + $0x18] sm:$0xff]   ;;  %v8732_v6 = vld [vmem:[%s8722_s3] sm:$0xff]   ;;  %s2377_s24 = scalar_lea.vmem %s9678_s12, %s8526_s5  ;;  %s8531_s25 = smov 120  }
  0x1f   : >> { %7926 = vmatpush3.bf16.msra.mxu0 %v8725_v4  ;;  %7934 = vmatpush3.bf16.msra.mxu1 %v8728_v5  ;;  %v8737_v7 = vld [vmem:[%s8722_s3 + $0x10] sm:$0xff]   ;;  %v8742_v12 = vld [vmem:[%s8722_s3 + $0x28] sm:$0xff]   ;;  %v8747_v13 = vld [vmem:[%s8722_s3 + $0x38] sm:$0xff]   ;;  %s8842_s23 = scalar_lea.vmem %s9675_s9, %s784_s18  ;;  %s8847_s2 = scalar_lea.vmem %s9676_s10, %s784_s18 }
  0x20   : >> { %7927 = vmatprep.subr.bf16.mxu0 %v8529_v3  ;;  %7935 = vmatprep.subr.bf16.mxu1 %v8529_v3  ;;  %v8751_v14 = vld [vmem:[%s8722_s3 + $0x20] sm:$0xff]   ;;  %v8755_v15 = vld [vmem:[%s8722_s3 + $0x30] sm:$0xff]   ;;  %v8769_v20 = vld [vmem:[%s8722_s3 + $0x48] sm:$0xff]   ;;  %s8532_s4 = smov 124   ;;  %s8533_s0 = smov 116  }
  0x21   : >> { %v805_v2 = vld [vmem:[#allocation2] sm:$0xff]  ;;  %v8779_v21 = vld [vmem:[%s8722_s3 + $0x58] sm:$0xff]   ;;  %v8787_v24 = vld [vmem:[%s8722_s3 + $0x50] sm:$0xff]   ;;  %s8535_s19 = smov 112   ;;  %s8536_s20 = smov 100  }
  0x22   : >> { %806 = vst.msk [vmem:[#allocation3 + $0x3] sm:$0xff] %vm740_vm1, %v805_v2  ;;  %v8783_v22 = vld [vmem:[%s8722_s3 + $0x40] sm:$0xff]   ;;  %v8797_v26 = vld [vmem:[%s8722_s3 + $0x68] sm:$0xff]   ;;  %s8538_s1 = smov 96  }
  0x23   : >> { %7928 = vmatpush3.bf16.msra.mxu0 %v8732_v6  ;;  %7936 = vmatpush3.bf16.msra.mxu1 %v8737_v7  ;;  %v8805_v29 = vld [vmem:[%s8722_s3 + $0x60] sm:$0xff]  }
  0x24   : >> { %7941 = vmatprep.subr.bf16.mxu0 %v8529_v3  ;;  %7949 = vmatprep.subr.bf16.mxu1 %v8529_v3 }
  0x29   : >> { %v807_v8 = vld [vmem:[#allocation3] sm:$0xff] }
  0x2a   : >> { %v865_v9 = vld [vmem:[#allocation3 + $0x1] sm:$0xff]  ;;  %v808_v10 = vpack.c.bf16 %v807_v8, %v807_v8 }
  0x2b   : >> { %v866_v11 = vpack.c.bf16 %v865_v9, %v865_v9  ;;  %v923_v16 = vld [vmem:[#allocation3 + $0x2] sm:$0xff] }
  0x2c   : >> { %7930 = vmatmul.mubr.msk.bf16.vlgmr.msra.gmra.mxu0 %vm740_vm1, %v808_v10  ;;  %v981_v17 = vld [vmem:[#allocation3 + $0x3] sm:$0xff]  ;;  %v924_v18 = vpack.c.bf16 %v923_v16, %v923_v16 }
  0x2d   : >> { %7938 = vmatmul.mubr.msk.bf16.vlgmr.msra.gmra.mxu1 %vm740_vm1, %v866_v11  ;;  %7942 = vmatpush3.bf16.msra.mxu0 %v8742_v12  ;;  %v982_v19 = vpack.c.bf16 %v981_v17, %v981_v17  ;;  %v1039_v23 = vld [vmem:[#allocation3 + $0x4] sm:$0xff] }
  0x2e   : >> { %7950 = vmatpush3.bf16.msra.mxu1 %v8747_v13  ;;  %7943 = vmatprep.subr.bf16.mxu0 %v8529_v3  ;;  %v1097_v25 = vld [vmem:[#allocation3 + $0x5] sm:$0xff]  ;;  %v1040_v27 = vpack.c.bf16 %v1039_v23, %v1039_v23 }
  0x2f   : >> { %7951 = vmatprep.subr.bf16.mxu1 %v8529_v3  ;;  %7945 = vmatprep.mubr.msk.bf16.mxu0 %vm8530_vm2, %v8529_v3  ;;  %v1098_v28 = vpack.c.bf16 %v1097_v25, %v1097_v25  ;;  %v1155_v30 = vld [vmem:[#allocation3 + $0x6] sm:$0xff] }
  0x30   : >> { %7953 = vmatprep.mubr.msk.bf16.mxu1 %vm8530_vm2, %v8529_v3  ;;  %v1156_v31 = vpack.c.bf16 %v1155_v30, %v1155_v30 }
  0x31   : >> { %7944 = vmatpush3.bf16.msra.mxu0 %v8751_v14 }
  0x32   : >> { %7952 = vmatpush3.bf16.msra.mxu1 %v8755_v15  ;;  %7957 = vmatprep.subr.bf16.mxu0 %v8529_v3 }
  0x33   : >> { %7965 = vmatprep.subr.bf16.mxu1 %v8529_v3 }
  0x34   : >> { %7946 = vmatmul.mubr.msk.bf16.vlgmr.msra.gmra.mxu0 %vm740_vm1, %v924_v18 }
  0x35   : >> { %7954 = vmatmul.mubr.msk.bf16.vlgmr.msra.gmra.mxu1 %vm740_vm1, %v982_v19  ;;  %7958 = vmatpush3.bf16.msra.mxu0 %v8769_v20 }
  0x36   : >> { %7966 = vmatpush3.bf16.msra.mxu1 %v8779_v21  ;;  %7959 = vmatprep.subr.bf16.mxu0 %v8529_v3 }
  0x37   : >> { %7967 = vmatprep.subr.bf16.mxu1 %v8529_v3  ;;  %7961 = vmatprep.mubr.msk.bf16.mxu0 %vm8530_vm2, %v8529_v3 }
  0x38   : >> { %7969 = vmatprep.mubr.msk.bf16.mxu1 %vm8530_vm2, %v8529_v3 }
  0x39   : >> { %7960 = vmatpush3.bf16.msra.mxu0 %v8783_v22 }
  0x3a   : >> { %7968 = vmatpush3.bf16.msra.mxu1 %v8787_v24  ;;  %7973 = vmatprep.subr.bf16.mxu0 %v8529_v3 }
  0x3b   : >> { %7981 = vmatprep.subr.bf16.mxu1 %v8529_v3 }
  0x3c   : >> { %7962 = vmatmul.mubr.msk.bf16.vlgmr.msra.gmra.mxu0 %vm740_vm1, %v1040_v27 }
  0x3d   : >> { %7970 = vmatmul.mubr.msk.bf16.vlgmr.msra.gmra.mxu1 %vm740_vm1, %v1098_v28  ;;  %7974 = vmatpush3.bf16.msra.mxu0 %v8797_v26 }
  0x3e   : >> { %7975 = vmatprep.subr.bf16.mxu0 %v8529_v3  ;;  %7977 = vmatprep.mubr.msk.bf16.mxu0 %vm8530_vm2, %v8529_v3 }
  0x3f   : >> { %7982 = vmatpush3.bf16.msra.mxu1 %v8725_v4  ;;  %7985 = vmatprep.mubr.msk.bf16.mxu1 %vm8530_vm2, %v8529_v3 }
  0x40   : >> { %7983 = vmatprep.subr.bf16.mxu1 %v8529_v3 }
  0x41   : >> { %7976 = vmatpush3.bf16.msra.mxu0 %v8805_v29 }
  0x42   : >> { %7989 = vmatprep.subr.bf16.mxu0 %v8529_v3 }
  0x43   : >> { %7984 = vmatpush3.bf16.msra.mxu1 %v8732_v6 }
  0x44   : >> { %7978 = vmatmul.mubr.msk.bf16.vlgmr.msra.gmra.mxu0 %vm740_vm1, %v1156_v31  ;;  %7997 = vmatprep.subr.bf16.mxu1 %v8529_v3 }
  0x45   : >> { %7990 = vmatpush3.bf16.msra.mxu0 %v8728_v5  ;;  %7993 = vmatprep.mubr.msk.bf16.mxu0 %vm8530_vm2, %v8529_v3 }
  0x46   : >> { %7991 = vmatprep.subr.bf16.mxu0 %v8529_v3 }
  0x49   : >> { %7992 = vmatpush3.bf16.msra.mxu0 %v8737_v7 }
  0x4a   : >> { %8005 = vmatprep.subr.bf16.mxu0 %v8529_v3 }
  0xec   : >> { %v858_v32 = vpop.f32.mrf.mxu0 }
  0xed   : >> { %v916_v33 = vpop.f32.mrf.mxu1  ;;  %v864_v40 = vadd.f32 %v8833_v36, %v858_v32 }
  0xee   : >> { %v7931_v34 = vpop.f32.mrf.mxu0 }
  0xef   : >> { %v7939_v35 = vpop.f32.mrf.mxu1  ;;  %v922_v45 = vadd.f32 %v916_v33, %v864_v40 }
  0xf0   : >> { %v861_v37 = vpop.f32.mrf.mxu0  ;;  %v7351_v35 = vld [vmem:[%s8842_s23] ss:$0 sm:$0xff] }
  0xf1   : >> { %v919_v38 = vpop.f32.mrf.mxu1 }
  0xf2   : >> { %v7932_v39 = vpop.f32.mrf.mxu0  ;;  %v7352_v38 = vld [vmem:[%s8847_s2] ss:$0 sm:$0xff] }
  0xf3   : >> { %v7940_v41 = vpop.f32.mrf.mxu1 }
  0xf4   : >> { %v974_v42 = vpop.f32.mrf.mxu0 }
  0xf5   : >> { %v1032_v43 = vpop.f32.mrf.mxu1  ;;  %v980_v48 = vadd.f32 %v974_v42, %v922_v45 }
  0xf6   : >> { %v7947_v44 = vpop.f32.mrf.mxu0 }
  0xf7   : >> { %v7955_v46 = vpop.f32.mrf.mxu1  ;;  %v1038_v53 = vadd.f32 %v1032_v43, %v980_v48 }
  0xf8   : >> { %v977_v47 = vpop.f32.mrf.mxu0 }
  0xf9   : >> { %v1035_v49 = vpop.f32.mrf.mxu1 }
  0xfa   : >> { %v7948_v50 = vpop.f32.mrf.mxu0 }
  0xfb   : >> { %v7956_v51 = vpop.f32.mrf.mxu1 }
  0xfc   : >> { %v1090_v52 = vpop.f32.mrf.mxu0 }
  0xfd   : >> { %v1148_v54 = vpop.f32.mrf.mxu1  ;;  %v1096_v56 = vadd.f32 %v1090_v52, %v1038_v53 }
  0xfe   : >> { %v7963_v55 = vpop.f32.mrf.mxu0 }
  0xff   : >> { %v7971_v57 = vpop.f32.mrf.mxu1  ;;  %v1154_v61 = vadd.f32 %v1148_v54, %v1096_v56 }
 0x100   : >> { %v1093_v58 = vpop.f32.mrf.mxu0 }
 0x101   : >> { %v1151_v59 = vpop.f32.mrf.mxu1 }
 0x102   : >> { %v7964_v60 = vpop.f32.mrf.mxu0 }
 0x103   : >> { %v7972_v62 = vpop.f32.mrf.mxu1 }
 0x104   : >> { %v1206_v63 = vpop.f32.mrf.mxu0 }
 0x105   : >> { %v1212_v0 = vadd.f32 %v1206_v63, %v1154_v61 }
 0x106   : >> { %v7979_v1 = vpop.f32.mrf.mxu0 }
 0x107   : >> { %v1213_v2 = vmax.f32 %v1212_v0, 0.0 }
 0x108   : >> { %v1209_v8 = vpop.f32.mrf.mxu0 }
 0x109   : >> { %v1214_v9 = vsel %vm740_vm1, %v1213_v2, 0.0 }
 0x10a   : >> { %1215 = vadd.xlane.f32.xlu0 %v1214_v9  ;;  %v7980_v10 = vpop.f32.mrf.mxu0 }
 0x193   : >> { %v1216_v11 = vpop.xlane.xlu0 %1215 }
 0x194   : >> { %v1218_v16 = vmul.f32 0.03125, %v1216_v11 }
 0x196   : >> { %v1219_v17 = vsub.f32 %v1213_v2, %v1218_v16 }
 0x198   : >> { %v1220_v18 = vmul.f32 %v1219_v17, %v1219_v17 }
 0x19a   : >> { %v1221_v19 = vsel %vm740_vm1, %v1220_v18, 0.0 }
 0x19b   : >> { %1222 = vadd.xlane.f32.xlu0 %v1221_v19 }
 0x224   : >> { %v1223_v23 = vpop.xlane.xlu0 %1222 }
 0x225   : >> { %v1224_v25 = vmul.f32 0.032258064, %v1223_v23 }
 0x227   : >> { %8429 = vrsqrt.f32 %v1224_v25  ;;  %vm1227_vm3 = vcmp.eq.f32.partialorder %v1224_v25, inf  ;;  %v1230_v30 = vand.u32 2147483648, %v1224_v25  ;;  %vm1229_vm4 = vcmp.eq.f32.partialorder %v1224_v25, 0.0 }
 0x234   : >> { %v8430_v27 = vpop.eup %8429 }
 0x235   : >> { %v1226_v28 = vmul.f32 %v8430_v27, %v1224_v25 }
 0x237   : >> { %v1228_v31 = vsel %vm1227_vm3, %v1224_v25, %v1226_v28  ;;  %vm3369_vm3 = vcmask 64512  }
 0x238   : >> { %v1231_v32 = vsel %vm1229_vm4, %v1230_v30, %v1228_v31  ;;  %vm4906_vm4 = vcmask 130048  }
 0x239   : >> { %v1232_v33 = vadd.f32 1e-06, %v1231_v32 }
 0x23b   : >> { %8431 = vrcp.f32 %v1232_v33 }
 0x248   : >> { %v8432_v34 = vpop.eup %8431 }
 0x249   : >> { %v1234_v37 = vmul.f32 %v8432_v34, %v1219_v17 }
 0x24b   : >> { %v1241_v39 = vmul.f32 %v7351_v35, %v1234_v37 }
 0x24d   : >> { %v1248_v40 = vadd.f32 %v7352_v38, %v1241_v39 }
 0x24f   : >> { %v1249_v41 = vadd.f32 %v1248_v40, %v1213_v2 }
 0x251   : >> { %1250 = vst.msk [vmem:[#allocation2] sm:$0xff] %vm740_vm1, %v1249_v41 }
 0x258   : >> { %v1251_v42 = vld [vmem:[#allocation2] sm:$0xff] }
 0x259   : >> { %1252 = vst.msk [vmem:[#allocation3 + $0x3] sm:$0xff] %vm740_vm1, %v1251_v42 }
 0x260   : >> { %v1253_v43 = vld [vmem:[#allocation3] sm:$0xff] }
 0x261   : >> { %v1299_v44 = vld [vmem:[#allocation3 + $0x1] sm:$0xff]  ;;  %v1254_v45 = vpack.c.bf16 %v1253_v43, %v1253_v43 }
 0x262   : >> { %v1300_v46 = vpack.c.bf16 %v1299_v44, %v1299_v44  ;;  %v1345_v47 = vld [vmem:[#allocation3 + $0x2] sm:$0xff] }
 0x263   : >> { %7986 = vmatmul.mubr.msk.bf16.vlgmr.msra.gmra.mxu1 %vm740_vm1, %v1254_v45  ;;  %v1391_v48 = vld [vmem:[#allocation3 + $0x3] sm:$0xff]  ;;  %v1346_v49 = vpack.c.bf16 %v1345_v47, %v1345_v47 }
 0x264   : >> { %7994 = vmatmul.mubr.msk.bf16.vlgmr.msra.gmra.mxu0 %vm740_vm1, %v1300_v46  ;;  %7998 = vmatpush3.bf16.msra.mxu1 %v8742_v12  ;;  %v1392_v12 = vpack.c.bf16 %v1391_v48, %v1391_v48  ;;  %v7360_v48 = vld [vmem:[%s8842_s23 + $0x1] ss:$0 sm:$0xff] }
 0x265   : >> { %8006 = vmatpush3.bf16.msra.mxu0 %v8747_v13  ;;  %7999 = vmatprep.subr.bf16.mxu1 %v8529_v3  ;;  %v1437_v13 = vld [vmem:[#allocation3 + $0x4] sm:$0xff] }
 0x266   : >> { %8007 = vmatprep.subr.bf16.mxu0 %v8529_v3  ;;  %8001 = vmatprep.mubr.msk.bf16.mxu1 %vm8530_vm2, %v8529_v3 }
 0x267   : >> { %8009 = vmatprep.mubr.msk.bf16.mxu0 %vm8530_vm2, %v8529_v3 }
 0x268   : >> { %8000 = vmatpush3.bf16.msra.mxu1 %v8751_v14  ;;  %v1483_v14 = vld [vmem:[#allocation3 + $0x5] sm:$0xff] }
 0x269   : >> { %8008 = vmatpush3.bf16.msra.mxu0 %v8755_v15  ;;  %8013 = vmatprep.subr.bf16.mxu1 %v8529_v3  ;;  %v1438_v15 = vpack.c.bf16 %v1437_v13, %v1437_v13 }
 0x26a   : >> { %8021 = vmatprep.subr.bf16.mxu0 %v8529_v3 }
 0x26b   : >> { %8002 = vmatmul.mubr.msk.bf16.vlgmr.msra.gmra.mxu1 %vm740_vm1, %v1346_v49 }
 0x26c   : >> { %8010 = vmatmul.mubr.msk.bf16.vlgmr.msra.gmra.mxu0 %vm740_vm1, %v1392_v12  ;;  %8014 = vmatpush3.bf16.msra.mxu1 %v8769_v20  ;;  %v1484_v20 = vpack.c.bf16 %v1483_v14, %v1483_v14  ;;  %v7361_v12 = vld [vmem:[%s8847_s2 + $0x1] ss:$0 sm:$0xff] }
 0x26d   : >> { %8022 = vmatpush3.bf16.msra.mxu0 %v8779_v21  ;;  %8015 = vmatprep.subr.bf16.mxu1 %v8529_v3  ;;  %v1529_v21 = vld [vmem:[#allocation3 + $0x6] sm:$0xff] }
 0x26e   : >> { %8023 = vmatprep.subr.bf16.mxu0 %v8529_v3  ;;  %8017 = vmatprep.mubr.msk.bf16.mxu1 %vm8530_vm2, %v8529_v3 }
 0x26f   : >> { %8025 = vmatprep.mubr.msk.bf16.mxu0 %vm8530_vm2, %v8529_v3 }
 0x270   : >> { %8016 = vmatpush3.bf16.msra.mxu1 %v8783_v22  ;;  %v1530_v22 = vpack.c.bf16 %v1529_v21, %v1529_v21 }
 0x271   : >> { %8024 = vmatpush3.bf16.msra.mxu0 %v8787_v24  ;;  %8029 = vmatprep.subr.bf16.mxu1 %v8529_v3 }
 0x272   : >> { %8037 = vmatprep.subr.bf16.mxu0 %v8529_v3 }
 0x273   : >> { %8018 = vmatmul.mubr.msk.bf16.vlgmr.msra.gmra.mxu1 %vm740_vm1, %v1438_v15 }
 0x274   : >> { %8026 = vmatmul.mubr.msk.bf16.vlgmr.msra.gmra.mxu0 %vm740_vm1, %v1484_v20  ;;  %8030 = vmatpush3.bf16.msra.mxu1 %v8797_v26 }
 0x275   : >> { %8033 = vmatprep.mubr.msk.bf16.mxu1 %vm8530_vm2, %v8529_v3  ;;  %8031 = vmatprep.subr.bf16.mxu1 %v8529_v3 }
 0x276   : >> { %8038 = vmatpush3.bf16.msra.mxu0 %v8725_v4  ;;  %8041 = vmatprep.mubr.msk.bf16.mxu0 %vm8530_vm2, %v8529_v3 }
 0x277   : >> { %8039 = vmatprep.subr.bf16.mxu0 %v8529_v3 }
 0x278   : >> { %8032 = vmatpush3.bf16.msra.mxu1 %v8805_v29 }
 0x279   : >> { %8045 = vmatprep.subr.bf16.mxu1 %v8529_v3 }
 0x27a   : >> { %8040 = vmatpush3.bf16.msra.mxu0 %v8732_v6 }
 0x27b   : >> { %8053 = vmatprep.subr.bf16.mxu0 %v8529_v3  ;;  %8034 = vmatmul.mubr.msk.bf16.vlgmr.msra.gmra.mxu1 %vm740_vm1, %v1530_v22 }
 0x27c   : >> { %8046 = vmatpush3.bf16.msra.mxu1 %v8728_v5  ;;  %8049 = vmatprep.mubr.msk.bf16.mxu1 %vm8530_vm2, %v8529_v3 }
 0x27d   : >> { %8047 = vmatprep.subr.bf16.mxu1 %v8529_v3 }
 0x280   : >> { %8048 = vmatpush3.bf16.msra.mxu1 %v8737_v7 }
 0x281   : >> { %8061 = vmatprep.subr.bf16.mxu1 %v8529_v3 }
 0x323   : >> { %v1292_v4 = vpop.f32.mrf.mxu1 }
 0x324   : >> { %v1338_v24 = vpop.f32.mrf.mxu0  ;;  %v1298_v55 = vadd.f32 %v8833_v36, %v1292_v4 }
 0x325   : >> { %v7987_v50 = vpop.f32.mrf.mxu1 }
 0x326   : >> { %v7995_v51 = vpop.f32.mrf.mxu0  ;;  %v1344_v59 = vadd.f32 %v1338_v24, %v1298_v55  ;;  %v8912_v50 = vld [vmem:[%s8722_s3 + $0x28] sm:$0xff]  }
 0x327   : >> { %v1295_v6 = vpop.f32.mrf.mxu1  ;;  %v8916_v51 = vld [vmem:[%s8722_s3 + $0x38] sm:$0xff]  }
 0x328   : >> { %v1341_v52 = vpop.f32.mrf.mxu0 }
 0x329   : >> { %v7988_v53 = vpop.f32.mrf.mxu1 }
 0x32a   : >> { %v7996_v54 = vpop.f32.mrf.mxu0  ;;  %v8926_v53 = vld [vmem:[%s8722_s3 + $0x20] sm:$0xff]  }
 0x32b   : >> { %v1384_v5 = vpop.f32.mrf.mxu1  ;;  %v8930_v54 = vld [vmem:[%s8722_s3 + $0x30] sm:$0xff]  }
 0x32c   : >> { %v1430_v56 = vpop.f32.mrf.mxu0  ;;  %v1390_v7 = vadd.f32 %v1384_v5, %v1344_v59 }
 0x32d   : >> { %v8003_v57 = vpop.f32.mrf.mxu1 }
 0x32e   : >> { %v8011_v58 = vpop.f32.mrf.mxu0  ;;  %v1436_v2 = vadd.f32 %v1430_v56, %v1390_v7  ;;  %v8938_v56 = vld [vmem:[%s8722_s3 + $0x48] sm:$0xff]   ;;  %v8942_v57 = vld [vmem:[%s8722_s3 + $0x58] sm:$0xff]  }
 0x32f   : >> { %v1387_v60 = vpop.f32.mrf.mxu1 }
 0x330   : >> { %v1433_v61 = vpop.f32.mrf.mxu0  ;;  %v8952_v60 = vld [vmem:[%s8722_s3 + $0x40] sm:$0xff]  }
 0x331   : >> { %v8004_v62 = vpop.f32.mrf.mxu1  ;;  %v8956_v61 = vld [vmem:[%s8722_s3 + $0x50] sm:$0xff]  }
 0x332   : >> { %v8012_v63 = vpop.f32.mrf.mxu0 }
 0x333   : >> { %v1476_v0 = vpop.f32.mrf.mxu1  ;;  %v8493_v63 = vld [vmem:[%s8722_s3 + $0x8] sm:$0xff]  }
 0x334   : >> { %v1522_v1 = vpop.f32.mrf.mxu0  ;;  %v1482_v10 = vadd.f32 %v1476_v0, %v1436_v2  ;;  %v8495_v2 = vld [vmem:[%s8722_s3 + $0x18] sm:$0xff]  }
 0x335   : >> { %v8019_v8 = vpop.f32.mrf.mxu1 }
 0x336   : >> { %v8027_v9 = vpop.f32.mrf.mxu0  ;;  %v1528_v19 = vadd.f32 %v1522_v1, %v1482_v10  ;;  %v8496_v8 = vld [vmem:[%s8722_s3 + $0x10] sm:$0xff]  }
 0x337   : >> { %v1479_v11 = vpop.f32.mrf.mxu1 }
 0x338   : >> { %v1525_v16 = vpop.f32.mrf.mxu0 }
 0x339   : >> { %v8020_v17 = vpop.f32.mrf.mxu1 }
 0x33a   : >> { %v8028_v18 = vpop.f32.mrf.mxu0 }
 0x33b   : >> { %v1568_v23 = vpop.f32.mrf.mxu1 }
 0x33c   : >> { %v1574_v25 = vadd.f32 %v1568_v23, %v1528_v19 }
 0x33d   : >> { %v8035_v27 = vpop.f32.mrf.mxu1 }
 0x33e   : >> { %v1575_v28 = vmax.f32 %v1574_v25, 0.0 }
 0x33f   : >> { %v1571_v30 = vpop.f32.mrf.mxu1 }
 0x340   : >> { %v1576_v31 = vsel %vm740_vm1, %v1575_v28, 0.0 }
 0x341   : >> { %v8036_v32 = vpop.f32.mrf.mxu1  ;;  %1577 = vadd.xlane.f32.xlu1 %v1576_v31 }
 0x3ca   : >> { %v1578_v33 = vpop.xlane.xlu1 %1577 }
 0x3cb   : >> { %v1579_v34 = vmul.f32 0.03125, %v1578_v33 }
 0x3cd   : >> { %v1580_v35 = vsub.f32 %v1575_v28, %v1579_v34 }
 0x3cf   : >> { %v1581_v37 = vmul.f32 %v1580_v35, %v1580_v35 }
 0x3d1   : >> { %v1582_v38 = vsel %vm740_vm1, %v1581_v37, 0.0 }
 0x3d2   : >> { %1583 = vadd.xlane.f32.xlu1 %v1582_v38 }
 0x45b   : >> { %v1584_v39 = vpop.xlane.xlu1 %1583 }
 0x45c   : >> { %v1585_v40 = vmul.f32 0.032258064, %v1584_v39 }
 0x45e   : >> { %8433 = vrsqrt.f32 %v1585_v40  ;;  %vm1588_vm5 = vcmp.eq.f32.partialorder %v1585_v40, inf  ;;  %v1591_v43 = vand.u32 2147483648, %v1585_v40  ;;  %vm1590_vm6 = vcmp.eq.f32.partialorder %v1585_v40, 0.0 }
 0x46b   : >> { %v8434_v41 = vpop.eup %8433 }
 0x46c   : >> { %v1587_v42 = vmul.f32 %v8434_v41, %v1585_v40 }
 0x46e   : >> { %v1589_v44 = vsel %vm1588_vm5, %v1585_v40, %v1587_v42  ;;  %vm4908_vm5 = vcmask 162816  }
 0x46f   : >> { %v1592_v45 = vsel %vm1590_vm6, %v1591_v43, %v1589_v44  ;;  %vm4910_vm6 = vcmask 195584  }
 0x470   : >> { %v1593_v46 = vadd.f32 1e-06, %v1592_v45 }
 0x472   : >> { %8435 = vrcp.f32 %v1593_v46 }
 0x47f   : >> { %v8436_v47 = vpop.eup %8435 }
 0x480   : >> { %v1595_v49 = vmul.f32 %v8436_v47, %v1580_v35 }
 0x482   : >> { %v1602_v13 = vmul.f32 %v7360_v48, %v1595_v49 }
 0x484   : >> { %v1609_v14 = vadd.f32 %v7361_v12, %v1602_v13 }
 0x486   : >> { %v1610_v15 = vadd.f32 %v1609_v14, %v1575_v28 }
 0x488   : >> { %1611 = vst.msk [vmem:[#allocation2] sm:$0xff] %vm740_vm1, %v1610_v15 }
 0x48f   : >> { %v1612_v20 = vld [vmem:[#allocation2] sm:$0xff] }
 0x490   : >> { %1613 = vst.msk [vmem:[#allocation3 + $0x3] sm:$0xff] %vm740_vm1, %v1612_v20 }
 0x497   : >> { %v1614_v21 = vld [vmem:[#allocation3] sm:$0xff] }
 0x498   : >> { %v1660_v22 = vld [vmem:[#allocation3 + $0x1] sm:$0xff]  ;;  %v1615_v4 = vpack.c.bf16 %v1614_v21, %v1614_v21 }
 0x499   : >> { %v1661_v24 = vpack.c.bf16 %v1660_v22, %v1660_v22  ;;  %v1706_v6 = vld [vmem:[#allocation3 + $0x2] sm:$0xff] }
 0x49a   : >> { %8042 = vmatmul.mubr.msk.bf16.vlgmr.msra.gmra.mxu0 %vm740_vm1, %v1615_v4  ;;  %v1752_v52 = vld [vmem:[#allocation3 + $0x3] sm:$0xff]  ;;  %v1707_v55 = vpack.c.bf16 %v1706_v6, %v1706_v6 }
 0x49b   : >> { %8050 = vmatmul.mubr.msk.bf16.vlgmr.msra.gmra.mxu1 %vm740_vm1, %v1661_v24  ;;  %8054 = vmatpush3.bf16.msra.mxu0 %v8912_v50  ;;  %v1753_v5 = vpack.c.bf16 %v1752_v52, %v1752_v52  ;;  %v1798_v58 = vld [vmem:[#allocation3 + $0x4] sm:$0xff] }
 0x49c   : >> { %8062 = vmatpush3.bf16.msra.mxu1 %v8916_v51  ;;  %8055 = vmatprep.subr.bf16.mxu0 %v8529_v3  ;;  %v1844_v59 = vld [vmem:[#allocation3 + $0x5] sm:$0xff]  ;;  %v1799_v7 = vpack.c.bf16 %v1798_v58, %v1798_v58 }
 0x49d   : >> { %8063 = vmatprep.subr.bf16.mxu1 %v8529_v3  ;;  %8057 = vmatprep.mubr.msk.bf16.mxu0 %vm8530_vm2, %v8529_v3  ;;  %v1845_v62 = vpack.c.bf16 %v1844_v59, %v1844_v59  ;;  %v1890_v0 = vld [vmem:[#allocation3 + $0x6] sm:$0xff] }
 0x49e   : >> { %8065 = vmatprep.mubr.msk.bf16.mxu1 %vm8530_vm2, %v8529_v3  ;;  %v1891_v1 = vpack.c.bf16 %v1890_v0, %v1890_v0 }
 0x49f   : >> { %8056 = vmatpush3.bf16.msra.mxu0 %v8926_v53 }
 0x4a0   : >> { %8064 = vmatpush3.bf16.msra.mxu1 %v8930_v54  ;;  %8069 = vmatprep.subr.bf16.mxu0 %v8529_v3 }
 0x4a1   : >> { %8077 = vmatprep.subr.bf16.mxu1 %v8529_v3 }
 0x4a2   : >> { %8058 = vmatmul.mubr.msk.bf16.vlgmr.msra.gmra.mxu0 %vm740_vm1, %v1707_v55 }
 0x4a3   : >> { %8066 = vmatmul.mubr.msk.bf16.vlgmr.msra.gmra.mxu1 %vm740_vm1, %v1753_v5  ;;  %8070 = vmatpush3.bf16.msra.mxu0 %v8938_v56 }
 0x4a4   : >> { %8078 = vmatpush3.bf16.msra.mxu1 %v8942_v57  ;;  %8071 = vmatprep.subr.bf16.mxu0 %v8529_v3 }
 0x4a5   : >> { %8079 = vmatprep.subr.bf16.mxu1 %v8529_v3  ;;  %8073 = vmatprep.mubr.msk.bf16.mxu0 %vm8530_vm2, %v8529_v3 }
 0x4a6   : >> { %8081 = vmatprep.mubr.msk.bf16.mxu1 %vm8530_vm2, %v8529_v3 }
 0x4a7   : >> { %8072 = vmatpush3.bf16.msra.mxu0 %v8952_v60 }
 0x4a8   : >> { %8080 = vmatpush3.bf16.msra.mxu1 %v8956_v61  ;;  %8085 = vmatprep.subr.bf16.mxu0 %v8529_v3 }
 0x4a9   : >> { %8093 = vmatprep.subr.bf16.mxu1 %v8529_v3 }
 0x4aa   : >> { %8074 = vmatmul.mubr.msk.bf16.vlgmr.msra.gmra.mxu0 %vm740_vm1, %v1799_v7 }
 0x4ab   : >> { %8082 = vmatmul.mubr.msk.bf16.vlgmr.msra.gmra.mxu1 %vm740_vm1, %v1845_v62  ;;  %8086 = vmatpush3.bf16.msra.mxu0 %v8797_v26  ;;  %v8494_v26 = vld [vmem:[%s8722_s3] sm:$0xff]  }
 0x4ac   : >> { %8089 = vmatprep.mubr.msk.bf16.mxu0 %vm8530_vm2, %v8529_v3  ;;  %8087 = vmatprep.subr.bf16.mxu0 %v8529_v3 }
 0x4ad   : >> { %8094 = vmatpush3.bf16.msra.mxu1 %v8493_v63  ;;  %8097 = vmatprep.mubr.msk.bf16.mxu1 %vm8530_vm2, %v8529_v3 }
 0x4ae   : >> { %8095 = vmatprep.subr.bf16.mxu1 %v8529_v3 }
 0x4af   : >> { %8088 = vmatpush3.bf16.msra.mxu0 %v8805_v29 }
 0x4b0   : >> { %8101 = vmatprep.subr.bf16.mxu0 %v8529_v3 }
 0x4b1   : >> { %8096 = vmatpush3.bf16.msra.mxu1 %v8494_v26  ;;  %v7369_v26 = vld [vmem:[%s8842_s23 + $0x2] ss:$0 sm:$0xff] }
 0x4b2   : >> { %8109 = vmatprep.subr.bf16.mxu1 %v8529_v3  ;;  %8090 = vmatmul.mubr.msk.bf16.vlgmr.msra.gmra.mxu0 %vm740_vm1, %v1891_v1 }
 0x4b3   : >> { %8102 = vmatpush3.bf16.msra.mxu0 %v8495_v2  ;;  %8105 = vmatprep.mubr.msk.bf16.mxu0 %vm8530_vm2, %v8529_v3 }
 0x4b4   : >> { %8103 = vmatprep.subr.bf16.mxu0 %v8529_v3 }
 0x4b7   : >> { %8104 = vmatpush3.bf16.msra.mxu0 %v8496_v8  ;;  %v7370_v8 = vld [vmem:[%s8847_s2 + $0x2] ss:$0 sm:$0xff] }
 0x4b8   : >> { %8117 = vmatprep.subr.bf16.mxu0 %v8529_v3 }
 0x55a   : >> { %v1653_v29 = vpop.f32.mrf.mxu0 }
 0x55b   : >> { %v1699_v9 = vpop.f32.mrf.mxu1  ;;  %v1659_v23 = vadd.f32 %v8833_v36, %v1653_v29 }
 0x55c   : >> { %v8043_v10 = vpop.f32.mrf.mxu0 }
 0x55d   : >> { %v8051_v11 = vpop.f32.mrf.mxu1  ;;  %v1705_v31 = vadd.f32 %v1699_v9, %v1659_v23 }
 0x55e   : >> { %v1656_v16 = vpop.f32.mrf.mxu0 }
 0x55f   : >> { %v1702_v17 = vpop.f32.mrf.mxu1 }
 0x560   : >> { %v8044_v18 = vpop.f32.mrf.mxu0 }
 0x561   : >> { %v8052_v19 = vpop.f32.mrf.mxu1 }
 0x562   : >> { %v1745_v25 = vpop.f32.mrf.mxu0 }
 0x563   : >> { %v1791_v27 = vpop.f32.mrf.mxu1  ;;  %v1751_v34 = vadd.f32 %v1745_v25, %v1705_v31 }
 0x564   : >> { %v8059_v28 = vpop.f32.mrf.mxu0 }
 0x565   : >> { %v8067_v30 = vpop.f32.mrf.mxu1  ;;  %v1797_v40 = vadd.f32 %v1791_v27, %v1751_v34 }
 0x566   : >> { %v1748_v32 = vpop.f32.mrf.mxu0 }
 0x567   : >> { %v1794_v33 = vpop.f32.mrf.mxu1 }
 0x568   : >> { %v8060_v35 = vpop.f32.mrf.mxu0 }
 0x569   : >> { %v8068_v37 = vpop.f32.mrf.mxu1 }
 0x56a   : >> { %v1837_v38 = vpop.f32.mrf.mxu0 }
 0x56b   : >> { %v1883_v39 = vpop.f32.mrf.mxu1  ;;  %v1843_v43 = vadd.f32 %v1837_v38, %v1797_v40 }
 0x56c   : >> { %v8075_v41 = vpop.f32.mrf.mxu0 }
 0x56d   : >> { %v8083_v42 = vpop.f32.mrf.mxu1  ;;  %v1889_v48 = vadd.f32 %v1883_v39, %v1843_v43 }
 0x56e   : >> { %v1840_v44 = vpop.f32.mrf.mxu0 }
 0x56f   : >> { %v1886_v45 = vpop.f32.mrf.mxu1 }
 0x570   : >> { %v8076_v46 = vpop.f32.mrf.mxu0 }
 0x571   : >> { %v8084_v47 = vpop.f32.mrf.mxu1 }
 0x572   : >> { %v1929_v49 = vpop.f32.mrf.mxu0 }
 0x573   : >> { %v1935_v12 = vadd.f32 %v1929_v49, %v1889_v48 }
 0x574   : >> { %v8091_v13 = vpop.f32.mrf.mxu0 }
 0x575   : >> { %v1936_v14 = vmax.f32 %v1935_v12, 0.0 }
 0x576   : >> { %v1932_v15 = vpop.f32.mrf.mxu0 }
 0x577   : >> { %v1937_v20 = vsel %vm740_vm1, %v1936_v14, 0.0 }
 0x578   : >> { %1938 = vadd.xlane.f32.xlu0 %v1937_v20  ;;  %v8092_v21 = vpop.f32.mrf.mxu0 }
 0x601   : >> { %v1939_v22 = vpop.xlane.xlu0 %1938 }
 0x602   : >> { %v1940_v4 = vmul.f32 0.03125, %v1939_v22 }
 0x604   : >> { %v1941_v24 = vsub.f32 %v1936_v14, %v1940_v4 }
 0x606   : >> { %v1942_v6 = vmul.f32 %v1941_v24, %v1941_v24 }
 0x608   : >> { %v1943_v52 = vsel %vm740_vm1, %v1942_v6, 0.0 }
 0x609   : >> { %1944 = vadd.xlane.f32.xlu1 %v1943_v52 }
 0x692   : >> { %v1945_v55 = vpop.xlane.xlu1 %1944 }
 0x693   : >> { %v1946_v5 = vmul.f32 0.032258064, %v1945_v55 }
 0x695   : >> { %8437 = vrsqrt.f32 %v1946_v5  ;;  %vm1949_vm7 = vcmp.eq.f32.partialorder %v1946_v5, inf  ;;  %v1952_v7 = vand.u32 2147483648, %v1946_v5  ;;  %vm1951_vm8 = vcmp.eq.f32.partialorder %v1946_v5, 0.0 }
 0x6a2   : >> { %v8438_v58 = vpop.eup %8437 }
 0x6a3   : >> { %v1948_v59 = vmul.f32 %v8438_v58, %v1946_v5 }
 0x6a5   : >> { %v1950_v62 = vsel %vm1949_vm7, %v1946_v5, %v1948_v59  ;;  %vm4912_vm7 = vcmask 228352  }
 0x6a6   : >> { %v1953_v63 = vsel %vm1951_vm8, %v1952_v7, %v1950_v62 }
 0x6a7   : >> { %v1954_v0 = vadd.f32 1e-06, %v1953_v63 }
 0x6a9   : >> { %8439 = vrcp.f32 %v1954_v0 }
 0x6b6   : >> { %v8440_v1 = vpop.eup %8439 }
 0x6b7   : >> { %v1956_v2 = vmul.f32 %v8440_v1, %v1941_v24 }
 0x6b9   : >> { %v1963_v29 = vmul.f32 %v7369_v26, %v1956_v2 }
 0x6bb   : >> { %v1970_v9 = vadd.f32 %v7370_v8, %v1963_v29 }
 0x6bd   : >> { %v1971_v10 = vadd.f32 %v1970_v9, %v1936_v14 }
 0x6bf   : >> { %1972 = vst.msk [vmem:[#allocation2] sm:$0xff] %vm740_vm1, %v1971_v10 }
 0x6c6   : >> { %v1973_v11 = vld [vmem:[#allocation2] sm:$0xff] }
 0x6c7   : >> { %1974 = vst.msk [vmem:[#allocation3 + $0x3] sm:$0xff] %vm740_vm1, %v1973_v11 }
 0x6ce   : >> { %v1975_v16 = vld [vmem:[#allocation3] sm:$0xff] }
 0x6cf   : >> { %v2021_v17 = vld [vmem:[#allocation3 + $0x1] sm:$0xff]  ;;  %v1976_v18 = vpack.c.bf16 %v1975_v16, %v1975_v16 }
 0x6d0   : >> { %v2022_v19 = vpack.c.bf16 %v2021_v17, %v2021_v17  ;;  %v2067_v23 = vld [vmem:[#allocation3 + $0x2] sm:$0xff] }
 0x6d1   : >> { %8098 = vmatmul.mubr.msk.bf16.vlgmr.msra.gmra.mxu1 %vm740_vm1, %v1976_v18  ;;  %v2113_v25 = vld [vmem:[#allocation3 + $0x3] sm:$0xff]  ;;  %v2068_v27 = vpack.c.bf16 %v2067_v23, %v2067_v23  ;;  %v7378_v23 = vld [vmem:[%s8842_s23 + $0x3] ss:$0 sm:$0xff] }
 0x6d2   : >> { %8106 = vmatmul.mubr.msk.bf16.vlgmr.msra.gmra.mxu0 %vm740_vm1, %v2022_v19  ;;  %8110 = vmatpush3.bf16.msra.mxu1 %v8912_v50  ;;  %v2114_v50 = vpack.c.bf16 %v2113_v25, %v2113_v25 }
 0x6d3   : >> { %8118 = vmatpush3.bf16.msra.mxu0 %v8916_v51  ;;  %8111 = vmatprep.subr.bf16.mxu1 %v8529_v3  ;;  %v2159_v51 = vld [vmem:[#allocation3 + $0x4] sm:$0xff] }
 0x6d4   : >> { %8119 = vmatprep.subr.bf16.mxu0 %v8529_v3  ;;  %8113 = vmatprep.mubr.msk.bf16.mxu1 %vm8530_vm2, %v8529_v3 }
 0x6d5   : >> { %8121 = vmatprep.mubr.msk.bf16.mxu0 %vm8530_vm2, %v8529_v3 }
 0x6d6   : >> { %8112 = vmatpush3.bf16.msra.mxu1 %v8926_v53  ;;  %v2205_v53 = vld [vmem:[#allocation3 + $0x5] sm:$0xff] }
 0x6d7   : >> { %8120 = vmatpush3.bf16.msra.mxu0 %v8930_v54  ;;  %8125 = vmatprep.subr.bf16.mxu1 %v8529_v3  ;;  %v2160_v54 = vpack.c.bf16 %v2159_v51, %v2159_v51 }
 0x6d8   : >> { %8133 = vmatprep.subr.bf16.mxu0 %v8529_v3 }
 0x6d9   : >> { %8114 = vmatmul.mubr.msk.bf16.vlgmr.msra.gmra.mxu1 %vm740_vm1, %v2068_v27  ;;  %v7379_v27 = vld [vmem:[%s8847_s2 + $0x3] ss:$0 sm:$0xff] }
 0x6da   : >> { %8122 = vmatmul.mubr.msk.bf16.vlgmr.msra.gmra.mxu0 %vm740_vm1, %v2114_v50  ;;  %8126 = vmatpush3.bf16.msra.mxu1 %v8938_v56  ;;  %v2206_v56 = vpack.c.bf16 %v2205_v53, %v2205_v53 }
 0x6db   : >> { %8134 = vmatpush3.bf16.msra.mxu0 %v8942_v57  ;;  %8127 = vmatprep.subr.bf16.mxu1 %v8529_v3  ;;  %v8497_v57 = vld [vmem:[%s8722_s3 + $0x68] sm:$0xff]  }
 0x6dc   : >> { %8135 = vmatprep.subr.bf16.mxu0 %v8529_v3  ;;  %8129 = vmatprep.mubr.msk.bf16.mxu1 %vm8530_vm2, %v8529_v3 }
 0x6dd   : >> { %8137 = vmatprep.mubr.msk.bf16.mxu0 %vm8530_vm2, %v8529_v3 }
 0x6de   : >> { %8128 = vmatpush3.bf16.msra.mxu1 %v8952_v60  ;;  %v2251_v60 = vld [vmem:[#allocation3 + $0x6] sm:$0xff] }
 0x6df   : >> { %8136 = vmatpush3.bf16.msra.mxu0 %v8956_v61  ;;  %8141 = vmatprep.subr.bf16.mxu1 %v8529_v3  ;;  %v8498_v61 = vld [vmem:[%s8722_s3 + $0x60] sm:$0xff]   ;;  %v2252_v28 = vpack.c.bf16 %v2251_v60, %v2251_v60  ;;  %s9039_s3 = sshll.u32 %s8526_s5, 4 }
 0x6e0   : >> { %8149 = vmatprep.subr.bf16.mxu0 %v8529_v3  ;;  %s2372_s18 = scalar_lea.vmem %s9677_s11, %s9039_s3 }
 0x6e1   : >> { %8130 = vmatmul.mubr.msk.bf16.vlgmr.msra.gmra.mxu1 %vm740_vm1, %v2160_v54 }
 0x6e2   : >> { %8138 = vmatmul.mubr.msk.bf16.vlgmr.msra.gmra.mxu0 %vm740_vm1, %v2206_v56  ;;  %8142 = vmatpush3.bf16.msra.mxu1 %v8497_v57 }
 0x6e3   : >> { %8145 = vmatprep.mubr.msk.bf16.mxu1 %vm8530_vm2, %v8529_v3  ;;  %8143 = vmatprep.subr.bf16.mxu1 %v8529_v3 }
 0x6e4   : >> { %8153 = vmatprep.mubr.msk.bf16.mxu0 %vm8530_vm2, %v8529_v3 }
 0x6e6   : >> { %8144 = vmatpush3.bf16.msra.mxu1 %v8498_v61 }
 0x6e7   : >> { %8157 = vmatprep.subr.mxu1 %v8529_v3 }
 0x6e9   : >> { %8146 = vmatmul.mubr.msk.bf16.vlgmr.msra.gmra.mxu1 %vm740_vm1, %v2252_v28 }
 0x6ea   : >> { %8159 = vmatprep.mubr.msk.f32.mxu1 %vm8530_vm2, %v8529_v3 }
 0x791   : >> { %v2014_v30 = vpop.f32.mrf.mxu1 }
 0x792   : >> { %v2060_v31 = vpop.f32.mrf.mxu0  ;;  %v2020_v39 = vadd.f32 %v8833_v36, %v2014_v30 }
 0x793   : >> { %v8099_v32 = vpop.f32.mrf.mxu1 }
 0x794   : >> { %v8107_v33 = vpop.f32.mrf.mxu0  ;;  %v2066_v44 = vadd.f32 %v2060_v31, %v2020_v39  ;;  %v8297_v31 = vld [vmem:[%s2372_s18 + $0x8] sm:$0xff]   ;;  %v8298_v32 = vld [vmem:[%s2372_s18] sm:$0xff]   ;;  %s8534_s18 = smov 108  }
 0x795   : >> { %v2017_v34 = vpop.f32.mrf.mxu1  ;;  %8150 = vmatpush3.bf16.msra.mxu0 %v8297_v31 }
 0x796   : >> { %v2063_v35 = vpop.f32.mrf.mxu0  ;;  %8151 = vmatprep.subr.bf16.mxu0 %v8529_v3 }
 0x797   : >> { %v8100_v37 = vpop.f32.mrf.mxu1 }
 0x798   : >> { %v8108_v38 = vpop.f32.mrf.mxu0 }
 0x799   : >> { %v2106_v40 = vpop.f32.mrf.mxu1  ;;  %8152 = vmatpush3.bf16.msra.mxu0 %v8298_v32 }
 0x79a   : >> { %v2152_v41 = vpop.f32.mrf.mxu0  ;;  %v2112_v47 = vadd.f32 %v2106_v40, %v2066_v44  ;;  %8177 = vmatprep.subr.mxu0 %v8529_v3 }
 0x79b   : >> { %v8115_v42 = vpop.f32.mrf.mxu1 }
 0x79c   : >> { %v8123_v43 = vpop.f32.mrf.mxu0  ;;  %v2158_v14 = vadd.f32 %v2152_v41, %v2112_v47 }
 0x79d   : >> { %v2109_v45 = vpop.f32.mrf.mxu1  ;;  %v7380_v43 = vld [vmem:[%s8842_s23 + $0x4] ss:$0 sm:$0xff] }
 0x79e   : >> { %v2155_v46 = vpop.f32.mrf.mxu0  ;;  %v7381_v45 = vld [vmem:[%s8847_s2 + $0x4] ss:$0 sm:$0xff] }
 0x79f   : >> { %v8116_v48 = vpop.f32.mrf.mxu1 }
 0x7a0   : >> { %v8124_v49 = vpop.f32.mrf.mxu0 }
 0x7a1   : >> { %v2198_v12 = vpop.f32.mrf.mxu1  ;;  %v7384_v49 = vld [vmem:[%s2377_s24] ss:$0 sm:$0xff]  ;;  %s8537_s24 = smov 104  }
 0x7a2   : >> { %v2244_v13 = vpop.f32.mrf.mxu0  ;;  %v2204_v21 = vadd.f32 %v2198_v12, %v2158_v14 }
 0x7a3   : >> { %v8131_v15 = vpop.f32.mrf.mxu1 }
 0x7a4   : >> { %v8139_v20 = vpop.f32.mrf.mxu0  ;;  %v2250_v6 = vadd.f32 %v2244_v13, %v2204_v21 }
 0x7a5   : >> { %v2201_v22 = vpop.f32.mrf.mxu1 }
 0x7a6   : >> { %v2247_v4 = vpop.f32.mrf.mxu0 }
 0x7a7   : >> { %v8132_v24 = vpop.f32.mrf.mxu1 }
 0x7a8   : >> { %v8140_v36 = vpop.f32.mrf.mxu0 }
 0x7a9   : >> { %v2290_v52 = vpop.f32.mrf.mxu1 }
 0x7aa   : >> { %v2296_v55 = vadd.f32 %v2290_v52, %v2250_v6 }
 0x7ab   : >> { %v8147_v5 = vpop.f32.mrf.mxu1 }
 0x7ac   : >> { %v2297_v58 = vmax.f32 %v2296_v55, 0.0 }
 0x7ad   : >> { %v2293_v59 = vpop.f32.mrf.mxu1 }
 0x7ae   : >> { %v2298_v7 = vsel %vm740_vm1, %v2297_v58, 0.0 }
 0x7af   : >> { %v8148_v62 = vpop.f32.mrf.mxu1  ;;  %2299 = vadd.xlane.f32.xlu0 %v2298_v7 }
 0x838   : >> { %v2300_v63 = vpop.xlane.xlu0 %2299 }
 0x839   : >> { %v2301_v0 = vmul.f32 0.03125, %v2300_v63 }
 0x83b   : >> { %v2302_v1 = vsub.f32 %v2297_v58, %v2301_v0 }
 0x83d   : >> { %v2303_v26 = vmul.f32 %v2302_v1, %v2302_v1 }
 0x83f   : >> { %v2304_v2 = vsel %vm740_vm1, %v2303_v26, 0.0 }
 0x840   : >> { %2305 = vadd.xlane.f32.xlu1 %v2304_v2 }
 0x8c9   : >> { %v2306_v8 = vpop.xlane.xlu1 %2305 }
 0x8ca   : >> { %v2307_v29 = vmul.f32 0.032258064, %v2306_v8 }
 0x8cc   : >> { %8441 = vrsqrt.f32 %v2307_v29  ;;  %vm2310_vm9 = vcmp.eq.f32.partialorder %v2307_v29, inf  ;;  %v2313_v11 = vand.u32 2147483648, %v2307_v29  ;;  %vm2312_vm10 = vcmp.eq.f32.partialorder %v2307_v29, 0.0 }
 0x8d9   : >> { %v8442_v9 = vpop.eup %8441 }
 0x8da   : >> { %v2309_v10 = vmul.f32 %v8442_v9, %v2307_v29 }
 0x8dc   : >> { %v2311_v16 = vsel %vm2310_vm9, %v2307_v29, %v2309_v10 }
 0x8dd   : >> { %v2314_v17 = vsel %vm2312_vm10, %v2313_v11, %v2311_v16 }
 0x8de   : >> { %v2315_v18 = vadd.f32 1e-06, %v2314_v17 }
 0x8e0   : >> { %8443 = vrcp.f32 %v2315_v18 }
 0x8ed   : >> { %v8444_v19 = vpop.eup %8443 }
 0x8ee   : >> { %v2317_v25 = vmul.f32 %v8444_v19, %v2302_v1 }
 0x8f0   : >> { %v2324_v50 = vmul.f32 %v7378_v23, %v2317_v25 }
 0x8f2   : >> { %v2331_v51 = vadd.f32 %v7379_v27, %v2324_v50 }
 0x8f4   : >> { %v2332_v53 = vadd.f32 %v2331_v51, %v2297_v58  ;;  %v3356_v51 = vlaneseq }
 0x8f6   : >> { %2333 = vst.msk [vmem:[#allocation2] sm:$0xff] %vm740_vm1, %v2332_v53 }
 0x8fd   : >> { %v2334_v54 = vld [vmem:[#allocation2] sm:$0xff] }
 0x8fe   : >> { %v2335_v56 = vsel %vm740_vm1, %v2334_v54, 0.0 }
 0x8ff   : >> { %2336 = vadd.xlane.f32.xlu0 %v2335_v56 }
 0x988   : >> { %v2337_v57 = vpop.xlane.xlu0 %2336 }
 0x989   : >> { %v2338_v60 = vmul.f32 0.03125, %v2337_v57  ;;  %v8539_v57 = vmov 0  }
 0x98b   : >> { %v2339_v61 = vsub.f32 %v2334_v54, %v2338_v60  ;;  %v9133_v54 = vshrl.u32 %v3356_v51, 7 }
 0x98d   : >> { %v2340_v28 = vmul.f32 %v2339_v61, %v2339_v61  ;;  %v9136_v56 = vsub.s32 0, %v9133_v54 }
 0x98f   : >> { %v2341_v30 = vsel %vm740_vm1, %v2340_v28, 0.0 }
 0x990   : >> { %2342 = vadd.xlane.f32.xlu1 %v2341_v30 }
 0xa19   : >> { %v2343_v33 = vpop.xlane.xlu1 %2342 }
 0xa1a   : >> { %v2344_v34 = vmul.f32 0.032258064, %v2343_v33 }
 0xa1c   : >> { %8445 = vrsqrt.f32 %v2344_v34  ;;  %vm2347_vm11 = vcmp.eq.f32.partialorder %v2344_v34, inf  ;;  %v2350_v38 = vand.u32 2147483648, %v2344_v34  ;;  %vm2349_vm12 = vcmp.eq.f32.partialorder %v2344_v34, 0.0 }
 0xa29   : >> { %v8446_v35 = vpop.eup %8445 }
 0xa2a   : >> { %v2346_v37 = vmul.f32 %v8446_v35, %v2344_v34 }
 0xa2c   : >> { %v2348_v39 = vsel %vm2347_vm11, %v2344_v34, %v2346_v37 }
 0xa2d   : >> { %v2351_v40 = vsel %vm2349_vm12, %v2350_v38, %v2348_v39 }
 0xa2e   : >> { %v2352_v41 = vadd.f32 1e-06, %v2351_v40 }
 0xa30   : >> { %8447 = vrcp.f32 %v2352_v41 }
 0xa3d   : >> { %v8448_v42 = vpop.eup %8447 }
 0xa3e   : >> { %v2354_v44 = vmul.f32 %v8448_v42, %v2339_v61 }
 0xa40   : >> { %v2361_v46 = vmul.f32 %v7380_v43, %v2354_v44 }
 0xa42   : >> { %v2368_v47 = vadd.f32 %v7381_v45, %v2361_v46 }
 0xa44   : >> { %v2369_v48 = vpack.c.bf16 %v2368_v47, %v2368_v47 }
 0xa46   : >> { %8154 = vmatmul.mubr.msk.bf16.vlgmr.msra.gmra.mxu0 %vm740_vm1, %v2369_v48 }
 0xa47   : >> { %8179 = vmatprep.mubr.msk.f32.mxu0 %vm8530_vm2, %v8529_v3 }
 0xb06   : >> { %v2434_v12 = vpop.f32.mrf.mxu0 }
 0xb07   : >> { %v9056_v13 = vadd.f32 %v7384_v49, %v2434_v12 }
 0xb08   : >> { %v8155_v14 = vpop.f32.mrf.mxu0 }
 0xb09   : >> { %2459 = vrot.lane.b32.xlu1 %v9056_v13, %s8531_s25  ;;  %2457 = vrot.lane.b32.xlu0 %v9056_v13, %s8532_s4  ;;  %v2440_v21 = vmul.f32 0.5, %v9056_v13 }
 0xb0a   : >> { %v2437_v15 = vpop.f32.mrf.mxu0 }
 0xb0c   : >> { %v8156_v20 = vpop.f32.mrf.mxu0 }
 0xb0d   : >> { %2461 = vrot.lane.b32.xlu1 %v9056_v13, %s8533_s0  ;;  %2465 = vrot.lane.b32.xlu0 %v9056_v13, %s8534_s18 }
 0xb11   : >> { %2463 = vrot.lane.b32.xlu1 %v9056_v13, %s8535_s19  ;;  %2469 = vrot.lane.b32.xlu0 %v9056_v13, %s8536_s20 }
 0xb15   : >> { %2467 = vrot.lane.b32.xlu1 %v9056_v13, %s8537_s24 }
 0xb19   : >> { %2471 = vrot.lane.b32.xlu1 %v9056_v13, %s8538_s1 }
 0xb1d   : >> { %2442 = vrot.lane.b32.xlu1 %v2440_v21, %s8532_s4  ;;  %s9709_s4 = sld [smem:[#allocation7_spill]] }
 0xb21   : >> { %2446 = vrot.lane.b32.xlu1 %v2440_v21, %s8533_s0 }
 0xb23   : >> { %s9710_s0 = scalar_lea.vmem %s9709_s4, %s9725_s28  ;;  %s8545_s4 = smov 12  }
 0xb24   : >> { %v3353_v53 = vld [vmem:[%s9710_s0] sm:$0x1]  ;;  %s8546_s0 = smov 16  }
 0xb25   : >> { %vm3354_vm15 = vcmp.gt.f32.partialorder %v3353_v53, 0.0 }
 0xb26   : >> { %v3355_v60 = vsel %vm3354_vm15, 1, %v8539_v57 }
 0xb27   : >> { %v3359_v61 = vrot.slane %v3355_v60, %v9136_v56 }
 0xb29   : >> { %vm9140_vm0 = vcmp.eq.s32.totalorder %v3359_v61, 1 }
 0xb7b   : >> { %v9067_v22 = vpop.permute.xlu1 %2459  ;;  %v9069_v4 = vpop.permute.xlu0 %2457 }
 0xb7c   : >> { %2473 = vrot.lane.b32.xlu0 %v9069_v4, %s8538_s1  ;;  %2475 = vrot.lane.b32.xlu1 %v9067_v22, %s8538_s1 }
 0xb7f   : >> { %v9073_v24 = vpop.permute.xlu1 %2461  ;;  %v9079_v6 = vpop.permute.xlu0 %2465 }
 0xb80   : >> { %2444 = vrot.lane.b32.xlu0 %v2440_v21, %s8531_s25  ;;  %s8544_s25 = smov 8  }
 0xb83   : >> { %v9075_v36 = vpop.permute.xlu1 %2463  ;;  %v9085_v55 = vpop.permute.xlu0 %2469 }
 0xb84   : >> { %2477 = vrot.lane.b32.xlu0 %v9073_v24, %s8538_s1  ;;  %2479 = vrot.lane.b32.xlu1 %v9075_v36, %s8538_s1 }
 0xb87   : >> { %v9081_v52 = vpop.permute.xlu1 %2467 }
 0xb88   : >> { %2481 = vrot.lane.b32.xlu0 %v9079_v6, %s8538_s1  ;;  %2483 = vrot.lane.b32.xlu1 %v9081_v52, %s8538_s1 }
 0xb8b   : >> { %v2472_v5 = vpop.permute.xlu1 %2471 }
 0xb8c   : >> { %2485 = vrot.lane.b32.xlu0 %v9085_v55, %s8538_s1  ;;  %2450 = vrot.lane.b32.xlu1 %v2440_v21, %s8534_s18  ;;  %s8540_s18 = smov 64   ;;  %s8543_s1 = smov 4  }
 0xb8f   : >> { %v2443_v58 = vpop.permute.xlu1 %2442 }
 0xb90   : >> { %2448 = vrot.lane.b32.xlu0 %v2440_v21, %s8535_s19  ;;  %2454 = vrot.lane.b32.xlu1 %v2440_v21, %s8536_s20  ;;  %s8548_s19 = smov 20   ;;  %s8549_s20 = smov 24  }
 0xb93   : >> { %v2447_v59 = vpop.permute.xlu1 %2446 }
 0xb94   : >> { %2452 = vrot.lane.b32.xlu0 %v2440_v21, %s8537_s24  ;;  %s4916_s24 = scalar_lea.vmem %s9679_s13, %s9039_s3 }
 0xbb2   : >> { %2495 = vxpose.xlu0.b32.start.end [1/1] (short) (narrow) %v2472_v5, 8 }
 0xbee   : >> { %v2474_v7 = vpop.permute.xlu0 %2473  ;;  %v2476_v62 = vpop.permute.xlu1 %2475 }
 0xbef   : >> { %2527 = vxpose.xlu1.b32.start.end [1/1] (short) (narrow) %v2474_v7, 8  ;;  %2559 = vxpose.xlu0.b32.start.end [1/1] (short) (narrow) %v2476_v62, 8 }
 0xbf2   : >> { %v2445_v63 = vpop.permute.xlu0 %2444 }
 0xbf6   : >> { %v2478_v0 = vpop.permute.xlu0 %2477  ;;  %v2480_v1 = vpop.permute.xlu1 %2479 }
 0xbf7   : >> { %2591 = vxpose.xlu0.b32.start.end [1/1] (short) (narrow) %v2478_v0, 8 }
 0xbfa   : >> { %v2484_v26 = vpop.permute.xlu1 %2483  ;;  %v2482_v2 = vpop.permute.xlu0 %2481 }
 0xbfb   : >> { %2623 = vxpose.xlu0.b32.start.end [1/1] (short) (narrow) %v2480_v1, 8  ;;  %2687 = vxpose.xlu1.b32.start.end [1/1] (short) (narrow) %v2484_v26, 8 }
 0xbfe   : >> { %v2486_v8 = vpop.permute.xlu0 %2485  ;;  %v2451_v11 = vpop.permute.xlu1 %2450 }
 0xbff   : >> { %2655 = vxpose.xlu0.b32.start.end [1/1] (short) (narrow) %v2482_v2, 8 }
 0xc02   : >> { %v2449_v29 = vpop.permute.xlu0 %2448  ;;  %v2455_v16 = vpop.permute.xlu1 %2454 }
 0xc03   : >> { %2719 = vxpose.xlu0.b32.start.end [1/1] (short) (narrow) %v2486_v8, 8 }
 0xc06   : >> { %v2453_v9 = vpop.permute.xlu0 %2452 }
 0xc2e   : >> { %v2511_v10 = vpop.trf.xlu0 }
 0xc2f   : >> { %8158 = vmatpush3.msk.msra.mxu1 %vm2754_vm13, %v2511_v10 }
 0xc30   : >> { %8160 = vmatmul.mubr.msk.f32.vlgmr.msra.gmra.mxu1 %vm2751_vm14, %v2440_v21  ;;  %8162 = vmatprep.subr.mxu1 %v8529_v3 }
 0xc31   : >> { %8164 = vmatprep.mubr.msk.f32.mxu1 %vm8530_vm2, %v8529_v3 }
 0xc6b   : >> { %v2543_v17 = vpop.trf.xlu1  ;;  %v2575_v18 = vpop.trf.xlu0 }
 0xc6c   : >> { %8163 = vmatpush3.msk.msra.mxu1 %vm2754_vm13, %v2543_v17 }
 0xc6d   : >> { %8165 = vmatmul.mubr.msk.f32.vlgmr.msra.gmra.mxu1 %vm2751_vm14, %v2443_v58  ;;  %8167 = vmatprep.subr.mxu1 %v8529_v3 }
 0xc6e   : >> { %8168 = vmatpush3.msk.msra.mxu1 %vm2754_vm13, %v2575_v18  ;;  %8169 = vmatprep.mubr.msk.f32.mxu1 %vm8530_vm2, %v8529_v3 }
 0xc6f   : >> { %8172 = vmatprep.subr.mxu1 %v8529_v3 }
 0xc71   : >> { %8170 = vmatmul.mubr.msk.f32.vlgmr.msra.gmra.mxu1 %vm2751_vm14, %v2445_v63 }
 0xc72   : >> { %8174 = vmatprep.mubr.msk.f32.mxu1 %vm8530_vm2, %v8529_v3 }
 0xc73   : >> { %v2607_v19 = vpop.trf.xlu0 }
 0xc74   : >> { %8173 = vmatpush3.msk.msra.mxu1 %vm2754_vm13, %v2607_v19 }
 0xc75   : >> { %8175 = vmatmul.mubr.msk.f32.vlgmr.msra.gmra.mxu1 %vm2751_vm14, %v2447_v59  ;;  %8182 = vmatprep.subr.mxu1 %v8529_v3 }
 0xc76   : >> { %8184 = vmatprep.mubr.msk.f32.mxu1 %vm8530_vm2, %v8529_v3 }
 0xc77   : >> { %v2639_v23 = vpop.trf.xlu0  ;;  %v2703_v25 = vpop.trf.xlu1 }
 0xc78   : >> { %8178 = vmatpush3.msk.msra.mxu0 %vm2754_vm13, %v2639_v23 }
 0xc79   : >> { %8180 = vmatmul.mubr.msk.f32.vlgmr.msra.gmra.mxu0 %vm2751_vm14, %v2449_v29  ;;  %8187 = vmatprep.subr.mxu0 %v8529_v3 }
 0xc7a   : >> { %8188 = vmatpush3.msk.msra.mxu0 %vm2754_vm13, %v2703_v25  ;;  %8189 = vmatprep.mubr.msk.f32.mxu0 %vm8530_vm2, %v8529_v3 }
 0xc7b   : >> { %v2671_v27 = vpop.trf.xlu0  ;;  %8197 = vmatprep.subr.mxu0 %v8529_v3 }
 0xc7c   : >> { %8183 = vmatpush3.msk.msra.mxu1 %vm2754_vm13, %v2671_v27 }
 0xc7d   : >> { %8185 = vmatmul.mubr.msk.f32.vlgmr.msra.gmra.mxu1 %vm2751_vm14, %v2451_v11  ;;  %8190 = vmatmul.mubr.msk.f32.vlgmr.msra.gmra.mxu0 %vm2751_vm14, %v2453_v9 }
 0xc7e   : >> { %8192 = vmatprep.subr.mxu1 %v8529_v3  ;;  %8194 = vmatprep.mubr.msk.f32.mxu1 %vm8530_vm2, %v8529_v3 }
 0xc7f   : >> { %v2735_v50 = vpop.trf.xlu0  ;;  %8199 = vmatprep.mubr.msk.f32.mxu0 %vm8530_vm2, %v8529_v3 }
 0xc80   : >> { %8193 = vmatpush3.msk.msra.mxu1 %vm2754_vm13, %v2735_v50 }
 0xc81   : >> { %8195 = vmatmul.mubr.msk.f32.vlgmr.msra.gmra.mxu1 %vm2751_vm14, %v2455_v16  ;;  %8202 = vmatprep.subr.mxu1 %v8529_v3 }
 0xc82   : >> { %8204 = vmatprep.mubr.msk.f32.mxu1 %vm8530_vm2, %v8529_v3 }
 0xcf0   : >> { %v2824_v30 = vpop.f32.mrf.mxu1 }
 0xcf1   : >> { %v3361_v31 = vsel %vm9140_vm0, %v2824_v30, -1e+09 }
 0xcf2   : >> { %v8161_v32 = vpop.f32.mrf.mxu1  ;;  %v3370_v33 = vsel %vm3369_vm3, %v3361_v31, -inf }
 0xcf3   : >> { %3371 = vmax.xlane.f32.xlu1 %v3370_v33 }
 0xd2d   : >> { %v2899_v34 = vpop.f32.mrf.mxu1 }
 0xd2e   : >> { %v9149_v35 = vsel %vm9140_vm0, %v2899_v34, -1e+09 }
 0xd2f   : >> { %v8166_v37 = vpop.f32.mrf.mxu1  ;;  %v3373_v38 = vsel %vm3369_vm3, %v9149_v35, -inf }
 0xd30   : >> { %3374 = vmax.xlane.f32.xlu0 %v3373_v38 }
 0xd31   : >> { %v2974_v39 = vpop.f32.mrf.mxu1 }
 0xd32   : >> { %v3363_v40 = vsel %vm9140_vm0, %v2974_v39, -1e+09 }
 0xd33   : >> { %v8171_v41 = vpop.f32.mrf.mxu1  ;;  %v3376_v42 = vsel %vm3369_vm3, %v3363_v40, -inf }
 0xd34   : >> { %3377 = vmax.xlane.f32.xlu1 %v3376_v42 }
 0xd35   : >> { %v3049_v43 = vpop.f32.mrf.mxu1 }
 0xd36   : >> { %v9158_v44 = vsel %vm9140_vm0, %v3049_v43, -1e+09 }
 0xd37   : >> { %v8176_v45 = vpop.f32.mrf.mxu1  ;;  %v3379_v46 = vsel %vm3369_vm3, %v9158_v44, -inf }
 0xd38   : >> { %3380 = vmax.xlane.f32.xlu1 %v3379_v46 }
 0xd39   : >> { %v3124_v47 = vpop.f32.mrf.mxu0 }
 0xd3a   : >> { %v3365_v48 = vsel %vm9140_vm0, %v3124_v47, -1e+09 }
 0xd3b   : >> { %v8181_v49 = vpop.f32.mrf.mxu0  ;;  %v3382_v12 = vsel %vm3369_vm3, %v3365_v48, -inf }
 0xd3c   : >> { %3383 = vmax.xlane.f32.xlu0 %v3382_v12 }
 0xd3d   : >> { %v3199_v14 = vpop.f32.mrf.mxu1  ;;  %v3274_v15 = vpop.f32.mrf.mxu0 }
 0xd3e   : >> { %v9167_v20 = vsel %vm9140_vm0, %v3199_v14, -1e+09  ;;  %v3367_v21 = vsel %vm9140_vm0, %v3274_v15, -1e+09 }
 0xd3f   : >> { %v8186_v5 = vpop.f32.mrf.mxu1  ;;  %v8191_v58 = vpop.f32.mrf.mxu0  ;;  %v3385_v59 = vsel %vm3369_vm3, %v9167_v20, -inf  ;;  %v3388_v7 = vsel %vm3369_vm3, %v3367_v21, -inf }
 0xd40   : >> { %3386 = vmax.xlane.f32.xlu1 %v3385_v59  ;;  %3389 = vmax.xlane.f32.xlu0 %v3388_v7 }
 0xd41   : >> { %v3349_v62 = vpop.f32.mrf.mxu1 }
 0xd42   : >> { %v3368_v63 = vsel %vm9140_vm0, %v3349_v62, -1e+09 }
 0xd43   : >> { %v8196_v0 = vpop.f32.mrf.mxu1  ;;  %v3391_v1 = vsel %vm3369_vm3, %v3368_v63, -inf }
 0xd44   : >> { %3392 = vmax.xlane.f32.xlu1 %v3391_v1 }
 0xd55   : >> { %3460 = vrot.lane.b32.xlu1 %v9069_v4, %s8540_s18 }
 0xd56   : >> { %3458 = vrot.lane.b32.xlu0 %v9056_v13, %s8540_s18 }
 0xd59   : >> { %3464 = vrot.lane.b32.xlu1 %v9073_v24, %s8540_s18 }
 0xd5d   : >> { %3468 = vrot.lane.b32.xlu1 %v9079_v6, %s8540_s18 }
 0xd61   : >> { %3472 = vrot.lane.b32.xlu1 %v9085_v55, %s8540_s18 }
 0xd7c   : >> { %v3372_v26 = vpop.xlane.xlu1 %3371 }
 0xd7d   : >> { %v3394_v2 = vsub.f32 %v3361_v31, %v3372_v26 }
 0xd7f   : >> { %v3402_v8 = vmul.f32 1.442695, %v3394_v2 }
 0xd81   : >> { %8449 = vpow2.f32 %v3402_v8 }
 0xd8e   : >> { %v9187_v29 = vpop.eup %8449 }
 0xd8f   : >> { %v3418_v4 = vsel %vm3369_vm3, %v9187_v29, 0.0 }
 0xd90   : >> { %3419 = vadd.xlane.f32.xlu1 %v3418_v4 }
 0xdb9   : >> { %v3375_v13 = vpop.xlane.xlu0 %3374 }
 0xdba   : >> { %v3395_v31 = vsub.f32 %v9149_v35, %v3375_v13 }
 0xdbc   : >> { %v3404_v32 = vmul.f32 1.442695, %v3395_v31 }
 0xdbd   : >> { %v3378_v9 = vpop.xlane.xlu1 %3377 }
 0xdbe   : >> { %v3396_v10 = vsub.f32 %v3363_v40, %v3378_v9 }
 0xdc0   : >> { %v3406_v16 = vmul.f32 1.442695, %v3396_v10 }
 0xdc1   : >> { %v3381_v60 = vpop.xlane.xlu1 %3380 }
 0xdc2   : >> { %v3397_v33 = vsub.f32 %v9158_v44, %v3381_v60 }
 0xdc4   : >> { %v3408_v37 = vmul.f32 1.442695, %v3397_v33 }
 0xdc5   : >> { %v3384_v24 = vpop.xlane.xlu0 %3383 }
 0xdc6   : >> { %v3398_v11 = vsub.f32 %v3365_v48, %v3384_v24 }
 0xdc8   : >> { %v3410_v6 = vmul.f32 1.442695, %v3398_v11 }
 0xdc9   : >> { %v3390_v17 = vpop.xlane.xlu0 %3389  ;;  %v3387_v61 = vpop.xlane.xlu1 %3386 }
 0xdca   : >> { %8451 = vpow2.f32 %v3410_v6  ;;  %v3400_v55 = vsub.f32 %v3367_v21, %v3390_v17  ;;  %v3399_v38 = vsub.f32 %v9167_v20, %v3387_v61 }
 0xdcb   : >> { %8453 = vpow2.f32 %v3406_v16 }
 0xdcc   : >> { %v3414_v18 = vmul.f32 1.442695, %v3400_v55 }
 0xdcd   : >> { %v3459_v19 = vpop.permute.xlu0 %3458  ;;  %v3393_v28 = vpop.xlane.xlu1 %3392 }
 0xdce   : >> { %3482 = vxpose.xlu0.b32.start.end [1/1] (short) (narrow) %v3459_v19, 8  ;;  %8455 = vpow2.f32 %v3414_v18  ;;  %v3401_v40 = vsub.f32 %v3368_v63, %v3393_v28 }
 0xdcf   : >> { %8457 = vpow2.f32 %v3404_v32 }
 0xdd0   : >> { %8459 = vpow2.f32 %v3408_v37 }
 0xdd1   : >> { %v3461_v30 = vpop.permute.xlu1 %3460 }
 0xdd5   : >> { %v3465_v34 = vpop.permute.xlu1 %3464 }
 0xdd7   : >> { %v9191_v23 = vpop.eup %8451 }
 0xdd8   : >> { %v3430_v25 = vsel %vm3369_vm3, %v9191_v23, 0.0  ;;  %v9195_v27 = vpop.eup %8453 }
 0xdd9   : >> { %3431 = vadd.xlane.f32.xlu1 %v3430_v25  ;;  %v3424_v50 = vsel %vm3369_vm3, %v9195_v27, 0.0  ;;  %v3469_v39 = vpop.permute.xlu1 %3468 }
 0xddb   : >> { %v9199_v51 = vpop.eup %8455 }
 0xddc   : >> { %v3436_v53 = vsel %vm3369_vm3, %v9199_v51, 0.0  ;;  %v8458_v42 = vpop.eup %8457 }
 0xddd   : >> { %3425 = vadd.xlane.f32.xlu1 %v3424_v50  ;;  %v3473_v41 = vpop.permute.xlu1 %3472  ;;  %v3421_v35 = vsel %vm3369_vm3, %v8458_v42, 0.0  ;;  %v8460_v43 = vpop.eup %8459 }
 0xdde   : >> { %v3427_v44 = vsel %vm3369_vm3, %v8460_v43, 0.0 }
 0xde1   : >> { %3437 = vadd.xlane.f32.xlu1 %v3436_v53 }
 0xdf7   : >> { %3462 = vrot.lane.b32.xlu0 %v9067_v22, %s8540_s18  ;;  %v3412_v22 = vmul.f32 1.442695, %v3399_v38 }
 0xdf9   : >> { %8461 = vpow2.f32 %v3412_v22 }
 0xdfb   : >> { %3466 = vrot.lane.b32.xlu0 %v9075_v36, %s8540_s18  ;;  %v3416_v36 = vmul.f32 1.442695, %v3401_v40 }
 0xdfd   : >> { %8463 = vpow2.f32 %v3416_v36 }
 0xdff   : >> { %3470 = vrot.lane.b32.xlu0 %v9081_v52, %s8540_s18  ;;  %s8547_s18 = smov 28  }
 0xe06   : >> { %v9214_v45 = vpop.eup %8461 }
 0xe07   : >> { %v3433_v46 = vsel %vm3369_vm3, %v9214_v45, 0.0 }
 0xe0a   : >> { %v9218_v47 = vpop.eup %8463 }
 0xe0b   : >> { %v3439_v12 = vsel %vm3369_vm3, %v9218_v47, 0.0 }
 0xe14   : >> { %3514 = vxpose.xlu1.b32.start.end [1/1] (short) (narrow) %v3461_v30, 8 }
 0xe19   : >> { %v3420_v52 = vpop.xlane.xlu1 %3419 }
 0xe1a   : >> { %8465 = vrcp.f32 %v3420_v52  ;;  %v8541_v52 = vmov 1983009808  }
 0xe1e   : >> { %3422 = vadd.xlane.f32.xlu0 %v3421_v35  ;;  %v8542_v35 = vmov 1934713408  }
 0xe22   : >> { %3428 = vadd.xlane.f32.xlu0 %v3427_v44 }
 0xe26   : >> { %3434 = vadd.xlane.f32.xlu0 %v3433_v46 }
 0xe27   : >> { %v8466_v48 = vpop.eup %8465 }
 0xe28   : >> { %v3450_v49 = vmul.f32 %v8466_v48, %v9187_v29 }
 0xe2a   : >> { %8198 = vmatpush3.xpose.msk.msra.mxu0 %vm3369_vm3, %v3450_v49  ;;  %3440 = vadd.xlane.f32.xlu0 %v3439_v12 }
 0xe2b   : >> { %8207 = vmatprep.subr.mxu0 %v8529_v3 }
 0xe4a   : >> { %v3498_v14 = vpop.trf.xlu0 }
 0xe4b   : >> { %8200 = vmatmul.mubr.msk.f32.vlgmr.msra.gmra.mxu0 %vm3369_vm3, %v3498_v14 }
 0xe4c   : >> { %8209 = vmatprep.mubr.msk.f32.mxu0 %vm8530_vm2, %v8529_v3 }
 0xe62   : >> { %v3432_v15 = vpop.xlane.xlu1 %3431 }
 0xe66   : >> { %v3426_v20 = vpop.xlane.xlu1 %3425 }
 0xe67   : >> { %8467 = vrcp.f32 %v3426_v20 }
 0xe69   : >> { %v3463_v21 = vpop.permute.xlu0 %3462 }
 0xe6a   : >> { %3546 = vxpose.xlu0.b32.start.end [1/1] (short) (narrow) %v3463_v21, 8  ;;  %v3438_v0 = vpop.xlane.xlu1 %3437 }
 0xe6d   : >> { %v3467_v5 = vpop.permute.xlu0 %3466 }
 0xe6e   : >> { %3578 = vxpose.xlu0.b32.start.end [1/1] (short) (narrow) %v3465_v34, 8  ;;  %3610 = vxpose.xlu1.b32.start.end [1/1] (short) (narrow) %v3467_v5, 8 }
 0xe71   : >> { %v3471_v58 = vpop.permute.xlu0 %3470 }
 0xe72   : >> { %3642 = vxpose.xlu0.b32.start.end [1/1] (short) (narrow) %v3469_v39, 8  ;;  %3674 = vxpose.xlu1.b32.start.end [1/1] (short) (narrow) %v3471_v58, 8 }
 0xe74   : >> { %v8468_v59 = vpop.eup %8467 }
 0xe75   : >> { %v3452_v7 = vmul.f32 %v8468_v59, %v9195_v27 }
 0xe76   : >> { %3706 = vxpose.xlu0.b32.start.end [1/1] (short) (narrow) %v3473_v41, 8 }
 0xe77   : >> { %8208 = vmatpush3.xpose.msk.msra.mxu0 %vm3369_vm3, %v3452_v7 }
 0xe78   : >> { %8217 = vmatprep.subr.mxu0 %v8529_v3 }
 0xe90   : >> { %v3530_v2 = vpop.trf.xlu1 }
 0xea7   : >> { %v3423_v62 = vpop.xlane.xlu0 %3422 }
 0xea8   : >> { %8469 = vrcp.f32 %v3423_v62 }
 0xeab   : >> { %v3429_v63 = vpop.xlane.xlu0 %3428 }
 0xeac   : >> { %8471 = vrcp.f32 %v3429_v63 }
 0xead   : >> { %8473 = vrcp.f32 %v3432_v15 }
 0xeae   : >> { %8475 = vrcp.f32 %v3438_v0 }
 0xeaf   : >> { %v3435_v4 = vpop.xlane.xlu0 %3434 }
 0xeb0   : >> { %8477 = vrcp.f32 %v3435_v4 }
 0xeb3   : >> { %v3441_v13 = vpop.xlane.xlu0 %3440 }
 0xeb4   : >> { %8479 = vrcp.f32 %v3441_v13 }
 0xeb5   : >> { %v8470_v1 = vpop.eup %8469 }
 0xeb6   : >> { %v3451_v26 = vmul.f32 %v8470_v1, %v8458_v42  ;;  %v4605_v42 = vunpack.c.l.s4 %v8541_v52 }
 0xeb8   : >> { %8203 = vmatpush3.xpose.msk.msra.mxu1 %vm3369_vm3, %v3451_v26 }
 0xeb9   : >> { %v8472_v8 = vpop.eup %8471  ;;  %8212 = vmatprep.subr.mxu1 %v8529_v3 }
 0xeba   : >> { %v3453_v29 = vmul.f32 %v8472_v8, %v8460_v43  ;;  %v8474_v9 = vpop.eup %8473  ;;  %v4669_v43 = vunpack.c.l.s4 %v8542_v35 }
 0xebb   : >> { %8205 = vmatmul.mubr.msk.f32.vlgmr.msra.gmra.mxu1 %vm3369_vm3, %v3530_v2  ;;  %v8476_v10 = vpop.eup %8475  ;;  %v3454_v11 = vmul.f32 %v8474_v9, %v9191_v23 }
 0xebc   : >> { %8213 = vmatpush3.xpose.msk.msra.mxu1 %vm3369_vm3, %v3453_v29  ;;  %8214 = vmatprep.mubr.msk.f32.mxu1 %vm8530_vm2, %v8529_v3  ;;  %v3456_v18 = vmul.f32 %v8476_v10, %v9199_v51 }
 0xebd   : >> { %8222 = vmatprep.subr.mxu1 %v8529_v3  ;;  %v8478_v16 = vpop.eup %8477 }
 0xebe   : >> { %v3455_v55 = vmul.f32 %v8478_v16, %v9214_v45  ;;  %v4606_v45 = vunpack.c.0.s8 %v4605_v42 }
 0xec0   : >> { %v9267_v48 = vsub.s32 %v4606_v45, %v9133_v54 }
 0xec1   : >> { %v8480_v19 = vpop.eup %8479 }
 0xec2   : >> { %v3457_v25 = vmul.f32 %v8480_v19, %v9218_v47  ;;  %v4670_v47 = vunpack.c.0.s8 %v4669_v43 }
 0xec4   : >> { %v9270_v5 = vsub.s32 %v4670_v47, %v9133_v54 }
 0xee6   : >> { %v3562_v24 = vpop.trf.xlu0 }
 0xee7   : >> { %8210 = vmatmul.mubr.msk.f32.vlgmr.msra.gmra.mxu0 %vm3369_vm3, %v3562_v24 }
 0xee8   : >> { %8218 = vmatpush3.xpose.msk.msra.mxu0 %vm3369_vm3, %v3454_v11  ;;  %8219 = vmatprep.mubr.msk.f32.mxu0 %vm8530_vm2, %v8529_v3 }
 0xee9   : >> { %8227 = vmatprep.subr.mxu0 %v8529_v3 }
 0xeea   : >> { %v3626_v6 = vpop.trf.xlu1  ;;  %v3594_v17 = vpop.trf.xlu0 }
 0xeeb   : >> { %8215 = vmatmul.mubr.msk.f32.vlgmr.msra.gmra.mxu1 %vm3369_vm3, %v3594_v17  ;;  %8220 = vmatmul.mubr.msk.f32.vlgmr.msra.gmra.mxu0 %vm3369_vm3, %v3626_v6 }
 0xeec   : >> { %8223 = vmatpush3.xpose.msk.msra.mxu1 %vm3369_vm3, %v3455_v55  ;;  %8228 = vmatpush3.xpose.msk.msra.mxu0 %vm3369_vm3, %v3456_v18 }
 0xeed   : >> { %8224 = vmatprep.mubr.msk.f32.mxu1 %vm8530_vm2, %v8529_v3  ;;  %8232 = vmatprep.subr.mxu1 %v8529_v3 }
 0xeee   : >> { %v3658_v23 = vpop.trf.xlu0  ;;  %v3690_v27 = vpop.trf.xlu1  ;;  %8229 = vmatprep.mubr.msk.f32.mxu0 %vm8530_vm2, %v8529_v3  ;;  %8237 = vmatprep.subr.bf16.mxu0 %v8529_v3 }
 0xeef   : >> { %8225 = vmatmul.mubr.msk.f32.vlgmr.msra.gmra.mxu1 %vm3369_vm3, %v3658_v23  ;;  %8230 = vmatmul.mubr.msk.f32.vlgmr.msra.gmra.mxu0 %vm3369_vm3, %v3690_v27 }
 0xef0   : >> { %8233 = vmatpush3.xpose.msk.msra.mxu1 %vm3369_vm3, %v3457_v25  ;;  %8234 = vmatprep.mubr.msk.f32.mxu1 %vm8530_vm2, %v8529_v3 }
 0xef1   : >> { %8241 = vmatprep.mubr.msk.bf16.mxu0 %vm8530_vm2, %v8529_v3  ;;  %vm4904_vm2 = vcmask 97280  }
 0xef2   : >> { %v3722_v50 = vpop.trf.xlu0 }
 0xef3   : >> { %8235 = vmatmul.mubr.msk.f32.vlgmr.msra.gmra.mxu1 %vm3369_vm3, %v3722_v50 }
 0xef4   : >> { %5337 = vmatprep.mubr.bf16.mxu1 %v8539_v57 }
 0xf0b   : >> { %v3810_v51 = vpop.f32.mrf.mxu0 }
 0xf0c   : >> { %4346 = vxpose.xlu1.b32.start.end [1/1] (short) (narrow) %v3810_v51, 8 }
 0xf0d   : >> { %v8201_v53 = vpop.f32.mrf.mxu0 }
 0xf7b   : >> { %v3886_v60 = vpop.f32.mrf.mxu1 }
 0xf7c   : >> { %4378 = vxpose.xlu0.b32.start.end [1/1] (short) (narrow) %v3886_v60, 8 }
 0xf7d   : >> { %v8206_v61 = vpop.f32.mrf.mxu1 }
 0xf88   : >> { %v4362_v41 = vpop.trf.xlu1 }
 0xfa7   : >> { %v3962_v28 = vpop.f32.mrf.mxu0 }
 0xfa8   : >> { %4410 = vxpose.xlu1.b32.start.end [1/1] (short) (narrow) %v3962_v28, 8 }
 0xfa9   : >> { %v8211_v30 = vpop.f32.mrf.mxu0 }
 0xfab   : >> { %v4038_v31 = vpop.f32.mrf.mxu1  ;;  %v4114_v32 = vpop.f32.mrf.mxu0 }
 0xfac   : >> { %4442 = vxpose.xlu0.b32.start.end [1/1] (short) (narrow) %v4038_v31, 8  ;;  %4474 = vxpose.xlu1.b32.start.end [1/1] (short) (narrow) %v4114_v32, 8 }
 0xfad   : >> { %v8216_v33 = vpop.f32.mrf.mxu1  ;;  %v8221_v34 = vpop.f32.mrf.mxu0 }
 0xfaf   : >> { %v4190_v37 = vpop.f32.mrf.mxu1  ;;  %v4266_v38 = vpop.f32.mrf.mxu0 }
 0xfb0   : >> { %4506 = vxpose.xlu0.b32.start.end [1/1] (short) (narrow) %v4190_v37, 8  ;;  %4538 = vxpose.xlu1.b32.start.end [1/1] (short) (narrow) %v4266_v38, 8 }
 0xfb1   : >> { %v8226_v39 = vpop.f32.mrf.mxu1  ;;  %v8231_v22 = vpop.f32.mrf.mxu0 }
 0xfb3   : >> { %v4342_v40 = vpop.f32.mrf.mxu1 }
 0xfb4   : >> { %4570 = vxpose.xlu0.b32.start.end [1/1] (short) (narrow) %v4342_v40, 8 }
 0xfb5   : >> { %v8236_v36 = vpop.f32.mrf.mxu1 }
 0xff8   : >> { %v4394_v44 = vpop.trf.xlu0 }
0x1024   : >> { %v4426_v46 = vpop.trf.xlu1 }
0x1025   : >> { %v4602_v49 = vcombine.low %v4362_v41, %v4426_v46  ;;  %v4603_v12 = vcombine.high %v4362_v41, %v4426_v46 }
0x1027   : >> { %v4610_v7 = vrot.slane %v4602_v49, %v9267_v48  ;;  %v4617_v62 = vrot.slane %v4603_v12, %v9267_v48 }
0x1028   : >> { %v4458_v14 = vpop.trf.xlu0  ;;  %v4490_v15 = vpop.trf.xlu1 }
0x1029   : >> { %v4618_v20 = vcombine.low %v4394_v44, %v4458_v14  ;;  %v4619_v21 = vcombine.high %v4394_v44, %v4458_v14 }
0x102b   : >> { %v4626_v58 = vrot.slane %v4618_v20, %v9267_v48  ;;  %v4633_v59 = vrot.slane %v4619_v21, %v9267_v48 }
0x102c   : >> { %v4522_v63 = vpop.trf.xlu0  ;;  %v4554_v8 = vpop.trf.xlu1 }
0x102d   : >> { %v4666_v0 = vcombine.low %v4610_v7, %v4626_v58  ;;  %v4667_v1 = vcombine.high %v4610_v7, %v4626_v58  ;;  %v4682_v26 = vcombine.low %v4617_v62, %v4633_v59  ;;  %v4683_v2 = vcombine.high %v4617_v62, %v4633_v59  ;;  %v8299_v58 = vld [vmem:[%s4916_s24 + $0x8] sm:$0xff]  }
0x102e   : >> { %v4634_v24 = vcombine.low %v4490_v15, %v4554_v8  ;;  %v4635_v11 = vcombine.high %v4490_v15, %v4554_v8  ;;  %8238 = vmatpush3.bf16.msra.mxu0 %v8299_v58 }
0x102f   : >> { %v4674_v29 = vrot.slane %v4666_v0, %v9270_v5  ;;  %v4681_v4 = vrot.slane %v4667_v1, %v9270_v5  ;;  %v4690_v13 = vrot.slane %v4682_v26, %v9270_v5  ;;  %v4697_v9 = vrot.slane %v4683_v2, %v9270_v5  ;;  %8239 = vmatprep.subr.bf16.mxu0 %v8529_v3  ;;  %v8300_v1 = vld [vmem:[%s4916_s24] sm:$0xff]  }
0x1030   : >> { %v4586_v10 = vpop.trf.xlu0  ;;  %v4642_v60 = vrot.slane %v4634_v24, %v9267_v48  ;;  %v4649_v61 = vrot.slane %v4635_v11, %v9267_v48 }
0x1031   : >> { %v7420_v16 = vcombine.low %v4674_v29, %v4681_v4  ;;  %v7422_v6 = vcombine.high %v4674_v29, %v4681_v4  ;;  %v7424_v17 = vcombine.low %v4690_v13, %v4697_v9  ;;  %v7426_v55 = vcombine.high %v4690_v13, %v4697_v9 }
0x1032   : >> { %v4650_v18 = vcombine.low %v4522_v63, %v4586_v10  ;;  %v4651_v19 = vcombine.high %v4522_v63, %v4586_v10  ;;  %8240 = vmatpush3.bf16.msra.mxu0 %v8300_v1 }
0x1033   : >> { %v4746_v23 = vrot.slane %v7420_v16, %v9267_v48  ;;  %v4762_v25 = vrot.slane %v7422_v6, %v9267_v48  ;;  %v4778_v27 = vrot.slane %v7424_v17, %v9267_v48  ;;  %v4794_v50 = vrot.slane %v7426_v55, %v9267_v48 }
0x1034   : >> { %v4658_v51 = vrot.slane %v4650_v18, %v9267_v48  ;;  %v4665_v53 = vrot.slane %v4651_v19, %v9267_v48 }
0x1035   : >> { %v4802_v28 = vcombine.low %v4746_v23, %v4762_v25  ;;  %v4834_v30 = vcombine.low %v4778_v27, %v4794_v50  ;;  %v4803_v31 = vcombine.high %v4746_v23, %v4762_v25  ;;  %v4835_v32 = vcombine.high %v4778_v27, %v4794_v50 }
0x1036   : >> { %v4698_v33 = vcombine.low %v4642_v60, %v4658_v51  ;;  %v4699_v34 = vcombine.high %v4642_v60, %v4658_v51  ;;  %v4714_v37 = vcombine.low %v4649_v61, %v4665_v53  ;;  %v4715_v38 = vcombine.high %v4649_v61, %v4665_v53  ;;  %v8499_v60 = vld [vmem:[#allocation2] sm:$0xff] }
0x1037   : >> { %v4810_v39 = vrot.slane %v4802_v28, %v9270_v5  ;;  %v4842_v22 = vrot.slane %v4834_v30, %v9270_v5  ;;  %v4817_v40 = vrot.slane %v4803_v31, %v9270_v5  ;;  %v4849_v36 = vrot.slane %v4835_v32, %v9270_v5 }
0x1038   : >> { %v4706_v41 = vrot.slane %v4698_v33, %v9270_v5  ;;  %v4713_v52 = vrot.slane %v4699_v34, %v9270_v5  ;;  %v4722_v42 = vrot.slane %v4714_v37, %v9270_v5  ;;  %v4729_v35 = vrot.slane %v4715_v38, %v9270_v5 }
0x1039   : >> { %v4867_v43 = vcombine.high %v4810_v39, %v4842_v22  ;;  %v4868_v44 = vcombine.low %v4817_v40, %v4849_v36  ;;  %v4866_v45 = vcombine.low %v4810_v39, %v4842_v22  ;;  %v4869_v59 = vcombine.high %v4817_v40, %v4849_v36 }
0x103a   : >> { %v7421_v46 = vcombine.low %v4706_v41, %v4713_v52  ;;  %v7423_v47 = vcombine.high %v4706_v41, %v4713_v52  ;;  %v7425_v49 = vcombine.low %v4722_v42, %v4729_v35  ;;  %v7427_v12 = vcombine.high %v4722_v42, %v4729_v35 }
0x103b   : >> { %4875 = vrot.lane.b32.xlu1 %v4867_v43, %s8543_s1  ;;  %4879 = vrot.lane.b32.xlu0 %v4868_v44, %s8544_s25  ;;  %s4977_s25 = scalar_lea.vmem %s9680_s14, %s8526_s5  ;;  %s9714_s1 = sld [smem:[#allocation13_spill]] }
0x103c   : >> { %v4753_v14 = vrot.slane %v7421_v46, %v9267_v48  ;;  %v4769_v15 = vrot.slane %v7423_v47, %v9267_v48  ;;  %v4785_v20 = vrot.slane %v7425_v49, %v9267_v48  ;;  %v4801_v21 = vrot.slane %v7427_v12, %v9267_v48  ;;  %v7432_v53 = vld [vmem:[%s4977_s25] ss:$0 sm:$0xff] }
0x103e   : >> { %v4818_v7 = vcombine.low %v4753_v14, %v4769_v15  ;;  %v4850_v62 = vcombine.low %v4785_v20, %v4801_v21  ;;  %v4819_v63 = vcombine.high %v4753_v14, %v4769_v15  ;;  %v4851_v0 = vcombine.high %v4785_v20, %v4801_v21 }
0x103f   : >> { %4883 = vrot.lane.b32.xlu1 %v4869_v59, %s8545_s4  ;;  %s7625_s4 = sshll.u32 %s8526_s5, 8 }
0x1040   : >> { %v4826_v26 = vrot.slane %v4818_v7, %v9270_v5  ;;  %v4858_v2 = vrot.slane %v4850_v62, %v9270_v5  ;;  %v4833_v8 = vrot.slane %v4819_v63, %v9270_v5  ;;  %v4865_v48 = vrot.slane %v4851_v0, %v9270_v5 }
0x1041   : >> { %s7013_s25 = scalar_lea.vmem %s9714_s1, %s8526_s5  ;;  %s750_s5 = sadd.s32 1, %s8526_s5  }
0x1042   : >> { %v4870_v29 = vcombine.low %v4826_v26, %v4858_v2  ;;  %v4873_v4 = vcombine.high %v4833_v8, %v4865_v48  ;;  %v4871_v13 = vcombine.high %v4826_v26, %v4858_v2  ;;  %v4872_v3 = vcombine.low %v4833_v8, %v4865_v48  ;;  %p747_p4 = scmp.ge.s32.totalorder %s750_s5, 3  }
0x1043   : > { %vm7131_vm10 = vcmask (%p747_p4), 7168   ;;  %s9721_s5 = sld [smem:[#allocation15_spill]] (%p747_p4) }
0x1044   : >> { %4887 = vrot.lane.b32.xlu1 %v4870_v29, %s8546_s0  ;;  %4899 = vrot.lane.b32.xlu0 %v4873_v4, %s8547_s18 }
0x1048   : >> { %4891 = vrot.lane.b32.xlu1 %v4871_v13, %s8548_s19  ;;  %s9327_s19 = scalar_lea.vmem %s9681_s15, %s7625_s4  ;;  %s9719_s4 = sld [smem:[#allocation11_spill]] (%p747_p4) }
0x1049   : >> { %v5040_v40 = vld [vmem:[%s9327_s19 + $0x80] sm:$0xff]  ;;  %v5041_v41 = vld [vmem:[%s9327_s19 + $0x88] sm:$0xff]  ;;  %v5042_v21 = vld [vmem:[%s9327_s19 + $0x90] sm:$0xff] }
0x104a   : >> { %v5048_v36 = vld [vmem:[%s9327_s19 + $0xc0] sm:$0xff]  ;;  %v5049_v42 = vld [vmem:[%s9327_s19 + $0xc8] sm:$0xff]  ;;  %v5050_v58 = vld [vmem:[%s9327_s19 + $0xd0] sm:$0xff] }
0x104b   : >> { %v7455_v52 = vcombine.high %v5040_v40, %v5048_v36  ;;  %v7454_v35 = vcombine.low %v5040_v40, %v5048_v36  ;;  %v7456_v43 = vcombine.low %v5041_v41, %v5049_v42  ;;  %v7457_v44 = vcombine.high %v5041_v41, %v5049_v42  ;;  %v5032_v46 = vld [vmem:[%s9327_s19 + $0x40] sm:$0xff]  ;;  %v5025_v47 = vld [vmem:[%s9327_s19 + $0x8] sm:$0xff]  ;;  %v5043_v59 = vld [vmem:[%s9327_s19 + $0x98] sm:$0xff] }
0x104c   : >> { %4895 = vrot.lane.b32.xlu1 %v4872_v3, %s8549_s20  ;;  %v5033_v12 = vld [vmem:[%s9327_s19 + $0x48] sm:$0xff]  ;;  %v7459_v7 = vcombine.high %v5042_v21, %v5050_v58  ;;  %v5051_v62 = vld [vmem:[%s9327_s19 + $0xd8] sm:$0xff]  ;;  %v7458_v63 = vcombine.low %v5042_v21, %v5050_v58  ;;  %v5046_v36 = vld [vmem:[%s9327_s19 + $0xb0] sm:$0xff]  ;;  %s9713_s20 = sld [smem:[#allocation12_spill]] }
0x104d   : >> { %5317 = vmatprep.subr.bf16.mxu1 %v7455_v52  ;;  %5358 = vmatprep.subr.bf16.mxu0 %v7457_v44  ;;  %v7441_v15 = vcombine.high %v5025_v47, %v5033_v12  ;;  %v7440_v20 = vcombine.low %v5025_v47, %v5033_v12  ;;  %v7460_v0 = vcombine.low %v5043_v59, %v5051_v62  ;;  %v5054_v41 = vld [vmem:[%s9327_s19 + $0xf0] sm:$0xff]  ;;  %v5047_v52 = vld [vmem:[%s9327_s19 + $0xb8] sm:$0xff] }
0x104e   : >> { %5318 = vmatpush1.bf16.msra.mxu1 %v7454_v35  ;;  %v7461_v1 = vcombine.high %v5043_v59, %v5051_v62  ;;  %v5055_v42 = vld [vmem:[%s9327_s19 + $0xf8] sm:$0xff]  ;;  %v7467_v44 = vcombine.high %v5046_v36, %v5054_v41  ;;  %v5038_v47 = vld [vmem:[%s9327_s19 + $0x70] sm:$0xff] }
0x104f   : >> { %v5039_v12 = vld [vmem:[%s9327_s19 + $0x78] sm:$0xff] }
0x1050   : >> { %v8302_v62 = vld [vmem:[%s8774_s26 + $0xf8] sm:$0xff]  }
0x1052   : >> { %s5057_s24 = scalar_lea.vmem %s9713_s20, %s9039_s3 }
0x10ad   : >> { %v4876_v9 = vpop.permute.xlu1 %4875  ;;  %v4880_v16 = vpop.permute.xlu0 %4879 }
0x10ae   : >> { %v4902_v11 = vsel %vm2751_vm14, %v4866_v45, %v4876_v9  ;;  %v5024_v45 = vld [vmem:[%s9327_s19] sm:$0xff] }
0x10af   : >> { %v4903_v6 = vsel %vm3369_vm3, %v4902_v11, %v4880_v16  ;;  %v7439_v49 = vcombine.high %v5024_v45, %v5032_v46  ;;  %v7438_v14 = vcombine.low %v5024_v45, %v5032_v46  ;;  %v7434_v11 = vld [vmem:[%s8847_s2 + $0x5] ss:$0 sm:$0xff]  ;;  %v7469_v45 = vcombine.high %v5047_v52, %v5055_v42  ;;  %v5030_v46 = vld [vmem:[%s9327_s19 + $0x30] sm:$0xff]  ;;  %s9716_s2 = sld [smem:[#allocation9_spill]] (%p747_p4) }
0x10b0   : >> { %v7450_v58 = vcombine.low %v5030_v46, %v5038_v47 }
0x10b1   : >> { %v4884_v10 = vpop.permute.xlu1 %4883  ;;  %5319 = vmatprep.subr.bf16.mxu1 %v7439_v49  ;;  %v5031_v49 = vld [vmem:[%s9327_s19 + $0x38] sm:$0xff] }
0x10b2   : >> { %v4905_v17 = vsel %vm4904_vm2, %v4903_v6, %v4884_v10  ;;  %5320 = vmatpush1.bf16.msra.mxu1 %v7438_v14  ;;  %v7433_v10 = vld [vmem:[%s8842_s23 + $0x5] ss:$0 sm:$0xff]  ;;  %v5034_v6 = vld [vmem:[%s9327_s19 + $0x50] sm:$0xff]  ;;  %v7466_v14 = vcombine.low %v5046_v36, %v5054_v41  ;;  %v7453_v21 = vcombine.high %v5031_v49, %v5039_v12  ;;  %v7452_v59 = vcombine.low %v5031_v49, %v5039_v12  ;;  %s9720_s23 = sld [smem:[#allocation14_spill]] (%p747_p4) }
0x10b3   : >> { %5399 = vmatprep.subr.bf16.mxu1 %v7459_v7  ;;  %v8301_v7 = vld [vmem:[%s8774_s26 + $0x78] sm:$0xff]   ;;  %v5084_v49 = vsub.s32 5, %v9133_v54  ;;  %v5092_v12 = vsub.s32 7, %v9133_v54 }
0x10b6   : >> { %v4888_v24 = vpop.permute.xlu1 %4887  ;;  %v4900_v23 = vpop.permute.xlu0 %4899 }
0x10b7   : >> { %v4907_v55 = vsel %vm4906_vm4, %v4905_v17, %v4888_v24  ;;  %v5027_v17 = vld [vmem:[%s9327_s19 + $0x18] sm:$0xff] }
0x10ba   : >> { %v4892_v5 = vpop.permute.xlu1 %4891 }
0x10bb   : >> { %v4909_v18 = vsel %vm4908_vm5, %v4907_v55, %v4892_v5  ;;  %v5026_v5 = vld [vmem:[%s9327_s19 + $0x10] sm:$0xff]  ;;  %v5035_v55 = vld [vmem:[%s9327_s19 + $0x58] sm:$0xff] }
0x10be   : >> { %v4896_v19 = vpop.permute.xlu1 %4895 }
0x10bf   : >> { %v4911_v25 = vsel %vm4910_vm6, %v4909_v18, %v4896_v19 }
0x10c0   : >> { %v4913_v27 = vsel %vm4912_vm7, %v4911_v25, %v4900_v23  ;;  %v7443_v23 = vcombine.high %v5026_v5, %v5034_v6  ;;  %v7445_v25 = vcombine.high %v5027_v17, %v5035_v55 }
0x10c1   : >> { %v4914_v50 = vpack.c.bf16 %v4913_v27, %v4913_v27  ;;  %v5044_v27 = vld [vmem:[%s9327_s19 + $0xa0] sm:$0xff] }
0x10c3   : >> { %8242 = vmatmul.mubr.msk.bf16.vlgmr.msra.gmra.mxu0 %vm740_vm1, %v4914_v50  ;;  %v5052_v50 = vld [vmem:[%s9327_s19 + $0xe0] sm:$0xff] }
0x10c4   : >> { %5378 = vmatprep.mubr.bf16.mxu0 %v8539_v57  ;;  %5359 = vmatpush1.bf16.msra.mxu0 %v7456_v43 }
0x10c5   : >> { %5360 = vmatprep.subr.bf16.mxu0 %v7441_v15  ;;  %v7468_v15 = vcombine.low %v5047_v52, %v5055_v42 }
0x10c8   : >> { %5361 = vmatpush1.bf16.msra.mxu0 %v7440_v20  ;;  %v7451_v20 = vcombine.high %v5030_v46, %v5038_v47 }
0x10c9   : >> { %5440 = vmatprep.subr.bf16.mxu0 %v7461_v1  ;;  %v8305_v1 = vld [vmem:[%s8774_s26 + $0x70] sm:$0xff]  }
0x1183   : >> { %v4970_v51 = vpop.f32.mrf.mxu0 }
0x1184   : >> { %v4976_v61 = vadd.f32 %v8499_v60, %v4970_v51  ;;  %v5045_v51 = vld [vmem:[%s9327_s19 + $0xa8] sm:$0xff]  ;;  %v7442_v60 = vcombine.low %v5026_v5, %v5034_v6  ;;  %v8320_v5 = vld [vmem:[%s8774_s26 + $0x98] sm:$0xff]   ;;  %v8321_v6 = vld [vmem:[%s8774_s26 + $0x50] sm:$0xff]  }
0x1185   : >> { %v8243_v28 = vpop.f32.mrf.mxu0 }
0x1186   : >> { %v9317_v30 = vadd.f32 %v7432_v53, %v4976_v61  ;;  %v5053_v53 = vld [vmem:[%s9327_s19 + $0xe8] sm:$0xff]  ;;  %v7444_v61 = vcombine.low %v5027_v17, %v5035_v55  ;;  %v7463_v28 = vcombine.high %v5044_v27, %v5052_v50  ;;  %v8322_v17 = vld [vmem:[%s8774_s26 + $0xd0] sm:$0xff]  }
0x1187   : >> { %v4973_v31 = vpop.f32.mrf.mxu0  ;;  %v8323_v55 = vld [vmem:[%s8774_s26 + $0x10] sm:$0xff]  }
0x1188   : >> { %v4986_v32 = vsel %vm740_vm1, %v9317_v30, 0.0  ;;  %v7465_v31 = vcombine.high %v5045_v51, %v5053_v53 }
0x1189   : >> { %4987 = vadd.xlane.f32.xlu1 %v4986_v32  ;;  %v8244_v33 = vpop.f32.mrf.mxu0  ;;  %v5028_v32 = vld [vmem:[%s9327_s19 + $0x20] sm:$0xff] }
0x118a   : >> { %v5036_v33 = vld [vmem:[%s9327_s19 + $0x60] sm:$0xff] }
0x118b   : >> { %v7446_v35 = vcombine.low %v5028_v32, %v5036_v33 }
0x1212   : >> { %v4988_v34 = vpop.xlane.xlu1 %4987 }
0x1213   : >> { %v4989_v37 = vmul.f32 0.03125, %v4988_v34  ;;  %v5029_v34 = vld [vmem:[%s9327_s19 + $0x28] sm:$0xff] }
0x1215   : >> { %v4990_v38 = vsub.f32 %v9317_v30, %v4989_v37  ;;  %v5037_v37 = vld [vmem:[%s9327_s19 + $0x68] sm:$0xff] }
0x1216   : >> { %v7449_v40 = vcombine.high %v5029_v34, %v5037_v37  ;;  %v7448_v43 = vcombine.low %v5029_v34, %v5037_v37  ;;  %v5072_v34 = vsub.s32 2, %v9133_v54  ;;  %v9434_v37 = vld [vmem:[%s5057_s24] sm:$0xff] }
0x1217   : >> { %v4991_v39 = vmul.f32 %v4990_v38, %v4990_v38 }
0x1219   : >> { %v4992_v22 = vsel %vm740_vm1, %v4991_v39, 0.0  ;;  %v7464_v39 = vcombine.low %v5045_v51, %v5053_v53  ;;  %v8330_v51 = vld [vmem:[%s8774_s26 + $0xc0] sm:$0xff]  }
0x121a   : >> { %4993 = vadd.xlane.f32.xlu0 %v4992_v22  ;;  %v7447_v22 = vcombine.high %v5028_v32, %v5036_v33  ;;  %v8331_v53 = vld [vmem:[%s8774_s26] sm:$0xff]   ;;  %v9426_v32 = vld [vmem:[%s5057_s24 + $0x8] sm:$0xff]  ;;  %s9717_s24 = sld [smem:[#allocation10_spill]] (%p747_p4) }
0x12a3   : >> { %v4994_v26 = vpop.xlane.xlu0 %4993 }
0x12a4   : >> { %v4995_v2 = vmul.f32 0.032258064, %v4994_v26  ;;  %v8306_v26 = vld [vmem:[%s8774_s26 + $0xf0] sm:$0xff]  }
0x12a6   : >> { %8481 = vrsqrt.f32 %v4995_v2  ;;  %vm4998_vm8 = vcmp.eq.f32.partialorder %v4995_v2, inf  ;;  %v5001_v29 = vand.u32 2147483648, %v4995_v2  ;;  %vm5000_vm9 = vcmp.eq.f32.partialorder %v4995_v2, 0.0 }
0x12b3   : >> { %v8482_v8 = vpop.eup %8481 }
0x12b4   : >> { %v4997_v48 = vmul.f32 %v8482_v8, %v4995_v2  ;;  %v8309_v8 = vld [vmem:[%s8774_s26 + $0x68] sm:$0xff]  }
0x12b6   : >> { %v4999_v4 = vsel %vm4998_vm8, %v4995_v2, %v4997_v48  ;;  %v8308_v2 = vld [vmem:[%s8774_s26 + $0xb0] sm:$0xff]   ;;  %v8310_v48 = vld [vmem:[%s8774_s26 + $0xe8] sm:$0xff]  }
0x12b7   : >> { %v5002_v13 = vsel %vm5000_vm9, %v5001_v29, %v4999_v4  ;;  %v8311_v29 = vld [vmem:[%s8774_s26 + $0x28] sm:$0xff]  }
0x12b8   : >> { %v5003_v3 = vadd.f32 1e-06, %v5002_v13  ;;  %v8312_v4 = vld [vmem:[%s8774_s26 + $0xa8] sm:$0xff]   ;;  %v8313_v13 = vld [vmem:[%s8774_s26 + $0x60] sm:$0xff]  }
0x12ba   : >> { %8483 = vrcp.f32 %v5003_v3  ;;  %v8314_v3 = vld [vmem:[%s8774_s26 + $0xe0] sm:$0xff]  }
0x12c7   : >> { %v8484_v9 = vpop.eup %8483 }
0x12c8   : >> { %v5005_v24 = vmul.f32 %v8484_v9, %v4990_v38  ;;  %v7462_v38 = vcombine.low %v5044_v27, %v5052_v50  ;;  %v8315_v9 = vld [vmem:[%s8774_s26 + $0x20] sm:$0xff]   ;;  %v8328_v27 = vld [vmem:[%s8774_s26 + $0x88] sm:$0xff]  }
0x12c9   : >> { %v8329_v50 = vld [vmem:[%s8774_s26 + $0x40] sm:$0xff]  }
0x12ca   : >> { %v5012_v16 = vmul.f32 %v7433_v10, %v5005_v24  ;;  %v8316_v10 = vld [vmem:[%s8774_s26 + $0xa0] sm:$0xff]   ;;  %v8317_v24 = vld [vmem:[%s8774_s26 + $0x58] sm:$0xff]  }
0x12cc   : >> { %v5019_v18 = vadd.f32 %v7434_v11, %v5012_v16  ;;  %v8318_v11 = vld [vmem:[%s8774_s26 + $0xd8] sm:$0xff]  }
0x12cd   : >> { %v8319_v16 = vld [vmem:[%s8774_s26 + $0x18] sm:$0xff]  }
0x12ce   : >> { %v9347_v19 = vpack.c.bf16 %v5019_v18, %v5019_v18  ;;  %v8324_v18 = vld [vmem:[%s8774_s26 + $0x90] sm:$0xff]  }
0x12d0   : >> { %7470 = vmatmul.mubr.msk.bf16.vlgmr.msra.gmra.mxu1 %vm740_vm1, %v9347_v19  ;;  %7471 = vmatmul.mubr.msk.bf16.vlgmr.msra.gmra.mxu0 %vm740_vm1, %v9347_v19 }
0x12d1   : >> { %5400 = vmatpush1.bf16.msra.mxu1 %v7458_v63  ;;  %5441 = vmatpush1.bf16.msra.mxu0 %v7460_v0  ;;  %v8303_v63 = vld [vmem:[%s8774_s26 + $0x38] sm:$0xff]  }
0x12d2   : >> { %5401 = vmatprep.subr.bf16.mxu1 %v7443_v23  ;;  %5442 = vmatprep.subr.bf16.mxu0 %v7445_v25  ;;  %v8304_v0 = vld [vmem:[%s8774_s26 + $0xb8] sm:$0xff]   ;;  %v8326_v23 = vld [vmem:[%s8774_s26 + $0xc8] sm:$0xff]  }
0x12d3   : >> { %5419 = vmatprep.mubr.bf16.mxu1 %v8539_v57  ;;  %5460 = vmatprep.mubr.bf16.mxu0 %v8539_v57  ;;  %v8327_v25 = vld [vmem:[%s8774_s26 + $0x8] sm:$0xff]  }
0x12d5   : >> { %5402 = vmatpush1.bf16.msra.mxu1 %v7442_v60  ;;  %5443 = vmatpush1.bf16.msra.mxu0 %v7444_v61  ;;  %v8332_v60 = vld [vmem:[%s8774_s26 + $0x80] sm:$0xff]   ;;  %v8333_v61 = vld [vmem:[%s8774_s26 + $0x178] sm:$0xff]  }
0x12d6   : >> { %5481 = vmatprep.subr.bf16.mxu1 %v7463_v28  ;;  %5522 = vmatprep.subr.bf16.mxu0 %v7465_v31  ;;  %v8334_v28 = vld [vmem:[%s8774_s26 + $0x1f8] sm:$0xff]   ;;  %v5088_v31 = vsub.s32 6, %v9133_v54 }
0x12d8   : >> { %7472 = vmatmul.mubr.msk.bf16.vlgmr.msra.gmra.mxu1 %vm740_vm1, %v9347_v19  ;;  %7473 = vmatmul.mubr.msk.bf16.vlgmr.msra.gmra.mxu0 %vm740_vm1, %v9347_v19  ;;  %v9431_v33 = vrot.slane %v9426_v32, %v5088_v31 }
0x12d9   : >> { %5482 = vmatpush1.bf16.msra.mxu1 %v7462_v38  ;;  %5523 = vmatpush1.bf16.msra.mxu0 %v7464_v39  ;;  %v5068_v38 = vsub.s32 1, %v9133_v54  ;;  %v5076_v39 = vsub.s32 3, %v9133_v54 }
0x12da   : >> { %5483 = vmatprep.subr.bf16.mxu1 %v7447_v22  ;;  %5524 = vmatprep.subr.bf16.mxu0 %v7449_v40  ;;  %v5065_v22 = vrot.slane %v9434_v37, %v9136_v56  ;;  %v5073_v40 = vrot.slane %v9434_v37, %v5072_v34 }
0x12db   : >> { %5501 = vmatprep.mubr.bf16.mxu1 %v8539_v57  ;;  %5542 = vmatprep.mubr.bf16.mxu0 %v8539_v57  ;;  %v5069_v36 = vrot.slane %v9434_v37, %v5068_v38  ;;  %v5077_v41 = vrot.slane %v9434_v37, %v5076_v39 }
0x12dd   : >> { %5484 = vmatpush1.bf16.msra.mxu1 %v7446_v35  ;;  %5525 = vmatpush1.bf16.msra.mxu0 %v7448_v43 }
0x12de   : >> { %5563 = vmatprep.subr.bf16.mxu1 %v7467_v44  ;;  %5604 = vmatprep.subr.bf16.mxu0 %v7469_v45 }
0x12e0   : >> { %7474 = vmatmul.mubr.msk.bf16.vlgmr.msra.gmra.mxu1 %vm740_vm1, %v9347_v19  ;;  %7475 = vmatmul.mubr.msk.bf16.vlgmr.msra.gmra.mxu0 %vm740_vm1, %v9347_v19 }
0x12e1   : >> { %5564 = vmatpush1.bf16.msra.mxu1 %v7466_v14  ;;  %5605 = vmatpush1.bf16.msra.mxu0 %v7468_v15 }
0x12e2   : >> { %5565 = vmatprep.subr.bf16.mxu1 %v7451_v20  ;;  %5606 = vmatprep.subr.bf16.mxu0 %v7453_v21 }
0x12e3   : >> { %5583 = vmatprep.mubr.bf16.mxu1 %v8539_v57  ;;  %5624 = vmatprep.mubr.bf16.mxu0 %v8539_v57  ;;  %v8307_v57 = vld [vmem:[%s8774_s26 + $0x30] sm:$0xff]  }
0x12e5   : >> { %5566 = vmatpush1.bf16.msra.mxu1 %v7450_v58  ;;  %5607 = vmatpush1.bf16.msra.mxu0 %v7452_v59 }
0x12e6   : >> { %7749 = vmatprep.subr.bf16.mxu1 %v8301_v7  ;;  %7771 = vmatprep.subr.bf16.mxu0 %v8302_v62 }
0x12e8   : >> { %7476 = vmatmul.mubr.msk.bf16.vlgmr.msra.gmra.mxu1 %vm740_vm1, %v9347_v19  ;;  %7477 = vmatmul.mubr.msk.bf16.vlgmr.msra.gmra.mxu0 %vm740_vm1, %v9347_v19  ;;  %v8325_v19 = vld [vmem:[%s8774_s26 + $0x48] sm:$0xff]  }
0x12e9   : >> { %7750 = vmatpush3.bf16.msra.mxu1 %v8303_v63  ;;  %7772 = vmatpush3.bf16.msra.mxu0 %v8304_v0 }
0x12ea   : >> { %7751 = vmatprep.subr.bf16.mxu1 %v8305_v1  ;;  %7773 = vmatprep.subr.bf16.mxu0 %v8306_v26  ;;  %v5085_v1 = vrot.slane %v9434_v37, %v5084_v49  ;;  %v5093_v26 = vrot.slane %v9434_v37, %v5092_v12 }
0x12ed   : >> { %7752 = vmatpush3.bf16.msra.mxu1 %v8307_v57  ;;  %7774 = vmatpush3.bf16.msra.mxu0 %v8308_v2  ;;  %v8335_v57 = vld [vmem:[%s8774_s26 + $0x138] sm:$0xff]  }
0x12ee   : >> { %7753 = vmatprep.subr.bf16.mxu1 %v8309_v8  ;;  %7775 = vmatprep.subr.bf16.mxu0 %v8310_v48  ;;  %v8336_v2 = vld [vmem:[%s8774_s26 + $0x1b8] sm:$0xff]  }
0x12f1   : >> { %7754 = vmatpush3.bf16.msra.mxu1 %v8311_v29  ;;  %7776 = vmatpush3.bf16.msra.mxu0 %v8312_v4 }
0x12f2   : >> { %7755 = vmatprep.subr.bf16.mxu1 %v8313_v13  ;;  %7777 = vmatprep.subr.bf16.mxu0 %v8314_v3  ;;  %v8337_v13 = vld [vmem:[%s8774_s26 + $0x170] sm:$0xff]  }
0x12f3   : >> { %v8338_v3 = vld [vmem:[%s8774_s26 + $0x1f0] sm:$0xff]  }
0x12f5   : >> { %7756 = vmatpush3.bf16.msra.mxu1 %v8315_v9  ;;  %7778 = vmatpush3.bf16.msra.mxu0 %v8316_v10 }
0x12f6   : >> { %7757 = vmatprep.subr.bf16.mxu1 %v8317_v24  ;;  %7779 = vmatprep.subr.bf16.mxu0 %v8318_v11 }
0x12f9   : >> { %7758 = vmatpush3.bf16.msra.mxu1 %v8319_v16  ;;  %7780 = vmatpush3.bf16.msra.mxu0 %v8320_v5  ;;  %v8339_v16 = vld [vmem:[%s8774_s26 + $0x130] sm:$0xff]  }
0x12fa   : >> { %7759 = vmatprep.subr.bf16.mxu1 %v8321_v6  ;;  %7781 = vmatprep.subr.bf16.mxu0 %v8322_v17  ;;  %v8340_v5 = vld [vmem:[%s8774_s26 + $0x1b0] sm:$0xff]  }
0x12fd   : >> { %7760 = vmatpush3.bf16.msra.mxu1 %v8323_v55  ;;  %7782 = vmatpush3.bf16.msra.mxu0 %v8324_v18  ;;  %v8341_v55 = vld [vmem:[%s8774_s26 + $0x168] sm:$0xff]  }
0x12fe   : >> { %7761 = vmatprep.subr.bf16.mxu1 %v8325_v19  ;;  %7783 = vmatprep.subr.bf16.mxu0 %v8326_v23  ;;  %v8342_v18 = vld [vmem:[%s8774_s26 + $0x1e8] sm:$0xff]  }
0x1301   : >> { %7762 = vmatpush3.bf16.msra.mxu1 %v8327_v25  ;;  %7784 = vmatpush3.bf16.msra.mxu0 %v8328_v27 }
0x1302   : >> { %7763 = vmatprep.subr.bf16.mxu1 %v8329_v50  ;;  %7785 = vmatprep.subr.bf16.mxu0 %v8330_v51 }
0x1305   : >> { %7764 = vmatpush3.bf16.msra.mxu1 %v8331_v53  ;;  %7786 = vmatpush3.bf16.msra.mxu0 %v8332_v60  ;;  %v8343_v53 = vld [vmem:[%s8774_s26 + $0x128] sm:$0xff]  }
0x1306   : >> { %7793 = vmatprep.subr.bf16.mxu1 %v8333_v61  ;;  %7815 = vmatprep.subr.bf16.mxu0 %v8334_v28  ;;  %v8344_v60 = vld [vmem:[%s8774_s26 + $0x1a8] sm:$0xff]  }
0x1390   : >> { %v5339_v52 = vpop.f32.mrf.mxu1  ;;  %v5380_v42 = vpop.f32.mrf.mxu0 }
0x1391   : >> { %v5340_v35 = vadd.f32 %v5339_v52, %v5065_v22  ;;  %v5381_v43 = vadd.f32 %v5380_v42, %v5073_v40  ;;  %v8345_v22 = vld [vmem:[%s8774_s26 + $0x160] sm:$0xff]   ;;  %v5080_v52 = vsub.s32 4, %v9133_v54 }
0x1392   : >> { %v5341_v44 = vpop.f32.mrf.mxu1  ;;  %v5382_v45 = vpop.f32.mrf.mxu0  ;;  %v8346_v40 = vld [vmem:[%s8774_s26 + $0x1e0] sm:$0xff]  }
0x1393   : >> { %v5342_v46 = vadd.f32 %v5341_v44, %v5069_v36  ;;  %v5383_v47 = vadd.f32 %v5382_v45, %v5077_v41  ;;  %v5633_v14 = vmax.f32 %v5340_v35, 0.0  ;;  %v5635_v15 = vmax.f32 %v5381_v43, 0.0  ;;  %v8347_v42 = vld [vmem:[%s8774_s26 + $0x120] sm:$0xff]   ;;  %v8349_v45 = vld [vmem:[%s8774_s26 + $0x158] sm:$0xff]  }
0x1394   : >> { %v5343_v20 = vpop.f32.mrf.mxu1  ;;  %v5384_v21 = vpop.f32.mrf.mxu0  ;;  %v8348_v35 = vld [vmem:[%s8774_s26 + $0x1a0] sm:$0xff]  }
0x1395   : >> { %v5634_v58 = vmax.f32 %v5342_v46, 0.0  ;;  %v5636_v59 = vmax.f32 %v5383_v47, 0.0  ;;  %v5649_v8 = vpack.c.bf16 %v5633_v14, %v5633_v14  ;;  %v5651_v48 = vpack.c.bf16 %v5635_v15, %v5635_v15  ;;  %v8350_v46 = vld [vmem:[%s8774_s26 + $0x1d8] sm:$0xff]  }
0x1396   : >> { %v5344_v7 = vpop.f32.mrf.mxu1  ;;  %v5385_v62 = vpop.f32.mrf.mxu0  ;;  %v5113_v47 = vrot.slane %v9426_v32, %v5080_v52  ;;  %v8351_v20 = vld [vmem:[%s8774_s26 + $0x118] sm:$0xff]  }
0x1397   : >> { %v5650_v63 = vpack.c.bf16 %v5634_v58, %v5634_v58  ;;  %v5652_v0 = vpack.c.bf16 %v5636_v59, %v5636_v59  ;;  %v8352_v21 = vld [vmem:[%s8774_s26 + $0x198] sm:$0xff]   ;;  %v8353_v7 = vld [vmem:[%s8774_s26 + $0x150] sm:$0xff]  }
0x1398   : >> { %v9459_v29 = vpop.f32.mrf.mxu1  ;;  %v9461_v4 = vpop.f32.mrf.mxu0  ;;  %v8354_v62 = vld [vmem:[%s8774_s26 + $0x1d0] sm:$0xff]  }
0x1399   : >> { %6724 = vmatprep.mubr.bf16.mxu1 %v5650_v63  ;;  %6764 = vmatprep.mubr.bf16.mxu0 %v5652_v0 }
0x139a   : >> { %v5423_v9 = vpop.f32.mrf.mxu1  ;;  %v5464_v10 = vpop.f32.mrf.mxu0  ;;  %6725 = vmatmul.mubr.bf16.vlgmr.msra.gmra.mxu1 %v5649_v8  ;;  %6765 = vmatmul.mubr.bf16.vlgmr.msra.gmra.mxu0 %v5651_v48  ;;  %v5081_v8 = vrot.slane %v9434_v37, %v5080_v52  ;;  %v5089_v48 = vrot.slane %v9434_v37, %v5088_v31  ;;  %v8359_v31 = vld [vmem:[%s8774_s26 + $0x108] sm:$0xff]  }
0x139b   : >> { %v5424_v24 = vadd.f32 %v5423_v9, %v5085_v1  ;;  %v5465_v11 = vadd.f32 %v5464_v10, %v5093_v26  ;;  %7794 = vmatpush3.bf16.msra.mxu1 %v8335_v57  ;;  %7816 = vmatpush3.bf16.msra.mxu0 %v8336_v2  ;;  %v8355_v57 = vld [vmem:[%s8774_s26 + $0x110] sm:$0xff]   ;;  %v8358_v9 = vld [vmem:[%s8774_s26 + $0x1c8] sm:$0xff]   ;;  %v5101_v10 = vrot.slane %v9426_v32, %v5068_v38  ;;  %v8361_v38 = vld [vmem:[%s8774_s26 + $0x140] sm:$0xff]  }
0x139c   : >> { %v5425_v6 = vpop.f32.mrf.mxu1  ;;  %v5466_v17 = vpop.f32.mrf.mxu0  ;;  %7795 = vmatprep.subr.bf16.mxu1 %v8337_v13  ;;  %7817 = vmatprep.subr.bf16.mxu0 %v8338_v3  ;;  %v8356_v2 = vld [vmem:[%s8774_s26 + $0x190] sm:$0xff]   ;;  %v8360_v37 = vld [vmem:[%s8774_s26 + $0x188] sm:$0xff]  }
0x139d   : >> { %v5638_v19 = vmax.f32 %v5424_v24, 0.0  ;;  %v5640_v23 = vmax.f32 %v5465_v11, 0.0  ;;  %v5109_v24 = vrot.slane %v9426_v32, %v5076_v39  ;;  %v5463_v6 = vadd.f32 %v9461_v4, %v5089_v48  ;;  %v8362_v17 = vld [vmem:[%s8774_s26 + $0x1c0] sm:$0xff]   ;;  %v8366_v4 = vld [vmem:[%s8774_s26 + $0x2f8] sm:$0xff]   ;;  %v8388_v48 = vld [vmem:[%s8774_s26 + $0x290] sm:$0xff]  }
0x139e   : >> { %v5426_v25 = vpop.f32.mrf.mxu1  ;;  %v5467_v27 = vpop.f32.mrf.mxu0 }
0x139f   : >> { %v5654_v50 = vpack.c.bf16 %v5638_v19, %v5638_v19  ;;  %v5656_v51 = vpack.c.bf16 %v5640_v23, %v5640_v23  ;;  %7796 = vmatpush3.bf16.msra.mxu1 %v8339_v16  ;;  %7818 = vmatpush3.bf16.msra.mxu0 %v8340_v5  ;;  %v5422_v5 = vadd.f32 %v9459_v29, %v5081_v8  ;;  %v8364_v19 = vld [vmem:[%s8774_s26 + $0x180] sm:$0xff]   ;;  %v5639_v25 = vmax.f32 %v5463_v6, 0.0  ;;  %v8365_v29 = vld [vmem:[%s8774_s26 + $0x278] sm:$0xff]  }
0x13a0   : >> { %v9471_v61 = vpop.f32.mrf.mxu1  ;;  %v9473_v28 = vpop.f32.mrf.mxu0  ;;  %7797 = vmatprep.subr.bf16.mxu1 %v8341_v55  ;;  %7819 = vmatprep.subr.bf16.mxu0 %v8342_v18  ;;  %v8363_v18 = vld [vmem:[%s8774_s26 + $0x100] sm:$0xff]   ;;  %v5097_v8 = vrot.slane %v9426_v32, %v9136_v56  ;;  %v5125_v56 = vrot.slane %v9426_v32, %v5092_v12 }
0x13a1   : >> { %6804 = vmatprep.mubr.bf16.mxu1 %v5654_v50  ;;  %6844 = vmatprep.mubr.bf16.mxu0 %v5656_v51  ;;  %v5637_v23 = vmax.f32 %v5422_v5, 0.0  ;;  %v8367_v51 = vld [vmem:[%s8774_s26 + $0x238] sm:$0xff]  }
0x13a2   : >> { %v5505_v36 = vpop.f32.mrf.mxu1  ;;  %v5546_v41 = vpop.f32.mrf.mxu0 }
0x13a3   : >> { %7798 = vmatpush3.bf16.msra.mxu1 %v8343_v53  ;;  %7820 = vmatpush3.bf16.msra.mxu0 %v8344_v60  ;;  %v5506_v55 = vadd.f32 %v5505_v36, %v5101_v10  ;;  %v5547_v39 = vadd.f32 %v5546_v41, %v5109_v24  ;;  %v5653_v53 = vpack.c.bf16 %v5637_v23, %v5637_v23  ;;  %v8369_v36 = vld [vmem:[%s8774_s26 + $0x270] sm:$0xff]   ;;  %v8391_v10 = vld [vmem:[%s8774_s26 + $0x208] sm:$0xff]  }
0x13a4   : >> { %v5507_v43 = vpop.f32.mrf.mxu1  ;;  %v5548_v44 = vpop.f32.mrf.mxu0  ;;  %7799 = vmatprep.subr.bf16.mxu1 %v8345_v22  ;;  %7821 = vmatprep.subr.bf16.mxu0 %v8346_v40  ;;  %v5655_v60 = vpack.c.bf16 %v5639_v25, %v5639_v25  ;;  %v8368_v22 = vld [vmem:[%s8774_s26 + $0x2b8] sm:$0xff]   ;;  %v8370_v41 = vld [vmem:[%s8774_s26 + $0x2f0] sm:$0xff]   ;;  %v5504_v24 = vadd.f32 %v9471_v61, %v5097_v8  ;;  %v8396_v61 = vld [vmem:[%s8774_s26 + $0x280] sm:$0xff]  }
0x13a5   : >> { %v5642_v27 = vmax.f32 %v5506_v55, 0.0  ;;  %v5644_v50 = vmax.f32 %v5547_v39, 0.0  ;;  %v8373_v43 = vld [vmem:[%s8774_s26 + $0x268] sm:$0xff]   ;;  %v8401_v39 = vld [vmem:[%s8774_s26 + $0x370] sm:$0xff]  }
0x13a6   : >> { %v5508_v14 = vpop.f32.mrf.mxu1  ;;  %v5549_v15 = vpop.f32.mrf.mxu0  ;;  %v8374_v44 = vld [vmem:[%s8774_s26 + $0x2e8] sm:$0xff]   ;;  %v5641_v12 = vmax.f32 %v5504_v24, 0.0  ;;  %v8403_v25 = vld [vmem:[%s8774_s26 + $0x330] sm:$0xff]  }
0x13a7   : >> { %7800 = vmatpush3.bf16.msra.mxu1 %v8347_v42  ;;  %7822 = vmatpush3.bf16.msra.mxu0 %v8348_v35  ;;  %v5658_v40 = vpack.c.bf16 %v5642_v27, %v5642_v27  ;;  %v5660_v52 = vpack.c.bf16 %v5644_v50, %v5644_v50  ;;  %v8371_v42 = vld [vmem:[%s8774_s26 + $0x230] sm:$0xff]   ;;  %v8378_v14 = vld [vmem:[%s8774_s26 + $0x2e0] sm:$0xff]   ;;  %v8406_v27 = vld [vmem:[%s8774_s26 + $0x3e8] sm:$0xff]  }
0x13a8   : >> { %v5585_v58 = vpop.f32.mrf.mxu1  ;;  %v5626_v59 = vpop.f32.mrf.mxu0  ;;  %7801 = vmatprep.subr.bf16.mxu1 %v8349_v45  ;;  %7823 = vmatprep.subr.bf16.mxu0 %v8350_v46  ;;  %v8372_v35 = vld [vmem:[%s8774_s26 + $0x2b0] sm:$0xff]   ;;  %v8375_v45 = vld [vmem:[%s8774_s26 + $0x228] sm:$0xff]   ;;  %v8379_v15 = vld [vmem:[%s8774_s26 + $0x220] sm:$0xff]  }
0x13a9   : >> { %v9487_v63 = vadd.f32 %v5585_v58, %v5113_v47  ;;  %v9490_v0 = vadd.f32 %v5626_v59, %v9431_v33  ;;  %v8357_v33 = vld [vmem:[%s8774_s26 + $0x148] sm:$0xff]   ;;  %v8377_v47 = vld [vmem:[%s8774_s26 + $0x260] sm:$0xff]   ;;  %v8382_v58 = vld [vmem:[%s8774_s26 + $0x2d8] sm:$0xff]  }
0x13aa   : >> { %v9492_v1 = vpop.f32.mrf.mxu1  ;;  %v9494_v26 = vpop.f32.mrf.mxu0  ;;  %v8376_v46 = vld [vmem:[%s8774_s26 + $0x2a8] sm:$0xff]   ;;  %v8383_v59 = vld [vmem:[%s8774_s26 + $0x218] sm:$0xff]  }
0x13ab   : >> { %7802 = vmatpush3.bf16.msra.mxu1 %v8351_v20  ;;  %7824 = vmatpush3.bf16.msra.mxu0 %v8352_v21  ;;  %v8380_v20 = vld [vmem:[%s8774_s26 + $0x2a0] sm:$0xff]   ;;  %v8381_v21 = vld [vmem:[%s8774_s26 + $0x258] sm:$0xff]   ;;  %v8407_v50 = vld [vmem:[%s8774_s26 + $0x328] sm:$0xff]  }
0x13ac   : >> { %v5589_v13 = vpop.f32.mrf.mxu1  ;;  %v5630_v3 = vpop.f32.mrf.mxu0  ;;  %7803 = vmatprep.subr.bf16.mxu1 %v8353_v7  ;;  %7825 = vmatprep.subr.bf16.mxu0 %v8354_v62  ;;  %v8384_v7 = vld [vmem:[%s8774_s26 + $0x298] sm:$0xff]   ;;  %v8385_v62 = vld [vmem:[%s8774_s26 + $0x250] sm:$0xff]  }
0x13ad   : >> { %v8389_v13 = vld [vmem:[%s8774_s26 + $0x248] sm:$0xff]   ;;  %v5105_v3 = vrot.slane %v9426_v32, %v5072_v34 }
0x13ae   : >> { %v5590_v11 = vpop.f32.mrf.mxu1  ;;  %v5631_v16 = vpop.f32.mrf.mxu0  ;;  %v8392_v34 = vld [vmem:[%s8774_s26 + $0x288] sm:$0xff]  }
0x13af   : >> { %7804 = vmatpush3.bf16.msra.mxu1 %v8355_v57  ;;  %7826 = vmatpush3.bf16.msra.mxu0 %v8356_v2  ;;  %v8386_v57 = vld [vmem:[%s8774_s26 + $0x2d0] sm:$0xff]   ;;  %v8393_v11 = vld [vmem:[%s8774_s26 + $0x240] sm:$0xff]   ;;  %v5545_v16 = vadd.f32 %v9473_v28, %v5105_v3  ;;  %v8398_v28 = vld [vmem:[%s8774_s26 + $0x3f8] sm:$0xff]  }
0x13b0   : >> { %7805 = vmatprep.subr.bf16.mxu1 %v8357_v33  ;;  %7827 = vmatprep.subr.bf16.mxu0 %v8358_v9  ;;  %v8387_v2 = vld [vmem:[%s8774_s26 + $0x210] sm:$0xff]   ;;  %v8390_v33 = vld [vmem:[%s8774_s26 + $0x2c8] sm:$0xff]   ;;  %v5117_v9 = vrot.slane %v9426_v32, %v5084_v49  ;;  %v5629_v32 = vadd.f32 %v9494_v26, %v5125_v56  ;;  %v8395_v49 = vld [vmem:[%s8774_s26 + $0x200] sm:$0xff]  }
0x13b1   : >> { %v5643_v5 = vmax.f32 %v5545_v16, 0.0  ;;  %v8400_v26 = vld [vmem:[%s8774_s26 + $0x3b8] sm:$0xff]  }
0x13b2   : >> { %v5588_v54 = vadd.f32 %v9492_v1, %v5117_v9  ;;  %v8399_v1 = vld [vmem:[%s8774_s26 + $0x338] sm:$0xff]  }
0x13b3   : >> { %7806 = vmatpush3.bf16.msra.mxu1 %v8359_v31  ;;  %7828 = vmatpush3.bf16.msra.mxu0 %v8360_v37  ;;  %v8394_v31 = vld [vmem:[%s8774_s26 + $0x2c0] sm:$0xff]   ;;  %v8397_v37 = vld [vmem:[%s8774_s26 + $0x378] sm:$0xff]   ;;  %v5659_v55 = vpack.c.bf16 %v5643_v5, %v5643_v5 }
0x13b4   : >> { %7807 = vmatprep.subr.bf16.mxu1 %v8361_v38  ;;  %7829 = vmatprep.subr.bf16.mxu0 %v8362_v17  ;;  %v5646_v6 = vmax.f32 %v5588_v54, 0.0  ;;  %v5648_v38 = vmax.f32 %v5629_v32, 0.0  ;;  %v5657_v17 = vpack.c.bf16 %v5641_v12, %v5641_v12 }
0x13b6   : >> { %v5664_v23 = vpack.c.bf16 %v5648_v38, %v5648_v38 }
0x13b7   : >> { %7808 = vmatpush3.bf16.msra.mxu1 %v8363_v18  ;;  %7830 = vmatpush3.bf16.msra.mxu0 %v8364_v19  ;;  %v5662_v18 = vpack.c.bf16 %v5646_v6, %v5646_v6  ;;  %v8402_v19 = vld [vmem:[%s8774_s26 + $0x3f0] sm:$0xff]  }
0x13b8   : >> { %7837 = vmatprep.subr.bf16.mxu1 %v8365_v29  ;;  %7859 = vmatprep.subr.bf16.mxu0 %v8366_v4  ;;  %v8404_v29 = vld [vmem:[%s8774_s26 + $0x3b0] sm:$0xff]   ;;  %v8405_v4 = vld [vmem:[%s8774_s26 + $0x368] sm:$0xff]  }
0x13ba   : >> { %6805 = vmatmul.mubr.bf16.vlgmr.msra.gmra.mxu1 %v5653_v53  ;;  %6845 = vmatmul.mubr.bf16.vlgmr.msra.gmra.mxu0 %v5655_v60  ;;  %v8409_v53 = vld [vmem:[%s8774_s26 + $0x360] sm:$0xff]  }
0x13bb   : >> { %7838 = vmatpush3.bf16.msra.mxu1 %v8367_v51  ;;  %6884 = vmatprep.mubr.bf16.mxu1 %v5658_v40  ;;  %v8408_v51 = vld [vmem:[%s8774_s26 + $0x3a8] sm:$0xff]   ;;  %v8410_v60 = vld [vmem:[%s8774_s26 + $0x3e0] sm:$0xff]  }
0x13bc   : >> { %7860 = vmatpush3.bf16.msra.mxu0 %v8368_v22  ;;  %6924 = vmatprep.mubr.bf16.mxu0 %v5660_v52  ;;  %v8411_v22 = vld [vmem:[%s8774_s26 + $0x320] sm:$0xff]   ;;  %v8415_v52 = vld [vmem:[%s8774_s26 + $0x318] sm:$0xff]  }
0x13bd   : >> { %7839 = vmatprep.subr.bf16.mxu1 %v8369_v36  ;;  %7861 = vmatprep.subr.bf16.mxu0 %v8370_v41  ;;  %v8412_v40 = vld [vmem:[%s8774_s26 + $0x3a0] sm:$0xff]   ;;  %v8413_v36 = vld [vmem:[%s8774_s26 + $0x358] sm:$0xff]  }
0x13be   : >> { %v8414_v41 = vld [vmem:[%s8774_s26 + $0x3d8] sm:$0xff]  }
0x13bf   : >> { %7840 = vmatpush3.bf16.msra.mxu1 %v8371_v42  ;;  %v8416_v42 = vld [vmem:[%s8774_s26 + $0x398] sm:$0xff]  }
0x13c0   : >> { %7862 = vmatpush3.bf16.msra.mxu0 %v8372_v35  ;;  %7841 = vmatprep.subr.bf16.mxu1 %v8373_v43  ;;  %v8417_v35 = vld [vmem:[%s8774_s26 + $0x350] sm:$0xff]  }
0x13c1   : >> { %7863 = vmatprep.subr.bf16.mxu0 %v8374_v44  ;;  %v8418_v43 = vld [vmem:[%s8774_s26 + $0x3d0] sm:$0xff]  }
0x13c2   : >> { %v8419_v44 = vld [vmem:[%s8774_s26 + $0x310] sm:$0xff]  }
0x13c3   : >> { %7842 = vmatpush3.bf16.msra.mxu1 %v8375_v45  ;;  %v8420_v45 = vld [vmem:[%s8774_s26 + $0x390] sm:$0xff]  }
0x13c4   : >> { %7864 = vmatpush3.bf16.msra.mxu0 %v8376_v46  ;;  %7843 = vmatprep.subr.bf16.mxu1 %v8377_v47  ;;  %v8421_v46 = vld [vmem:[%s8774_s26 + $0x348] sm:$0xff]  }
0x13c5   : >> { %7865 = vmatprep.subr.bf16.mxu0 %v8378_v14  ;;  %v8422_v47 = vld [vmem:[%s8774_s26 + $0x3c8] sm:$0xff]  }
0x13c6   : >> { %v8423_v14 = vld [vmem:[%s8774_s26 + $0x308] sm:$0xff]  }
0x13c7   : >> { %7844 = vmatpush3.bf16.msra.mxu1 %v8379_v15  ;;  %v8424_v15 = vld [vmem:[%s8774_s26 + $0x388] sm:$0xff]  }
0x13c8   : >> { %7866 = vmatpush3.bf16.msra.mxu0 %v8380_v20  ;;  %7845 = vmatprep.subr.bf16.mxu1 %v8381_v21  ;;  %v8425_v20 = vld [vmem:[%s8774_s26 + $0x340] sm:$0xff]  }
0x13c9   : >> { %7867 = vmatprep.subr.bf16.mxu0 %v8382_v58  ;;  %v8426_v21 = vld [vmem:[%s8774_s26 + $0x3c0] sm:$0xff]  }
0x13ca   : >> { %v8427_v58 = vld [vmem:[%s8774_s26 + $0x300] sm:$0xff]  }
0x13cb   : >> { %7846 = vmatpush3.bf16.msra.mxu1 %v8383_v59  ;;  %v5645_v59 = vmax.f32 %v9487_v63, 0.0 }
0x13cc   : >> { %7868 = vmatpush3.bf16.msra.mxu0 %v8384_v7  ;;  %7847 = vmatprep.subr.bf16.mxu1 %v8385_v62  ;;  %v8428_v7 = vld [vmem:[%s8774_s26 + $0x380] sm:$0xff]   ;;  %v5647_v62 = vmax.f32 %v9490_v0, 0.0 }
0x13cd   : >> { %7869 = vmatprep.subr.bf16.mxu0 %v8386_v57  ;;  %v5661_v57 = vpack.c.bf16 %v5645_v59, %v5645_v59 }
0x13cf   : >> { %7848 = vmatpush3.bf16.msra.mxu1 %v8387_v2  ;;  %v5663_v2 = vpack.c.bf16 %v5647_v62, %v5647_v62 }
0x13d0   : >> { %7870 = vmatpush3.bf16.msra.mxu0 %v8388_v48  ;;  %7849 = vmatprep.subr.bf16.mxu1 %v8389_v13 }
0x13d1   : >> { %7871 = vmatprep.subr.bf16.mxu0 %v8390_v33 }
0x13d3   : >> { %7850 = vmatpush3.bf16.msra.mxu1 %v8391_v10 }
0x13d4   : >> { %7872 = vmatpush3.bf16.msra.mxu0 %v8392_v34  ;;  %7851 = vmatprep.subr.bf16.mxu1 %v8393_v11 }
0x13d5   : >> { %7873 = vmatprep.subr.bf16.mxu0 %v8394_v31 }
0x13d7   : >> { %7852 = vmatpush3.bf16.msra.mxu1 %v8395_v49 }
0x13d8   : >> { %7874 = vmatpush3.bf16.msra.mxu0 %v8396_v61  ;;  %7881 = vmatprep.subr.bf16.mxu1 %v8397_v37 }
0x13d9   : >> { %7903 = vmatprep.subr.bf16.mxu0 %v8398_v28 }
0x13da   : >> { %6885 = vmatmul.mubr.bf16.vlgmr.msra.gmra.mxu1 %v5657_v17 }
0x13db   : >> { %6925 = vmatmul.mubr.bf16.vlgmr.msra.gmra.mxu0 %v5659_v55  ;;  %7882 = vmatpush3.bf16.msra.mxu1 %v8399_v1 }
0x13dc   : >> { %6964 = vmatprep.mubr.bf16.mxu1 %v5662_v18  ;;  %7904 = vmatpush3.bf16.msra.mxu0 %v8400_v26 }
0x13dd   : >> { %7004 = vmatprep.mubr.bf16.mxu0 %v5664_v23  ;;  %7883 = vmatprep.subr.bf16.mxu1 %v8401_v39 }
0x13de   : >> { %7905 = vmatprep.subr.bf16.mxu0 %v8402_v19 }
0x13df   : >> { %7884 = vmatpush3.bf16.msra.mxu1 %v8403_v25 }
0x13e0   : >> { %7906 = vmatpush3.bf16.msra.mxu0 %v8404_v29  ;;  %7885 = vmatprep.subr.bf16.mxu1 %v8405_v4 }
0x13e1   : >> { %7907 = vmatprep.subr.bf16.mxu0 %v8406_v27 }
0x13e3   : >> { %7886 = vmatpush3.bf16.msra.mxu1 %v8407_v50 }
0x13e4   : >> { %7908 = vmatpush3.bf16.msra.mxu0 %v8408_v51  ;;  %7887 = vmatprep.subr.bf16.mxu1 %v8409_v53 }
0x13e5   : >> { %7909 = vmatprep.subr.bf16.mxu0 %v8410_v60 }
0x13e7   : >> { %7888 = vmatpush3.bf16.msra.mxu1 %v8411_v22 }
0x13e8   : >> { %7910 = vmatpush3.bf16.msra.mxu0 %v8412_v40  ;;  %7889 = vmatprep.subr.bf16.mxu1 %v8413_v36 }
0x13e9   : >> { %7911 = vmatprep.subr.bf16.mxu0 %v8414_v41 }
0x13eb   : >> { %7890 = vmatpush3.bf16.msra.mxu1 %v8415_v52 }
0x13ec   : >> { %7912 = vmatpush3.bf16.msra.mxu0 %v8416_v42  ;;  %7891 = vmatprep.subr.bf16.mxu1 %v8417_v35  ;;  %v7608_v35 = vld [vmem:[%s7013_s25] ss:$0 sm:$0xff]  ;;  %s9722_s25 = scalar_lea.vmem (%p747_p4), %s9688_s22, %s8676_s29 }
0x13ed   : >> { %7913 = vmatprep.subr.bf16.mxu0 %v8418_v43 }
0x13ef   : >> { %7892 = vmatpush3.bf16.msra.mxu1 %v8419_v44 }
0x13f0   : >> { %7914 = vmatpush3.bf16.msra.mxu0 %v8420_v45  ;;  %7893 = vmatprep.subr.bf16.mxu1 %v8421_v46 }
0x13f1   : >> { %7915 = vmatprep.subr.bf16.mxu0 %v8422_v47  ;;  %v7611_v47 = vld [vmem:[%s9716_s2] ss:$0 sm:$0xff] (%p747_p4) }
0x13f3   : >> { %7894 = vmatpush3.bf16.msra.mxu1 %v8423_v14  ;;  %v7024_v14 = vld [vmem:[%s8690_s27] sm:$0xff] (%p747_p4) }
0x13f4   : >> { %7916 = vmatpush3.bf16.msra.mxu0 %v8424_v15  ;;  %7895 = vmatprep.subr.bf16.mxu1 %v8425_v20  ;;  %v7612_v20 = vld [vmem:[%s9717_s24] ss:$0 sm:$0xff] (%p747_p4) }
0x13f5   : >> { %7917 = vmatprep.subr.bf16.mxu0 %v8426_v21  ;;  %v7080_v21 = vmul.f32 (%p747_p4), %v7612_v20, %v7024_v14 }
0x13f7   : >> { %7896 = vmatpush3.bf16.msra.mxu1 %v8427_v58  ;;  %v7081_v58 = vsel (%p747_p4), %vm740_vm1, %v7080_v21, 0.0 }
0x13f8   : >> { %7918 = vmatpush3.bf16.msra.mxu0 %v8428_v7 }
0x13fa   : >> { %6965 = vmatmul.mubr.bf16.vlgmr.msra.gmra.mxu1 %v5661_v57 }
0x13fb   : >> { %7005 = vmatmul.mubr.bf16.vlgmr.msra.gmra.mxu0 %v5663_v2 }
0x145a   : >> { %v7765_v8 = vpop.f32.mrf.mxu1  ;;  %v7787_v48 = vpop.f32.mrf.mxu0 }
0x145c   : >> { %v7766_v13 = vpop.f32.mrf.mxu1  ;;  %v7788_v3 = vpop.f32.mrf.mxu0 }
0x145d   : >> { %v7767_v33 = vadd.f32 %v7766_v13, %v7765_v8  ;;  %v7789_v9 = vadd.f32 %v7788_v3, %v7787_v48  ;;  %v7615_v8 = vld [vmem:[%s9716_s2 + $0x1] ss:$0 sm:$0xff] (%p747_p4) }
0x145e   : >> { %v7768_v56 = vpop.f32.mrf.mxu1  ;;  %v7790_v63 = vpop.f32.mrf.mxu0  ;;  %v7126_v3 = vld [vmem:[%s729_s30] sm:$0xff] (%p747_p4) }
0x145f   : >> { %v6767_v10 = vadd.f32 %v7789_v9, %v7767_v33  ;;  %v7128_v33 = vsub.f32 (%p747_p4), 1.0, %v7126_v3  ;;  %v7613_v9 = vld [vmem:[%s9719_s4] ss:$0 sm:$0xff] (%p747_p4) }
0x1460   : >> { %v7769_v24 = vpop.f32.mrf.mxu1  ;;  %v7791_v34 = vpop.f32.mrf.mxu0 }
0x147a   : >> { %v7809_v11 = vpop.f32.mrf.mxu1  ;;  %v7831_v0 = vpop.f32.mrf.mxu0 }
0x147c   : >> { %v7810_v16 = vpop.f32.mrf.mxu1  ;;  %v7832_v31 = vpop.f32.mrf.mxu0 }
0x147d   : >> { %v7811_v26 = vadd.f32 %v7810_v16, %v7809_v11  ;;  %v7833_v39 = vadd.f32 %v7832_v31, %v7831_v0 }
0x147e   : >> { %v7812_v54 = vpop.f32.mrf.mxu1  ;;  %v7834_v32 = vpop.f32.mrf.mxu0 }
0x147f   : >> { %v6807_v55 = vadd.f32 %v7811_v26, %v6767_v10  ;;  %v7129_v10 = vmul.f32 (%p747_p4), -1e+30, %v7128_v33 }
0x1480   : >> { %v7813_v49 = vpop.f32.mrf.mxu1  ;;  %v7835_v12 = vpop.f32.mrf.mxu0 }
0x1481   : >> { %v6847_v19 = vadd.f32 %v7833_v39, %v6807_v55 }
0x149a   : >> { %v7853_v61 = vpop.f32.mrf.mxu1 }
0x149b   : >> { %v7875_v37 = vpop.f32.mrf.mxu0 }
0x149c   : >> { %v7854_v5 = vpop.f32.mrf.mxu1 }
0x149d   : >> { %v7876_v28 = vpop.f32.mrf.mxu0  ;;  %v7855_v18 = vadd.f32 %v7854_v5, %v7853_v61 }
0x149e   : >> { %v7856_v6 = vpop.f32.mrf.mxu1  ;;  %v7877_v29 = vadd.f32 %v7876_v28, %v7875_v37 }
0x149f   : >> { %v7878_v38 = vpop.f32.mrf.mxu0  ;;  %v6887_v23 = vadd.f32 %v7855_v18, %v6847_v19 }
0x14a0   : >> { %v7857_v1 = vpop.f32.mrf.mxu1 }
0x14a1   : >> { %v7879_v17 = vpop.f32.mrf.mxu0  ;;  %v6927_v50 = vadd.f32 %v7877_v29, %v6887_v23 }
0x14ba   : >> { %v7897_v25 = vpop.f32.mrf.mxu1 }
0x14bb   : >> { %v7919_v4 = vpop.f32.mrf.mxu0 }
0x14bc   : >> { %v7898_v27 = vpop.f32.mrf.mxu1 }
0x14bd   : >> { %v7899_v51 = vadd.f32 %v7898_v27, %v7897_v25  ;;  %v7920_v53 = vpop.f32.mrf.mxu0 }
0x14be   : >> { %v7900_v60 = vpop.f32.mrf.mxu1  ;;  %v7921_v40 = vadd.f32 %v7920_v53, %v7919_v4 }
0x14bf   : >> { %v6967_v22 = vadd.f32 %v7899_v51, %v6927_v50  ;;  %v7922_v36 = vpop.f32.mrf.mxu0 }
0x14c0   : >> { %v7901_v41 = vpop.f32.mrf.mxu1  ;;  %v7610_v36 = vld [vmem:[%s9721_s5] ss:$0 sm:$0xff] (%p747_p4) }
0x14c1   : >> { %v7007_v52 = vadd.f32 %v7921_v40, %v6967_v22  ;;  %v7923_v42 = vpop.f32.mrf.mxu0  ;;  %v7609_v22 = vld [vmem:[%s9720_s23] ss:$0 sm:$0xff] (%p747_p4) }
0x14c3   : >> { %v7012_v43 = vadd.f32 %v7007_v52, %v9317_v30  ;;  %749 = sbr.rel (!%p747_p4) target bundleno = 27 (0x1b), region = 177  ;;  %v7023_v30 = vld [vmem:[%s718_s6] sm:$0xff] (%p747_p4) }
0x14c4   : > { %v7070_v15 = vmul.f32 (%p747_p4), %v7611_v47, %v7023_v30  ;;  %v7101_v48 = vmul.f32 (%p747_p4), %v7615_v8, %v7023_v30  ;;  %v7617_v52 = vld [vmem:[%s9717_s24 + $0x1] ss:$0 sm:$0xff] (%p747_p4) }
0x14c5   : >> { %v7021_v44 = vadd.f32 %v7608_v35, %v7012_v43 }
0x14c6   : > { %7071 = vadd.xlane.f32.xlu1 (%p747_p4), %v7070_v15 }
0x14c7   : >> { %7022 = vst.msk [vmem:[#allocation2] sm:$0xff] %vm740_vm1, %v7021_v44 }
0x14ca   : > { %7082 = vadd.xlane.f32.xlu1 %v7081_v58 }
0x14ce   : > { %v7025_v45 = vld [vmem:[#allocation2] sm:$0xff] }
0x14cf   : > { %v7028_v46 = vsel %vm740_vm1, %v7025_v45, 0.0 }
0x14d0   : > { %7029 = vadd.xlane.f32.xlu0 %v7028_v46 }
0x154f   : > { %v7072_v13 = vpop.xlane.xlu1 %7071 }
0x1553   : > { %v7083_v56 = vpop.xlane.xlu1 %7082 }
0x1554   : > { %v7084_v63 = vadd.f32 %v7083_v56, %v7072_v13 }
0x1556   : > { %v7092_v24 = vadd.f32 %v7613_v9, %v7084_v63 }
0x1558   : > { %v7127_v34 = vmul.f32 %v7126_v3, %v7092_v24 }
0x1559   : > { %v7030_v59 = vpop.xlane.xlu0 %7029 }
0x155a   : > { %v7032_v7 = vmul.f32 0.03125, %v7030_v59  ;;  %v7130_v11 = vadd.f32 %v7129_v10, %v7127_v34 }
0x155c   : > { %v7033_v62 = vsub.f32 %v7025_v45, %v7032_v7  ;;  %v7132_v0 = vsel %vm7131_vm10, %v7130_v11, -inf  ;;  %v7619_v45 = vld [vmem:[%s9719_s4 + $0x1] ss:$0 sm:$0xff] }
0x155d   : > { %v7133_v16 = vrot.slane %v7132_v0, 4 }
0x155e   : > { %v7034_v57 = vmul.f32 %v7033_v62, %v7033_v62 }
0x155f   : > { %v7134_v31 = vmax.f32 %v7132_v0, %v7133_v16 }
0x1560   : > { %v7035_v2 = vsel %vm740_vm1, %v7034_v57, 0.0 }
0x1561   : > { %7036 = vadd.xlane.f32.xlu0 %v7035_v2  ;;  %v7135_v54 = vrot.slane %v7134_v31, 2 }
0x1563   : > { %v7136_v32 = vmax.f32 %v7134_v31, %v7135_v54 }
0x1565   : > { %7102 = vadd.xlane.f32.xlu0 %v7101_v48  ;;  %v7137_v49 = vrot.slane %v7136_v32, 1 }
0x1567   : > { %v7138_v12 = vmax.f32 %v7136_v32, %v7137_v49 }
0x1569   : > { %v7139_v61 = vsub.f32 %v7130_v11, %v7138_v12 }
0x156b   : > { %v7140_v37 = vmul.f32 1.442695, %v7139_v61 }
0x156d   : > { %8500 = vpow2.f32 %v7140_v37 }
0x157a   : > { %v8501_v5 = vpop.eup %8500 }
0x157b   : > { %v7142_v28 = vsel %vm7131_vm10, %v8501_v5, 0.0 }
0x157c   : > { %v7143_v6 = vrot.slane %v7142_v28, 4 }
0x157e   : > { %v7144_v38 = vadd.f32 %v7143_v6, %v7142_v28 }
0x1580   : > { %v7145_v1 = vrot.slane %v7144_v38, 2 }
0x1582   : > { %v7146_v17 = vadd.f32 %v7145_v1, %v7144_v38 }
0x1584   : > { %v7147_v26 = vrot.slane %v7146_v17, 1 }
0x1586   : > { %v7148_v55 = vadd.f32 %v7147_v26, %v7146_v17 }
0x1588   : > { %8502 = vlog2.f32 %v7148_v55 }
0x1595   : > { %v8503_v39 = vpop.eup %8502 }
0x1596   : > { %v7150_v18 = vmul.f32 0.6931472, %v8503_v39 }
0x1598   : > { %v7151_v19 = vsub.f32 %v7139_v61, %v7150_v18 }
0x159a   : > { %7152 = vst.msk [vmem:[%s733_s16] sm:$0xff] %vm7131_vm10, %v7151_v19 }
0x15ea   : > { %v7037_v23 = vpop.xlane.xlu0 %7036 }
0x15eb   : > { %v7038_v25 = vmul.f32 0.032258064, %v7037_v23 }
0x15ed   : > { %8504 = vrsqrt.f32 %v7038_v25  ;;  %vm7041_vm11 = vcmp.eq.f32.partialorder %v7038_v25, inf  ;;  %v7044_v27 = vand.u32 2147483648, %v7038_v25  ;;  %vm7043_vm12 = vcmp.eq.f32.partialorder %v7038_v25, 0.0 }
0x15ee   : > { %v7103_v44 = vpop.xlane.xlu0 %7102 }
0x15fa   : > { %v8505_v29 = vpop.eup %8504 }
0x15fb   : > { %v7040_v4 = vmul.f32 %v8505_v29, %v7038_v25 }
0x15fd   : > { %v7042_v50 = vsel %vm7041_vm11, %v7038_v25, %v7040_v4 }
0x15fe   : > { %v7045_v51 = vsel %vm7043_vm12, %v7044_v27, %v7042_v50 }
0x15ff   : > { %v7046_v53 = vadd.f32 1e-06, %v7045_v51 }
0x1601   : > { %8506 = vrcp.f32 %v7046_v53 }
0x160e   : > { %v8507_v60 = vpop.eup %8506 }
0x160f   : > { %v7048_v40 = vmul.f32 %v8507_v60, %v7033_v62 }
0x1611   : > { %v7055_v41 = vmul.f32 %v7609_v22, %v7048_v40 }
0x1613   : > { %v7062_v42 = vadd.f32 %v7610_v36, %v7055_v41 }
0x1615   : > { %v7112_v35 = vmul.f32 %v7617_v52, %v7062_v42 }
0x1617   : > { %v7113_v43 = vsel %vm740_vm1, %v7112_v35, 0.0 }
0x1618   : > { %7114 = vadd.xlane.f32.xlu1 %v7113_v43 }
0x16a1   : > { %v7115_v46 = vpop.xlane.xlu1 %7114 }
0x16a2   : > { %v7116_v30 = vadd.f32 %v7115_v46, %v7103_v44 }
0x16a4   : > { %v7125_v47 = vadd.f32 %v7619_v45, %v7116_v30 }
0x16a6   : > { %v7153_v14 = vmul.f32 %v7126_v3, %v7125_v47 }
0x16a8   : > { %v7154_v15 = vadd.f32 %v7153_v14, %v7129_v10 }
0x16aa   : > { %v7155_v20 = vsel %vm7131_vm10, %v7154_v15, -inf }
0x16ab   : > { %v7156_v21 = vrot.slane %v7155_v20, 4 }
0x16ad   : > { %v7157_v58 = vmax.f32 %v7155_v20, %v7156_v21 }
0x16af   : > { %v7158_v59 = vrot.slane %v7157_v58, 2 }
0x16b1   : > { %v7159_v7 = vmax.f32 %v7157_v58, %v7158_v59 }
0x16b3   : > { %v7160_v62 = vrot.slane %v7159_v7, 1 }
0x16b5   : > { %v7161_v57 = vmax.f32 %v7159_v7, %v7160_v62 }
0x16b7   : > { %v7162_v2 = vsub.f32 %v7154_v15, %v7161_v57 }
0x16b9   : > { %v7163_v8 = vmul.f32 1.442695, %v7162_v2 }
0x16bb   : > { %8508 = vpow2.f32 %v7163_v8 }
0x16c8   : > { %v8509_v48 = vpop.eup %8508 }
0x16c9   : > { %v7165_v13 = vsel %vm7131_vm10, %v8509_v48, 0.0 }
0x16ca   : > { %v7166_v33 = vrot.slane %v7165_v13, 4 }
0x16cc   : > { %v7167_v9 = vadd.f32 %v7166_v33, %v7165_v13 }
0x16ce   : > { %v7168_v56 = vrot.slane %v7167_v9, 2 }
0x16d0   : > { %v7169_v3 = vadd.f32 %v7168_v56, %v7167_v9 }
0x16d2   : > { %v7170_v63 = vrot.slane %v7169_v3, 1 }
0x16d4   : > { %v7171_v10 = vadd.f32 %v7170_v63, %v7169_v3 }
0x16d6   : > { %8510 = vlog2.f32 %v7171_v10 }
0x16e3   : > { %v8511_v24 = vpop.eup %8510 }
0x16e4   : > { %v7173_v34 = vmul.f32 0.6931472, %v8511_v24 }
0x16e6   : > { %v7174_v11 = vsub.f32 %v7162_v2, %v7173_v34 }
0x16e8   : > { %7175 = vst.msk [vmem:[%s9722_s25] sm:$0xff] %vm7131_vm10, %v7174_v11 }
0x16e9 PF: > { %s9723_s30 = sld [smem:[#allocation4_spill]] }
0x16ef   : > { %s33_s3 = sadd.s32 1, %s9723_s30  }
0x16f0   : > { %p30_p5 = scmp.ge.s32.totalorder %s33_s3, 4  }
0x16f2   :  { %32 = sbr.rel (!%p30_p5) target bundleno = 12 (0xc), region = 188 }

</bundles_post_ra>
